<compile_context>
chip_gen: v7x
topology: tpu7x:2x2x1
jax: 0.10.0
libtpu: 0.0.40
codegen_flags: <defaults>
</compile_context>

<pallas_src>
import functools

import jax
import jax.numpy as jnp
from jax.experimental import pallas as pl
from jax.experimental.pallas import tpu as pltpu


# ---------------------------------------------------------------------------
# PositionEmbeddding1D  (plain JAX glue; parameter-free, deterministic)
# ---------------------------------------------------------------------------
def position_embedding_1d(L, E, temperature=10000.0):
    # matches PositionEmbeddding1D.forward with N=1, normalize=False
    pos = jnp.cumsum(jnp.ones((1, L), jnp.float32), axis=1)          # (1, L)
    dim_t = jnp.arange(E, dtype=jnp.float32)
    dim_t = temperature ** (2.0 * jnp.floor(dim_t / 2.0) / E)        # (E,)
    pe = pos[:, :, None] / dim_t                                     # (1, L, E)
    pe = jnp.stack((jnp.sin(pe[:, :, 0::2]), jnp.cos(pe[:, :, 1::2])), axis=3)
    pe = pe.reshape(1, L, E)                                         # flatten(2)
    pe = jnp.transpose(pe, (1, 0, 2))                                # (L, 1, E)
    return pe[:, 0, :]                                               # (L, E)


# ---------------------------------------------------------------------------
# Pallas kernel: preprocess_batch_discrete_round hot path (+ fused permute)
# ---------------------------------------------------------------------------
def _preprocess_kernel(packed_ref, emb_ref, out_ref, *, H, W, p_chunk, compute_dtype):
    # packed_ref: (T, N, 3) f32   last dim: 0 = x, 1 = y, 2 = visibility
    # emb_ref:    (N, D)    f32   shared across all T frames (MXU LHS stays resident)
    # out_ref:    (T, D, Pc) f32  lane-dense output chunk (Pc multiple of 128)
    T, N, _ = packed_ref.shape

    # pixel indices covered by this P chunk (built once, (N, Pc) only)
    p0 = pl.multiple_of(pl.program_id(1) * p_chunk, 128)
    pix = jax.lax.broadcasted_iota(jnp.int32, (N, p_chunk), 1) + p0   # (N, Pc)

    emb = emb_ref[...].astype(compute_dtype)                          # (N, D)

    def body(t, carry):
        row = packed_ref[t]                                           # (N, 3)
        x = row[:, 0:1]                                               # (N, 1)
        y = row[:, 1:2]
        vis = row[:, 2:3]

        xr = jnp.round(x)                                             # round-half-even == torch.round
        yr = jnp.round(y)
        in_frame = ((xr >= 0.0) & (xr < float(W)) &
                    (yr >= 0.0) & (yr < float(H)))                    # (N, 1)
        vis_m = jnp.where(in_frame, vis, 0.0)                         # (N, 1)

        xi = jnp.clip(xr, 0.0, float(W - 1)).astype(jnp.int32)
        yi = jnp.clip(yr, 0.0, float(H - 1)).astype(jnp.int32)
        lin = yi * W + xi                                             # (N, 1)

        # visibility folded straight into the one-hot: one select, no (T,N,D) intermediate
        w = jnp.where(pix == lin, vis_m, 0.0).astype(compute_dtype)   # (N, Pc)

        # scatter-add == emb^T @ w  -> (D, Pc) on the MXU (contraction over N)
        out_t = jax.lax.dot_general(
            emb, w,
            dimension_numbers=(((0,), (0,)), ((), ())),
            preferred_element_type=jnp.float32)                       # (D, Pc)
        out_ref[t] = out_t.astype(out_ref.dtype)
        return carry

    jax.lax.fori_loop(0, T, body, 0, unroll=True)


def preprocess_batch_discrete_round(p_track, p_visibility, emb_selected, H, W,
                                    model_dim, *, p_chunk=None, compute_dtype=None):
    """
    Args:
      p_track:      (B, T, N, 2) float32  (x, y)
      p_visibility: (B, T, N)    float32
      emb_selected: (B, N, D)    float32  point_embedding[random_idx]
      p_chunk:      pixel-chunk size (multiple of 128 dividing H*W).
                    Default: min(P, 2048) -> safe on v7x's 64 MiB VMEM;
                    pass 4096-8192 on v5e/v6e for fewer, larger steps.
      compute_dtype: matmul operand dtype. Default f32 for small P (bit parity),
                    bf16 once P reaches production scale (one-hot exact in bf16).
    Returns:
      x: (B, T, D, H, W) float32   (permute already fused in-kernel)
    """
    B, T, N, _ = p_track.shape
    D = model_dim
    P = H * W

    if p_chunk is None:
        p_chunk = P if P <= 2048 else 2048
    assert P % p_chunk == 0, (P, p_chunk)
    assert p_chunk == P or p_chunk % 128 == 0, p_chunk
    n_chunks = P // p_chunk

    if compute_dtype is None:
        compute_dtype = jnp.float32 if P < 4096 else jnp.bfloat16

    # Pack x / y / vis as (B, T, N, 3): per-point scalars slice out as (N, 1)
    # sublane vectors inside the kernel (no lane<->sublane relayout).
    packed = jnp.stack(
        [p_track[..., 0].astype(jnp.float32),
         p_track[..., 1].astype(jnp.float32),
         p_visibility.astype(jnp.float32)],
        axis=-1)                                                      # (B, T, N, 3)
    emb_selected = emb_selected.astype(jnp.float32)                   # (B, N, D)

    # VMEM budget: double-buffered blocks + one-hot slab + matmul result, with headroom.
    est = 4 * 2 * (T * N * 3 + N * D + T * D * p_chunk)               # pipelined blocks
    est += 4 * 2 * (N * p_chunk + D * p_chunk)                        # in-kernel temporaries
    vmem_limit = int(min(96 * 1024 * 1024, max(32 * 1024 * 1024, 2 * est)))

    kernel = functools.partial(_preprocess_kernel, H=H, W=W,
                               p_chunk=p_chunk, compute_dtype=compute_dtype)

    feat_tdp = pl.pallas_call(
        kernel,
        out_shape=jax.ShapeDtypeStruct((B, T, D, P), jnp.float32),
        grid_spec=pltpu.PrefetchScalarGridSpec(
            num_scalar_prefetch=0,
            grid=(B, n_chunks),
            in_specs=[
                pl.BlockSpec((None, T, N, 3), lambda b, pc: (b, 0, 0, 0)),
                pl.BlockSpec((None, N, D), lambda b, pc: (b, 0, 0)),
            ],
            out_specs=pl.BlockSpec((None, T, D, p_chunk),
                                   lambda b, pc: (b, 0, 0, pc)),
        ),
        compiler_params=pltpu.CompilerParams(
            # all (b, pc) blocks are independent -> both axes parallel (megacore)
            dimension_semantics=("parallel", "parallel"),
            vmem_limit_bytes=vmem_limit),
    )(packed, emb_selected)

    return feat_tdp.reshape(B, T, D, H, W)


# ---------------------------------------------------------------------------
# TrajectoryDiscriminator forward (trainable path up to the backbone input)
# ---------------------------------------------------------------------------
def trajectory_discriminator_forward(pred_tracks, pred_visibility, point_embedding,
                                     random_idx, frame_size, model_dim, **kwargs):
    """
    pred_tracks:      (B, T, N, 2)
    pred_visibility:  (B, T, N)
    point_embedding:  (H*W, D)
    random_idx:       (B, N) int32 indices into the embedding table
    Returns x: (B, T, D, H, W)  -- the tensor fed to the Discriminator3D backbone.
    """
    H, W = frame_size
    emb_selected = jnp.take(point_embedding, random_idx, axis=0)      # (B, N, D) glue gather (~32 KiB)
    x = preprocess_batch_discrete_round(
        pred_tracks, pred_visibility, emb_selected, H, W, model_dim, **kwargs)
    # GradientCopyFn.apply(x, vid) is identity in the forward pass.
    # TODO(synk): Discriminator3D backbone is not defined in the provided source.
    return x


# ---------------------------------------------------------------------------
# Pure-JAX reference (for correctness check of the Pallas scatter kernel)
# ---------------------------------------------------------------------------
def _reference_preprocess(p_track, p_visibility, emb_selected, H, W, D):
    B, T, N, _ = p_track.shape
    pt = jnp.round(p_track)
    in_frame = ((pt[..., 0] < W) & (pt[..., 0] >= 0) &
                (pt[..., 1] < H) & (pt[..., 1] >= 0)).astype(jnp.float32)
    vis = p_visibility * in_frame
    xc = jnp.clip(pt[..., 0].astype(jnp.int32), 0, W - 1)
    yc = jnp.clip(pt[..., 1].astype(jnp.int32), 0, H - 1)
    lin = yc * W + xc                                                 # (B, T, N)
    contrib = emb_selected[:, None, :, :] * vis[..., None]            # (B, T, N, D)
    feat = jnp.zeros((B, T, H * W, D), jnp.float32)
    feat = jax.vmap(jax.vmap(
        lambda f, idx, c: f.at[idx].add(c)))(feat, lin, contrib)
    return feat.reshape(B, T, H, W, D)


if __name__ == "__main__":
    # Small shapes consistent with the module:
    #   model_dim=64, frame_size=[16,16], temporal_size=8, N(tracks)=64, batch=2
    B, T, N = 2, 8, 64
    H = W = 16
    D = 64

    key = jax.random.PRNGKey(0)
    k1, k2, k3 = jax.random.split(key, 3)

    # synthetic cotracker outputs (cotracker itself is external / frozen)
    pred_tracks = jax.random.uniform(
        k1, (B, T, N, 2), jnp.float32, minval=-2.0, maxval=float(W) + 2.0)
    pred_visibility = (jax.random.uniform(k2, (B, T, N)) > 0.3).astype(jnp.float32)

    # deterministic point embedding + random_idx (randperm[:N] per batch)
    point_embedding = position_embedding_1d(H * W, D)                 # (H*W, D)
    perm = jax.random.permutation(k3, H * W)
    random_idx = jnp.broadcast_to(perm[None, :N], (B, N)).astype(jnp.int32)

    x = trajectory_discriminator_forward(
        pred_tracks, pred_visibility, point_embedding, random_idx, (H, W), D)
    x = jax.block_until_ready(x)
    assert x.shape == (B, T, D, H, W), x.shape

    # correctness check of the Pallas kernel vs. pure-JAX scatter-add
    emb_sel = jnp.take(point_embedding, random_idx, axis=0)
    ref = _reference_preprocess(pred_tracks, pred_visibility, emb_sel, H, W, D)
    ref_x = jnp.transpose(ref, (0, 1, 4, 2, 3))
    assert jnp.allclose(x, ref_x, atol=1e-3, rtol=1e-3), float(jnp.abs(x - ref_x).max())

    print("KERNEL_OK")
</pallas_src>

<mosaic_0001>
module attributes {stable_mosaic.version = 11 : i64} {
  func.func @_preprocess_kernel(%arg0: i32, %arg1: i32, %arg2: memref<1x8x64x3xf32, #tpu.memory_space<vmem>>, %arg3: memref<1x64x64xf32, #tpu.memory_space<vmem>>, %arg4: memref<1x8x64x256xf32, #tpu.memory_space<vmem>>) attributes {dimension_semantics = [#tpu.dimension_semantics<parallel>, #tpu.dimension_semantics<parallel>], iteration_bounds = array<i64: 2, 1>, scalar_prefetch = 0 : i64, scratch_operands = 0 : i64, tpu.core_type = #tpu.core_type<tc>, window_params = [{transform_indices = @transform_0, window_bounds = array<i64: 1, 8, 64, 3>}, {transform_indices = @transform_1, window_bounds = array<i64: 1, 64, 64>}, {transform_indices = @transform_2, window_bounds = array<i64: 1, 8, 64, 256>}]} {
    %c256_i32 = arith.constant 256 : i32
    %0 = arith.muli %arg1, %c256_i32 : i32
    %1 = tpu.assume_multiple %0, 128 : i32
    %2 = tpu.iota {dimensions = array<i32: 1>} : vector<64x256xi32>
    %3 = vector.broadcast %1 : i32 to vector<64x256xi32>
    %4 = arith.addi %2, %3 : vector<64x256xi32>
    %c0 = arith.constant 0 : index
    %c0_0 = arith.constant 0 : index
    %c0_1 = arith.constant 0 : index
    %5 = vector.load %arg3[%c0, %c0_0, %c0_1] : memref<1x64x64xf32, #tpu.memory_space<vmem>>, vector<1x64x64xf32>
    %6 = vector.shape_cast %5 : vector<1x64x64xf32> to vector<64x64xf32>
    %c0_i32 = arith.constant 0 : i32
    %c0_2 = arith.constant 0 : index
    %7 = arith.index_cast %c0_i32 : i32 to index
    %c0_3 = arith.constant 0 : index
    %c0_4 = arith.constant 0 : index
    %8 = vector.load %arg2[%c0_2, %7, %c0_3, %c0_4] : memref<1x8x64x3xf32, #tpu.memory_space<vmem>>, vector<1x1x64x3xf32>
    %9 = vector.shape_cast %8 : vector<1x1x64x3xf32> to vector<64x3xf32>
    %10 = vector.extract_strided_slice %9 {offsets = [0, 0], sizes = [64, 1], strides = [1, 1]} : vector<64x3xf32> to vector<64x1xf32>
    %11 = vector.extract_strided_slice %9 {offsets = [0, 1], sizes = [64, 1], strides = [1, 1]} : vector<64x3xf32> to vector<64x1xf32>
    %12 = vector.extract_strided_slice %9 {offsets = [0, 2], sizes = [64, 1], strides = [1, 1]} : vector<64x3xf32> to vector<64x1xf32>
    %13 = math.roundeven %10 : vector<64x1xf32>
    %14 = math.roundeven %11 : vector<64x1xf32>
    %cst = arith.constant 0.000000e+00 : f32
    %15 = vector.broadcast %cst : f32 to vector<64x1xf32>
    %16 = arith.cmpf oge, %13, %15 : vector<64x1xf32>
    %cst_5 = arith.constant 1.600000e+01 : f32
    %17 = vector.broadcast %cst_5 : f32 to vector<64x1xf32>
    %18 = arith.cmpf olt, %13, %17 : vector<64x1xf32>
    %19 = arith.andi %16, %18 : vector<64x1xi1>
    %cst_6 = arith.constant 0.000000e+00 : f32
    %20 = vector.broadcast %cst_6 : f32 to vector<64x1xf32>
    %21 = arith.cmpf oge, %14, %20 : vector<64x1xf32>
    %22 = arith.andi %19, %21 : vector<64x1xi1>
    %cst_7 = arith.constant 1.600000e+01 : f32
    %23 = vector.broadcast %cst_7 : f32 to vector<64x1xf32>
    %24 = arith.cmpf olt, %14, %23 : vector<64x1xf32>
    %25 = arith.andi %22, %24 : vector<64x1xi1>
    %cst_8 = arith.constant 0.000000e+00 : f32
    %26 = vector.broadcast %cst_8 : f32 to vector<64x1xf32>
    %27 = arith.select %25, %12, %26 : vector<64x1xi1>, vector<64x1xf32>
    %cst_9 = arith.constant 0.000000e+00 : f32
    %cst_10 = arith.constant 1.500000e+01 : f32
    %28 = vector.broadcast %cst_9 : f32 to vector<64x1xf32>
    %29 = arith.maximumf %28, %13 : vector<64x1xf32>
    %30 = vector.broadcast %cst_10 : f32 to vector<64x1xf32>
    %31 = arith.minimumf %30, %29 : vector<64x1xf32>
    %32 = arith.fptosi %31 : vector<64x1xf32> to vector<64x1xi32>
    %cst_11 = arith.constant 0.000000e+00 : f32
    %cst_12 = arith.constant 1.500000e+01 : f32
    %33 = vector.broadcast %cst_11 : f32 to vector<64x1xf32>
    %34 = arith.maximumf %33, %14 : vector<64x1xf32>
    %35 = vector.broadcast %cst_12 : f32 to vector<64x1xf32>
    %36 = arith.minimumf %35, %34 : vector<64x1xf32>
    %37 = arith.fptosi %36 : vector<64x1xf32> to vector<64x1xi32>
    %c16_i32 = arith.constant 16 : i32
    %38 = vector.broadcast %c16_i32 : i32 to vector<64x1xi32>
    %39 = arith.muli %37, %38 : vector<64x1xi32>
    %40 = arith.addi %39, %32 : vector<64x1xi32>
    %41 = vector.broadcast %40 : vector<64x1xi32> to vector<64x256xi32>
    %42 = arith.cmpi eq, %4, %41 : vector<64x256xi32>
    %cst_13 = arith.constant 0.000000e+00 : f32
    %43 = vector.shape_cast %27 : vector<64x1xf32> to vector<64x1xf32>
    %44 = vector.broadcast %43 : vector<64x1xf32> to vector<64x256xf32>
    %45 = vector.broadcast %cst_13 : f32 to vector<64x256xf32>
    %46 = arith.select %42, %44, %45 : vector<64x256xi1>, vector<64x256xf32>
    %cst_14 = arith.constant dense<0.000000e+00> : vector<64x256xf32>
    %47 = tpu.matmul %6, %46, %cst_14 {dimension_numbers = #tpu.dot_dimension_numbers<[0], [0], [1], [1], [0, 1, 1, 1], [], []>} : vector<64x64xf32>, vector<64x256xf32>, vector<64x256xf32> -> vector<64x256xf32>
    %c0_15 = arith.constant 0 : index
    %48 = arith.index_cast %c0_i32 : i32 to index
    %c0_16 = arith.constant 0 : index
    %c0_17 = arith.constant 0 : index
    %49 = vector.load %arg4[%c0_15, %48, %c0_16, %c0_17] : memref<1x8x64x256xf32, #tpu.memory_space<vmem>>, vector<1x1x64x256xf32>
    %50 = vector.shape_cast %49 : vector<1x1x64x256xf32> to vector<64x256xf32>
    %51 = vector.shape_cast %47 : vector<64x256xf32> to vector<1x1x64x256xf32>
    tpu.vector_store %arg4[%c0_15, %48, %c0_16, %c0_17], %51 {strides = array<i32>} : memref<1x8x64x256xf32, #tpu.memory_space<vmem>>, vector<1x1x64x256xf32>,
    %c1_i32 = arith.constant 1 : i32
    %c0_18 = arith.constant 0 : index
    %52 = arith.index_cast %c1_i32 : i32 to index
    %c0_19 = arith.constant 0 : index
    %c0_20 = arith.constant 0 : index
    %53 = vector.load %arg2[%c0_18, %52, %c0_19, %c0_20] : memref<1x8x64x3xf32, #tpu.memory_space<vmem>>, vector<1x1x64x3xf32>
    %54 = vector.shape_cast %53 : vector<1x1x64x3xf32> to vector<64x3xf32>
    %55 = vector.extract_strided_slice %54 {offsets = [0, 0], sizes = [64, 1], strides = [1, 1]} : vector<64x3xf32> to vector<64x1xf32>
    %56 = vector.extract_strided_slice %54 {offsets = [0, 1], sizes = [64, 1], strides = [1, 1]} : vector<64x3xf32> to vector<64x1xf32>
    %57 = vector.extract_strided_slice %54 {offsets = [0, 2], sizes = [64, 1], strides = [1, 1]} : vector<64x3xf32> to vector<64x1xf32>
    %58 = math.roundeven %55 : vector<64x1xf32>
    %59 = math.roundeven %56 : vector<64x1xf32>
    %cst_21 = arith.constant 0.000000e+00 : f32
    %60 = vector.broadcast %cst_21 : f32 to vector<64x1xf32>
    %61 = arith.cmpf oge, %58, %60 : vector<64x1xf32>
    %cst_22 = arith.constant 1.600000e+01 : f32
    %62 = vector.broadcast %cst_22 : f32 to vector<64x1xf32>
    %63 = arith.cmpf olt, %58, %62 : vector<64x1xf32>
    %64 = arith.andi %61, %63 : vector<64x1xi1>
    %cst_23 = arith.constant 0.000000e+00 : f32
    %65 = vector.broadcast %cst_23 : f32 to vector<64x1xf32>
    %66 = arith.cmpf oge, %59, %65 : vector<64x1xf32>
    %67 = arith.andi %64, %66 : vector<64x1xi1>
    %cst_24 = arith.constant 1.600000e+01 : f32
    %68 = vector.broadcast %cst_24 : f32 to vector<64x1xf32>
    %69 = arith.cmpf olt, %59, %68 : vector<64x1xf32>
    %70 = arith.andi %67, %69 : vector<64x1xi1>
    %cst_25 = arith.constant 0.000000e+00 : f32
    %71 = vector.broadcast %cst_25 : f32 to vector<64x1xf32>
    %72 = arith.select %70, %57, %71 : vector<64x1xi1>, vector<64x1xf32>
    %cst_26 = arith.constant 0.000000e+00 : f32
    %cst_27 = arith.constant 1.500000e+01 : f32
    %73 = vector.broadcast %cst_26 : f32 to vector<64x1xf32>
    %74 = arith.maximumf %73, %58 : vector<64x1xf32>
    %75 = vector.broadcast %cst_27 : f32 to vector<64x1xf32>
    %76 = arith.minimumf %75, %74 : vector<64x1xf32>
    %77 = arith.fptosi %76 : vector<64x1xf32> to vector<64x1xi32>
    %cst_28 = arith.constant 0.000000e+00 : f32
    %cst_29 = arith.constant 1.500000e+01 : f32
    %78 = vector.broadcast %cst_28 : f32 to vector<64x1xf32>
    %79 = arith.maximumf %78, %59 : vector<64x1xf32>
    %80 = vector.broadcast %cst_29 : f32 to vector<64x1xf32>
    %81 = arith.minimumf %80, %79 : vector<64x1xf32>
    %82 = arith.fptosi %81 : vector<64x1xf32> to vector<64x1xi32>
    %c16_i32_30 = arith.constant 16 : i32
    %83 = vector.broadcast %c16_i32_30 : i32 to vector<64x1xi32>
    %84 = arith.muli %82, %83 : vector<64x1xi32>
    %85 = arith.addi %84, %77 : vector<64x1xi32>
    %86 = vector.broadcast %85 : vector<64x1xi32> to vector<64x256xi32>
    %87 = arith.cmpi eq, %4, %86 : vector<64x256xi32>
    %cst_31 = arith.constant 0.000000e+00 : f32
    %88 = vector.shape_cast %72 : vector<64x1xf32> to vector<64x1xf32>
    %89 = vector.broadcast %88 : vector<64x1xf32> to vector<64x256xf32>
    %90 = vector.broadcast %cst_31 : f32 to vector<64x256xf32>
    %91 = arith.select %87, %89, %90 : vector<64x256xi1>, vector<64x256xf32>
    %cst_32 = arith.constant dense<0.000000e+00> : vector<64x256xf32>
    %92 = tpu.matmul %6, %91, %cst_32 {dimension_numbers = #tpu.dot_dimension_numbers<[0], [0], [1], [1], [0, 1, 1, 1], [], []>} : vector<64x64xf32>, vector<64x256xf32>, vector<64x256xf32> -> vector<64x256xf32>
    %c0_33 = arith.constant 0 : index
    %93 = arith.index_cast %c1_i32 : i32 to index
    %c0_34 = arith.constant 0 : index
    %c0_35 = arith.constant 0 : index
    %94 = vector.load %arg4[%c0_33, %93, %c0_34, %c0_35] : memref<1x8x64x256xf32, #tpu.memory_space<vmem>>, vector<1x1x64x256xf32>
    %95 = vector.shape_cast %94 : vector<1x1x64x256xf32> to vector<64x256xf32>
    %96 = vector.shape_cast %92 : vector<64x256xf32> to vector<1x1x64x256xf32>
    tpu.vector_store %arg4[%c0_33, %93, %c0_34, %c0_35], %96 {strides = array<i32>} : memref<1x8x64x256xf32, #tpu.memory_space<vmem>>, vector<1x1x64x256xf32>,
    %c2_i32 = arith.constant 2 : i32
    %c0_36 = arith.constant 0 : index
    %97 = arith.index_cast %c2_i32 : i32 to index
    %c0_37 = arith.constant 0 : index
    %c0_38 = arith.constant 0 : index
    %98 = vector.load %arg2[%c0_36, %97, %c0_37, %c0_38] : memref<1x8x64x3xf32, #tpu.memory_space<vmem>>, vector<1x1x64x3xf32>
    %99 = vector.shape_cast %98 : vector<1x1x64x3xf32> to vector<64x3xf32>
    %100 = vector.extract_strided_slice %99 {offsets = [0, 0], sizes = [64, 1], strides = [1, 1]} : vector<64x3xf32> to vector<64x1xf32>
    %101 = vector.extract_strided_slice %99 {offsets = [0, 1], sizes = [64, 1], strides = [1, 1]} : vector<64x3xf32> to vector<64x1xf32>
    %102 = vector.extract_strided_slice %99 {offsets = [0, 2], sizes = [64, 1], strides = [1, 1]} : vector<64x3xf32> to vector<64x1xf32>
    %103 = math.roundeven %100 : vector<64x1xf32>
    %104 = math.roundeven %101 : vector<64x1xf32>
    %cst_39 = arith.constant 0.000000e+00 : f32
    %105 = vector.broadcast %cst_39 : f32 to vector<64x1xf32>
    %106 = arith.cmpf oge, %103, %105 : vector<64x1xf32>
    %cst_40 = arith.constant 1.600000e+01 : f32
    %107 = vector.broadcast %cst_40 : f32 to vector<64x1xf32>
    %108 = arith.cmpf olt, %103, %107 : vector<64x1xf32>
    %109 = arith.andi %106, %108 : vector<64x1xi1>
    %cst_41 = arith.constant 0.000000e+00 : f32
    %110 = vector.broadcast %cst_41 : f32 to vector<64x1xf32>
    %111 = arith.cmpf oge, %104, %110 : vector<64x1xf32>
    %112 = arith.andi %109, %111 : vector<64x1xi1>
    %cst_42 = arith.constant 1.600000e+01 : f32
    %113 = vector.broadcast %cst_42 : f32 to vector<64x1xf32>
    %114 = arith.cmpf olt, %104, %113 : vector<64x1xf32>
    %115 = arith.andi %112, %114 : vector<64x1xi1>
    %cst_43 = arith.constant 0.000000e+00 : f32
    %116 = vector.broadcast %cst_43 : f32 to vector<64x1xf32>
    %117 = arith.select %115, %102, %116 : vector<64x1xi1>, vector<64x1xf32>
    %cst_44 = arith.constant 0.000000e+00 : f32
    %cst_45 = arith.constant 1.500000e+01 : f32
    %118 = vector.broadcast %cst_44 : f32 to vector<64x1xf32>
    %119 = arith.maximumf %118, %103 : vector<64x1xf32>
    %120 = vector.broadcast %cst_45 : f32 to vector<64x1xf32>
    %121 = arith.minimumf %120, %119 : vector<64x1xf32>
    %122 = arith.fptosi %121 : vector<64x1xf32> to vector<64x1xi32>
    %cst_46 = arith.constant 0.000000e+00 : f32
    %cst_47 = arith.constant 1.500000e+01 : f32
    %123 = vector.broadcast %cst_46 : f32 to vector<64x1xf32>
    %124 = arith.maximumf %123, %104 : vector<64x1xf32>
    %125 = vector.broadcast %cst_47 : f32 to vector<64x1xf32>
    %126 = arith.minimumf %125, %124 : vector<64x1xf32>
    %127 = arith.fptosi %126 : vector<64x1xf32> to vector<64x1xi32>
    %c16_i32_48 = arith.constant 16 : i32
    %128 = vector.broadcast %c16_i32_48 : i32 to vector<64x1xi32>
    %129 = arith.muli %127, %128 : vector<64x1xi32>
    %130 = arith.addi %129, %122 : vector<64x1xi32>
    %131 = vector.broadcast %130 : vector<64x1xi32> to vector<64x256xi32>
    %132 = arith.cmpi eq, %4, %131 : vector<64x256xi32>
    %cst_49 = arith.constant 0.000000e+00 : f32
    %133 = vector.shape_cast %117 : vector<64x1xf32> to vector<64x1xf32>
    %134 = vector.broadcast %133 : vector<64x1xf32> to vector<64x256xf32>
    %135 = vector.broadcast %cst_49 : f32 to vector<64x256xf32>
    %136 = arith.select %132, %134, %135 : vector<64x256xi1>, vector<64x256xf32>
    %cst_50 = arith.constant dense<0.000000e+00> : vector<64x256xf32>
    %137 = tpu.matmul %6, %136, %cst_50 {dimension_numbers = #tpu.dot_dimension_numbers<[0], [0], [1], [1], [0, 1, 1, 1], [], []>} : vector<64x64xf32>, vector<64x256xf32>, vector<64x256xf32> -> vector<64x256xf32>
    %c0_51 = arith.constant 0 : index
    %138 = arith.index_cast %c2_i32 : i32 to index
    %c0_52 = arith.constant 0 : index
    %c0_53 = arith.constant 0 : index
    %139 = vector.load %arg4[%c0_51, %138, %c0_52, %c0_53] : memref<1x8x64x256xf32, #tpu.memory_space<vmem>>, vector<1x1x64x256xf32>
    %140 = vector.shape_cast %139 : vector<1x1x64x256xf32> to vector<64x256xf32>
    %141 = vector.shape_cast %137 : vector<64x256xf32> to vector<1x1x64x256xf32>
    tpu.vector_store %arg4[%c0_51, %138, %c0_52, %c0_53], %141 {strides = array<i32>} : memref<1x8x64x256xf32, #tpu.memory_space<vmem>>, vector<1x1x64x256xf32>,
    %c3_i32 = arith.constant 3 : i32
    %c0_54 = arith.constant 0 : index
    %142 = arith.index_cast %c3_i32 : i32 to index
    %c0_55 = arith.constant 0 : index
    %c0_56 = arith.constant 0 : index
    %143 = vector.load %arg2[%c0_54, %142, %c0_55, %c0_56] : memref<1x8x64x3xf32, #tpu.memory_space<vmem>>, vector<1x1x64x3xf32>
    %144 = vector.shape_cast %143 : vector<1x1x64x3xf32> to vector<64x3xf32>
    %145 = vector.extract_strided_slice %144 {offsets = [0, 0], sizes = [64, 1], strides = [1, 1]} : vector<64x3xf32> to vector<64x1xf32>
    %146 = vector.extract_strided_slice %144 {offsets = [0, 1], sizes = [64, 1], strides = [1, 1]} : vector<64x3xf32> to vector<64x1xf32>
    %147 = vector.extract_strided_slice %144 {offsets = [0, 2], sizes = [64, 1], strides = [1, 1]} : vector<64x3xf32> to vector<64x1xf32>
    %148 = math.roundeven %145 : vector<64x1xf32>
    %149 = math.roundeven %146 : vector<64x1xf32>
    %cst_57 = arith.constant 0.000000e+00 : f32
    %150 = vector.broadcast %cst_57 : f32 to vector<64x1xf32>
    %151 = arith.cmpf oge, %148, %150 : vector<64x1xf32>
    %cst_58 = arith.constant 1.600000e+01 : f32
    %152 = vector.broadcast %cst_58 : f32 to vector<64x1xf32>
    %153 = arith.cmpf olt, %148, %152 : vector<64x1xf32>
    %154 = arith.andi %151, %153 : vector<64x1xi1>
    %cst_59 = arith.constant 0.000000e+00 : f32
    %155 = vector.broadcast %cst_59 : f32 to vector<64x1xf32>
    %156 = arith.cmpf oge, %149, %155 : vector<64x1xf32>
    %157 = arith.andi %154, %156 : vector<64x1xi1>
    %cst_60 = arith.constant 1.600000e+01 : f32
    %158 = vector.broadcast %cst_60 : f32 to vector<64x1xf32>
    %159 = arith.cmpf olt, %149, %158 : vector<64x1xf32>
    %160 = arith.andi %157, %159 : vector<64x1xi1>
    %cst_61 = arith.constant 0.000000e+00 : f32
    %161 = vector.broadcast %cst_61 : f32 to vector<64x1xf32>
    %162 = arith.select %160, %147, %161 : vector<64x1xi1>, vector<64x1xf32>
    %cst_62 = arith.constant 0.000000e+00 : f32
    %cst_63 = arith.constant 1.500000e+01 : f32
    %163 = vector.broadcast %cst_62 : f32 to vector<64x1xf32>
    %164 = arith.maximumf %163, %148 : vector<64x1xf32>
    %165 = vector.broadcast %cst_63 : f32 to vector<64x1xf32>
    %166 = arith.minimumf %165, %164 : vector<64x1xf32>
    %167 = arith.fptosi %166 : vector<64x1xf32> to vector<64x1xi32>
    %cst_64 = arith.constant 0.000000e+00 : f32
    %cst_65 = arith.constant 1.500000e+01 : f32
    %168 = vector.broadcast %cst_64 : f32 to vector<64x1xf32>
    %169 = arith.maximumf %168, %149 : vector<64x1xf32>
    %170 = vector.broadcast %cst_65 : f32 to vector<64x1xf32>
    %171 = arith.minimumf %170, %169 : vector<64x1xf32>
    %172 = arith.fptosi %171 : vector<64x1xf32> to vector<64x1xi32>
    %c16_i32_66 = arith.constant 16 : i32
    %173 = vector.broadcast %c16_i32_66 : i32 to vector<64x1xi32>
    %174 = arith.muli %172, %173 : vector<64x1xi32>
    %175 = arith.addi %174, %167 : vector<64x1xi32>
    %176 = vector.broadcast %175 : vector<64x1xi32> to vector<64x256xi32>
    %177 = arith.cmpi eq, %4, %176 : vector<64x256xi32>
    %cst_67 = arith.constant 0.000000e+00 : f32
    %178 = vector.shape_cast %162 : vector<64x1xf32> to vector<64x1xf32>
    %179 = vector.broadcast %178 : vector<64x1xf32> to vector<64x256xf32>
    %180 = vector.broadcast %cst_67 : f32 to vector<64x256xf32>
    %181 = arith.select %177, %179, %180 : vector<64x256xi1>, vector<64x256xf32>
    %cst_68 = arith.constant dense<0.000000e+00> : vector<64x256xf32>
    %182 = tpu.matmul %6, %181, %cst_68 {dimension_numbers = #tpu.dot_dimension_numbers<[0], [0], [1], [1], [0, 1, 1, 1], [], []>} : vector<64x64xf32>, vector<64x256xf32>, vector<64x256xf32> -> vector<64x256xf32>
    %c0_69 = arith.constant 0 : index
    %183 = arith.index_cast %c3_i32 : i32 to index
    %c0_70 = arith.constant 0 : index
    %c0_71 = arith.constant 0 : index
    %184 = vector.load %arg4[%c0_69, %183, %c0_70, %c0_71] : memref<1x8x64x256xf32, #tpu.memory_space<vmem>>, vector<1x1x64x256xf32>
    %185 = vector.shape_cast %184 : vector<1x1x64x256xf32> to vector<64x256xf32>
    %186 = vector.shape_cast %182 : vector<64x256xf32> to vector<1x1x64x256xf32>
    tpu.vector_store %arg4[%c0_69, %183, %c0_70, %c0_71], %186 {strides = array<i32>} : memref<1x8x64x256xf32, #tpu.memory_space<vmem>>, vector<1x1x64x256xf32>,
    %c4_i32 = arith.constant 4 : i32
    %c0_72 = arith.constant 0 : index
    %187 = arith.index_cast %c4_i32 : i32 to index
    %c0_73 = arith.constant 0 : index
    %c0_74 = arith.constant 0 : index
    %188 = vector.load %arg2[%c0_72, %187, %c0_73, %c0_74] : memref<1x8x64x3xf32, #tpu.memory_space<vmem>>, vector<1x1x64x3xf32>
    %189 = vector.shape_cast %188 : vector<1x1x64x3xf32> to vector<64x3xf32>
    %190 = vector.extract_strided_slice %189 {offsets = [0, 0], sizes = [64, 1], strides = [1, 1]} : vector<64x3xf32> to vector<64x1xf32>
    %191 = vector.extract_strided_slice %189 {offsets = [0, 1], sizes = [64, 1], strides = [1, 1]} : vector<64x3xf32> to vector<64x1xf32>
    %192 = vector.extract_strided_slice %189 {offsets = [0, 2], sizes = [64, 1], strides = [1, 1]} : vector<64x3xf32> to vector<64x1xf32>
    %193 = math.roundeven %190 : vector<64x1xf32>
    %194 = math.roundeven %191 : vector<64x1xf32>
    %cst_75 = arith.constant 0.000000e+00 : f32
    %195 = vector.broadcast %cst_75 : f32 to vector<64x1xf32>
    %196 = arith.cmpf oge, %193, %195 : vector<64x1xf32>
    %cst_76 = arith.constant 1.600000e+01 : f32
    %197 = vector.broadcast %cst_76 : f32 to vector<64x1xf32>
    %198 = arith.cmpf olt, %193, %197 : vector<64x1xf32>
    %199 = arith.andi %196, %198 : vector<64x1xi1>
    %cst_77 = arith.constant 0.000000e+00 : f32
    %200 = vector.broadcast %cst_77 : f32 to vector<64x1xf32>
    %201 = arith.cmpf oge, %194, %200 : vector<64x1xf32>
    %202 = arith.andi %199, %201 : vector<64x1xi1>
    %cst_78 = arith.constant 1.600000e+01 : f32
    %203 = vector.broadcast %cst_78 : f32 to vector<64x1xf32>
    %204 = arith.cmpf olt, %194, %203 : vector<64x1xf32>
    %205 = arith.andi %202, %204 : vector<64x1xi1>
    %cst_79 = arith.constant 0.000000e+00 : f32
    %206 = vector.broadcast %cst_79 : f32 to vector<64x1xf32>
    %207 = arith.select %205, %192, %206 : vector<64x1xi1>, vector<64x1xf32>
    %cst_80 = arith.constant 0.000000e+00 : f32
    %cst_81 = arith.constant 1.500000e+01 : f32
    %208 = vector.broadcast %cst_80 : f32 to vector<64x1xf32>
    %209 = arith.maximumf %208, %193 : vector<64x1xf32>
    %210 = vector.broadcast %cst_81 : f32 to vector<64x1xf32>
    %211 = arith.minimumf %210, %209 : vector<64x1xf32>
    %212 = arith.fptosi %211 : vector<64x1xf32> to vector<64x1xi32>
    %cst_82 = arith.constant 0.000000e+00 : f32
    %cst_83 = arith.constant 1.500000e+01 : f32
    %213 = vector.broadcast %cst_82 : f32 to vector<64x1xf32>
    %214 = arith.maximumf %213, %194 : vector<64x1xf32>
    %215 = vector.broadcast %cst_83 : f32 to vector<64x1xf32>
    %216 = arith.minimumf %215, %214 : vector<64x1xf32>
    %217 = arith.fptosi %216 : vector<64x1xf32> to vector<64x1xi32>
    %c16_i32_84 = arith.constant 16 : i32
    %218 = vector.broadcast %c16_i32_84 : i32 to vector<64x1xi32>
    %219 = arith.muli %217, %218 : vector<64x1xi32>
    %220 = arith.addi %219, %212 : vector<64x1xi32>
    %221 = vector.broadcast %220 : vector<64x1xi32> to vector<64x256xi32>
    %222 = arith.cmpi eq, %4, %221 : vector<64x256xi32>
    %cst_85 = arith.constant 0.000000e+00 : f32
    %223 = vector.shape_cast %207 : vector<64x1xf32> to vector<64x1xf32>
    %224 = vector.broadcast %223 : vector<64x1xf32> to vector<64x256xf32>
    %225 = vector.broadcast %cst_85 : f32 to vector<64x256xf32>
    %226 = arith.select %222, %224, %225 : vector<64x256xi1>, vector<64x256xf32>
    %cst_86 = arith.constant dense<0.000000e+00> : vector<64x256xf32>
    %227 = tpu.matmul %6, %226, %cst_86 {dimension_numbers = #tpu.dot_dimension_numbers<[0], [0], [1], [1], [0, 1, 1, 1], [], []>} : vector<64x64xf32>, vector<64x256xf32>, vector<64x256xf32> -> vector<64x256xf32>
    %c0_87 = arith.constant 0 : index
    %228 = arith.index_cast %c4_i32 : i32 to index
    %c0_88 = arith.constant 0 : index
    %c0_89 = arith.constant 0 : index
    %229 = vector.load %arg4[%c0_87, %228, %c0_88, %c0_89] : memref<1x8x64x256xf32, #tpu.memory_space<vmem>>, vector<1x1x64x256xf32>
    %230 = vector.shape_cast %229 : vector<1x1x64x256xf32> to vector<64x256xf32>
    %231 = vector.shape_cast %227 : vector<64x256xf32> to vector<1x1x64x256xf32>
    tpu.vector_store %arg4[%c0_87, %228, %c0_88, %c0_89], %231 {strides = array<i32>} : memref<1x8x64x256xf32, #tpu.memory_space<vmem>>, vector<1x1x64x256xf32>,
    %c5_i32 = arith.constant 5 : i32
    %c0_90 = arith.constant 0 : index
    %232 = arith.index_cast %c5_i32 : i32 to index
    %c0_91 = arith.constant 0 : index
    %c0_92 = arith.constant 0 : index
    %233 = vector.load %arg2[%c0_90, %232, %c0_91, %c0_92] : memref<1x8x64x3xf32, #tpu.memory_space<vmem>>, vector<1x1x64x3xf32>
    %234 = vector.shape_cast %233 : vector<1x1x64x3xf32> to vector<64x3xf32>
    %235 = vector.extract_strided_slice %234 {offsets = [0, 0], sizes = [64, 1], strides = [1, 1]} : vector<64x3xf32> to vector<64x1xf32>
    %236 = vector.extract_strided_slice %234 {offsets = [0, 1], sizes = [64, 1], strides = [1, 1]} : vector<64x3xf32> to vector<64x1xf32>
    %237 = vector.extract_strided_slice %234 {offsets = [0, 2], sizes = [64, 1], strides = [1, 1]} : vector<64x3xf32> to vector<64x1xf32>
    %238 = math.roundeven %235 : vector<64x1xf32>
    %239 = math.roundeven %236 : vector<64x1xf32>
    %cst_93 = arith.constant 0.000000e+00 : f32
    %240 = vector.broadcast %cst_93 : f32 to vector<64x1xf32>
    %241 = arith.cmpf oge, %238, %240 : vector<64x1xf32>
    %cst_94 = arith.constant 1.600000e+01 : f32
    %242 = vector.broadcast %cst_94 : f32 to vector<64x1xf32>
    %243 = arith.cmpf olt, %238, %242 : vector<64x1xf32>
    %244 = arith.andi %241, %243 : vector<64x1xi1>
    %cst_95 = arith.constant 0.000000e+00 : f32
    %245 = vector.broadcast %cst_95 : f32 to vector<64x1xf32>
    %246 = arith.cmpf oge, %239, %245 : vector<64x1xf32>
    %247 = arith.andi %244, %246 : vector<64x1xi1>
    %cst_96 = arith.constant 1.600000e+01 : f32
    %248 = vector.broadcast %cst_96 : f32 to vector<64x1xf32>
    %249 = arith.cmpf olt, %239, %248 : vector<64x1xf32>
    %250 = arith.andi %247, %249 : vector<64x1xi1>
    %cst_97 = arith.constant 0.000000e+00 : f32
    %251 = vector.broadcast %cst_97 : f32 to vector<64x1xf32>
    %252 = arith.select %250, %237, %251 : vector<64x1xi1>, vector<64x1xf32>
    %cst_98 = arith.constant 0.000000e+00 : f32
    %cst_99 = arith.constant 1.500000e+01 : f32
    %253 = vector.broadcast %cst_98 : f32 to vector<64x1xf32>
    %254 = arith.maximumf %253, %238 : vector<64x1xf32>
    %255 = vector.broadcast %cst_99 : f32 to vector<64x1xf32>
    %256 = arith.minimumf %255, %254 : vector<64x1xf32>
    %257 = arith.fptosi %256 : vector<64x1xf32> to vector<64x1xi32>
    %cst_100 = arith.constant 0.000000e+00 : f32
    %cst_101 = arith.constant 1.500000e+01 : f32
    %258 = vector.broadcast %cst_100 : f32 to vector<64x1xf32>
    %259 = arith.maximumf %258, %239 : vector<64x1xf32>
    %260 = vector.broadcast %cst_101 : f32 to vector<64x1xf32>
    %261 = arith.minimumf %260, %259 : vector<64x1xf32>
    %262 = arith.fptosi %261 : vector<64x1xf32> to vector<64x1xi32>
    %c16_i32_102 = arith.constant 16 : i32
    %263 = vector.broadcast %c16_i32_102 : i32 to vector<64x1xi32>
    %264 = arith.muli %262, %263 : vector<64x1xi32>
    %265 = arith.addi %264, %257 : vector<64x1xi32>
    %266 = vector.broadcast %265 : vector<64x1xi32> to vector<64x256xi32>
    %267 = arith.cmpi eq, %4, %266 : vector<64x256xi32>
    %cst_103 = arith.constant 0.000000e+00 : f32
    %268 = vector.shape_cast %252 : vector<64x1xf32> to vector<64x1xf32>
    %269 = vector.broadcast %268 : vector<64x1xf32> to vector<64x256xf32>
    %270 = vector.broadcast %cst_103 : f32 to vector<64x256xf32>
    %271 = arith.select %267, %269, %270 : vector<64x256xi1>, vector<64x256xf32>
    %cst_104 = arith.constant dense<0.000000e+00> : vector<64x256xf32>
    %272 = tpu.matmul %6, %271, %cst_104 {dimension_numbers = #tpu.dot_dimension_numbers<[0], [0], [1], [1], [0, 1, 1, 1], [], []>} : vector<64x64xf32>, vector<64x256xf32>, vector<64x256xf32> -> vector<64x256xf32>
    %c0_105 = arith.constant 0 : index
    %273 = arith.index_cast %c5_i32 : i32 to index
    %c0_106 = arith.constant 0 : index
    %c0_107 = arith.constant 0 : index
    %274 = vector.load %arg4[%c0_105, %273, %c0_106, %c0_107] : memref<1x8x64x256xf32, #tpu.memory_space<vmem>>, vector<1x1x64x256xf32>
    %275 = vector.shape_cast %274 : vector<1x1x64x256xf32> to vector<64x256xf32>
    %276 = vector.shape_cast %272 : vector<64x256xf32> to vector<1x1x64x256xf32>
    tpu.vector_store %arg4[%c0_105, %273, %c0_106, %c0_107], %276 {strides = array<i32>} : memref<1x8x64x256xf32, #tpu.memory_space<vmem>>, vector<1x1x64x256xf32>,
    %c6_i32 = arith.constant 6 : i32
    %c0_108 = arith.constant 0 : index
    %277 = arith.index_cast %c6_i32 : i32 to index
    %c0_109 = arith.constant 0 : index
    %c0_110 = arith.constant 0 : index
    %278 = vector.load %arg2[%c0_108, %277, %c0_109, %c0_110] : memref<1x8x64x3xf32, #tpu.memory_space<vmem>>, vector<1x1x64x3xf32>
    %279 = vector.shape_cast %278 : vector<1x1x64x3xf32> to vector<64x3xf32>
    %280 = vector.extract_strided_slice %279 {offsets = [0, 0], sizes = [64, 1], strides = [1, 1]} : vector<64x3xf32> to vector<64x1xf32>
    %281 = vector.extract_strided_slice %279 {offsets = [0, 1], sizes = [64, 1], strides = [1, 1]} : vector<64x3xf32> to vector<64x1xf32>
    %282 = vector.extract_strided_slice %279 {offsets = [0, 2], sizes = [64, 1], strides = [1, 1]} : vector<64x3xf32> to vector<64x1xf32>
    %283 = math.roundeven %280 : vector<64x1xf32>
    %284 = math.roundeven %281 : vector<64x1xf32>
    %cst_111 = arith.constant 0.000000e+00 : f32
    %285 = vector.broadcast %cst_111 : f32 to vector<64x1xf32>
    %286 = arith.cmpf oge, %283, %285 : vector<64x1xf32>
    %cst_112 = arith.constant 1.600000e+01 : f32
    %287 = vector.broadcast %cst_112 : f32 to vector<64x1xf32>
    %288 = arith.cmpf olt, %283, %287 : vector<64x1xf32>
    %289 = arith.andi %286, %288 : vector<64x1xi1>
    %cst_113 = arith.constant 0.000000e+00 : f32
    %290 = vector.broadcast %cst_113 : f32 to vector<64x1xf32>
    %291 = arith.cmpf oge, %284, %290 : vector<64x1xf32>
    %292 = arith.andi %289, %291 : vector<64x1xi1>
    %cst_114 = arith.constant 1.600000e+01 : f32
    %293 = vector.broadcast %cst_114 : f32 to vector<64x1xf32>
    %294 = arith.cmpf olt, %284, %293 : vector<64x1xf32>
    %295 = arith.andi %292, %294 : vector<64x1xi1>
    %cst_115 = arith.constant 0.000000e+00 : f32
    %296 = vector.broadcast %cst_115 : f32 to vector<64x1xf32>
    %297 = arith.select %295, %282, %296 : vector<64x1xi1>, vector<64x1xf32>
    %cst_116 = arith.constant 0.000000e+00 : f32
    %cst_117 = arith.constant 1.500000e+01 : f32
    %298 = vector.broadcast %cst_116 : f32 to vector<64x1xf32>
    %299 = arith.maximumf %298, %283 : vector<64x1xf32>
    %300 = vector.broadcast %cst_117 : f32 to vector<64x1xf32>
    %301 = arith.minimumf %300, %299 : vector<64x1xf32>
    %302 = arith.fptosi %301 : vector<64x1xf32> to vector<64x1xi32>
    %cst_118 = arith.constant 0.000000e+00 : f32
    %cst_119 = arith.constant 1.500000e+01 : f32
    %303 = vector.broadcast %cst_118 : f32 to vector<64x1xf32>
    %304 = arith.maximumf %303, %284 : vector<64x1xf32>
    %305 = vector.broadcast %cst_119 : f32 to vector<64x1xf32>
    %306 = arith.minimumf %305, %304 : vector<64x1xf32>
    %307 = arith.fptosi %306 : vector<64x1xf32> to vector<64x1xi32>
    %c16_i32_120 = arith.constant 16 : i32
    %308 = vector.broadcast %c16_i32_120 : i32 to vector<64x1xi32>
    %309 = arith.muli %307, %308 : vector<64x1xi32>
    %310 = arith.addi %309, %302 : vector<64x1xi32>
    %311 = vector.broadcast %310 : vector<64x1xi32> to vector<64x256xi32>
    %312 = arith.cmpi eq, %4, %311 : vector<64x256xi32>
    %cst_121 = arith.constant 0.000000e+00 : f32
    %313 = vector.shape_cast %297 : vector<64x1xf32> to vector<64x1xf32>
    %314 = vector.broadcast %313 : vector<64x1xf32> to vector<64x256xf32>
    %315 = vector.broadcast %cst_121 : f32 to vector<64x256xf32>
    %316 = arith.select %312, %314, %315 : vector<64x256xi1>, vector<64x256xf32>
    %cst_122 = arith.constant dense<0.000000e+00> : vector<64x256xf32>
    %317 = tpu.matmul %6, %316, %cst_122 {dimension_numbers = #tpu.dot_dimension_numbers<[0], [0], [1], [1], [0, 1, 1, 1], [], []>} : vector<64x64xf32>, vector<64x256xf32>, vector<64x256xf32> -> vector<64x256xf32>
    %c0_123 = arith.constant 0 : index
    %318 = arith.index_cast %c6_i32 : i32 to index
    %c0_124 = arith.constant 0 : index
    %c0_125 = arith.constant 0 : index
    %319 = vector.load %arg4[%c0_123, %318, %c0_124, %c0_125] : memref<1x8x64x256xf32, #tpu.memory_space<vmem>>, vector<1x1x64x256xf32>
    %320 = vector.shape_cast %319 : vector<1x1x64x256xf32> to vector<64x256xf32>
    %321 = vector.shape_cast %317 : vector<64x256xf32> to vector<1x1x64x256xf32>
    tpu.vector_store %arg4[%c0_123, %318, %c0_124, %c0_125], %321 {strides = array<i32>} : memref<1x8x64x256xf32, #tpu.memory_space<vmem>>, vector<1x1x64x256xf32>,
    %c7_i32 = arith.constant 7 : i32
    %c0_126 = arith.constant 0 : index
    %322 = arith.index_cast %c7_i32 : i32 to index
    %c0_127 = arith.constant 0 : index
    %c0_128 = arith.constant 0 : index
    %323 = vector.load %arg2[%c0_126, %322, %c0_127, %c0_128] : memref<1x8x64x3xf32, #tpu.memory_space<vmem>>, vector<1x1x64x3xf32>
    %324 = vector.shape_cast %323 : vector<1x1x64x3xf32> to vector<64x3xf32>
    %325 = vector.extract_strided_slice %324 {offsets = [0, 0], sizes = [64, 1], strides = [1, 1]} : vector<64x3xf32> to vector<64x1xf32>
    %326 = vector.extract_strided_slice %324 {offsets = [0, 1], sizes = [64, 1], strides = [1, 1]} : vector<64x3xf32> to vector<64x1xf32>
    %327 = vector.extract_strided_slice %324 {offsets = [0, 2], sizes = [64, 1], strides = [1, 1]} : vector<64x3xf32> to vector<64x1xf32>
    %328 = math.roundeven %325 : vector<64x1xf32>
    %329 = math.roundeven %326 : vector<64x1xf32>
    %cst_129 = arith.constant 0.000000e+00 : f32
    %330 = vector.broadcast %cst_129 : f32 to vector<64x1xf32>
    %331 = arith.cmpf oge, %328, %330 : vector<64x1xf32>
    %cst_130 = arith.constant 1.600000e+01 : f32
    %332 = vector.broadcast %cst_130 : f32 to vector<64x1xf32>
    %333 = arith.cmpf olt, %328, %332 : vector<64x1xf32>
    %334 = arith.andi %331, %333 : vector<64x1xi1>
    %cst_131 = arith.constant 0.000000e+00 : f32
    %335 = vector.broadcast %cst_131 : f32 to vector<64x1xf32>
    %336 = arith.cmpf oge, %329, %335 : vector<64x1xf32>
    %337 = arith.andi %334, %336 : vector<64x1xi1>
    %cst_132 = arith.constant 1.600000e+01 : f32
    %338 = vector.broadcast %cst_132 : f32 to vector<64x1xf32>
    %339 = arith.cmpf olt, %329, %338 : vector<64x1xf32>
    %340 = arith.andi %337, %339 : vector<64x1xi1>
    %cst_133 = arith.constant 0.000000e+00 : f32
    %341 = vector.broadcast %cst_133 : f32 to vector<64x1xf32>
    %342 = arith.select %340, %327, %341 : vector<64x1xi1>, vector<64x1xf32>
    %cst_134 = arith.constant 0.000000e+00 : f32
    %cst_135 = arith.constant 1.500000e+01 : f32
    %343 = vector.broadcast %cst_134 : f32 to vector<64x1xf32>
    %344 = arith.maximumf %343, %328 : vector<64x1xf32>
    %345 = vector.broadcast %cst_135 : f32 to vector<64x1xf32>
    %346 = arith.minimumf %345, %344 : vector<64x1xf32>
    %347 = arith.fptosi %346 : vector<64x1xf32> to vector<64x1xi32>
    %cst_136 = arith.constant 0.000000e+00 : f32
    %cst_137 = arith.constant 1.500000e+01 : f32
    %348 = vector.broadcast %cst_136 : f32 to vector<64x1xf32>
    %349 = arith.maximumf %348, %329 : vector<64x1xf32>
    %350 = vector.broadcast %cst_137 : f32 to vector<64x1xf32>
    %351 = arith.minimumf %350, %349 : vector<64x1xf32>
    %352 = arith.fptosi %351 : vector<64x1xf32> to vector<64x1xi32>
    %c16_i32_138 = arith.constant 16 : i32
    %353 = vector.broadcast %c16_i32_138 : i32 to vector<64x1xi32>
    %354 = arith.muli %352, %353 : vector<64x1xi32>
    %355 = arith.addi %354, %347 : vector<64x1xi32>
    %356 = vector.broadcast %355 : vector<64x1xi32> to vector<64x256xi32>
    %357 = arith.cmpi eq, %4, %356 : vector<64x256xi32>
    %cst_139 = arith.constant 0.000000e+00 : f32
    %358 = vector.shape_cast %342 : vector<64x1xf32> to vector<64x1xf32>
    %359 = vector.broadcast %358 : vector<64x1xf32> to vector<64x256xf32>
    %360 = vector.broadcast %cst_139 : f32 to vector<64x256xf32>
    %361 = arith.select %357, %359, %360 : vector<64x256xi1>, vector<64x256xf32>
    %cst_140 = arith.constant dense<0.000000e+00> : vector<64x256xf32>
    %362 = tpu.matmul %6, %361, %cst_140 {dimension_numbers = #tpu.dot_dimension_numbers<[0], [0], [1], [1], [0, 1, 1, 1], [], []>} : vector<64x64xf32>, vector<64x256xf32>, vector<64x256xf32> -> vector<64x256xf32>
    %c0_141 = arith.constant 0 : index
    %363 = arith.index_cast %c7_i32 : i32 to index
    %c0_142 = arith.constant 0 : index
    %c0_143 = arith.constant 0 : index
    %364 = vector.load %arg4[%c0_141, %363, %c0_142, %c0_143] : memref<1x8x64x256xf32, #tpu.memory_space<vmem>>, vector<1x1x64x256xf32>
    %365 = vector.shape_cast %364 : vector<1x1x64x256xf32> to vector<64x256xf32>
    %366 = vector.shape_cast %362 : vector<64x256xf32> to vector<1x1x64x256xf32>
    tpu.vector_store %arg4[%c0_141, %363, %c0_142, %c0_143], %366 {strides = array<i32>} : memref<1x8x64x256xf32, #tpu.memory_space<vmem>>, vector<1x1x64x256xf32>,
    %c8_i32 = arith.constant 8 : i32
    return
  }
  func.func @transform_0(%arg0: i32, %arg1: i32) -> (i32, i32, i32, i32) {
    %c0_i32 = arith.constant 0 : i32
    %c0_i32_0 = arith.constant 0 : i32
    %c0_i32_1 = arith.constant 0 : i32
    %c0_i32_2 = arith.constant 0 : i32
    return %arg0, %c0_i32, %c0_i32_0, %c0_i32_1 : i32, i32, i32, i32
  }
  func.func @transform_1(%arg0: i32, %arg1: i32) -> (i32, i32, i32) {
    %c0_i32 = arith.constant 0 : i32
    %c0_i32_0 = arith.constant 0 : i32
    %c0_i32_1 = arith.constant 0 : i32
    return %arg0, %c0_i32, %c0_i32_0 : i32, i32, i32
  }
  func.func @transform_2(%arg0: i32, %arg1: i32) -> (i32, i32, i32, i32) {
    %c0_i32 = arith.constant 0 : i32
    %c0_i32_0 = arith.constant 0 : i32
    %c0_i32_1 = arith.constant 0 : i32
    return %arg0, %c0_i32, %c0_i32_0, %arg1 : i32, i32, i32, i32
  }
}

</mosaic_0001>

<bundles_post_ra>
// kernel: tpu_custom_call.1
= control target key start
LH: loop header
LB: loop body
LE: loop exit
PB: predicated region body
PF: predicated region fallthrough
CT: control target
= control target key end

     0   :  { %7 = vsyncpa [#allocation3], 0  ;;  %s9163_s0 = inlined_call_operand.vmem [shape: f32[2,8,64,3], index: 0, kind: input, shape index: {}]   ;;  %s9164_s1 = inlined_call_operand.vmem [shape: f32[2,64,64], index: 1, kind: input, shape index: {}]   ;;  %s9165_s2 = inlined_call_operand.hbm [shape: f32[2,8,64,256], index: 2, kind: output, shape index: {}]  }
   0x1   :  { %9 = vsyncpa [#allocation3 + $0x1], 0  ;;  %s5428_s9 = smov 0   ;;  %s5430_s10 = smov 0  }
   0x2   :  { %s5432_s11 = smov 0   ;;  %s5434_s12 = smov 0  }
   0x3   :  { %s5436_s13 = smov 0   ;;  %s5438_s14 = smov 0  }
   0x4 LB: > { %s3892_s15 = sadd.s32 4294967295, %s5402_s14   ;;  %s3893_s16 = sadd.s32 4294967294, %s5402_s14   ;;  %s5402_s14 = sphi %s5438_s14, %s15_s14   ;;  %s5398_s13 = sphi %s5436_s13, %s10358_s13   ;;  %s5394_s12 = sphi %s5434_s12, %s10357_s12   ;;  %s5390_s11 = sphi %s5432_s11, %s10356_s11   ;;  %s5386_s10 = sphi %s5430_s10, %s10355_s10   ;;  %s5382_s9 = sphi %s5428_s9, %s10354_s9  }
   0x5   : > { %s27_s17 = sadd.s32 1, %s5398_s13  ;;  %s88_s18 = sadd.s32 1, %s5390_s11 }
   0x6   : > { %p29_p0 = scmp.ge.s32.totalorder %s27_s17, 2  ;;  %p98_p1 = scmp.ne.s32.totalorder %s5390_s11, %s5386_s10 }
   0x7   : > { %p99_p2 = scmp.eq.s32.totalorder %s3892_s15, 1  ;;  %p104_p3 = scmp.ne.s32.totalorder %s5386_s10, %s5382_s9 }
   0x8   : > { %s10360_s17 = smov (%p29_p0, %s27_s17), 0  ;;  %p105_p5 = scmp.eq.s32.totalorder %s3893_s16, 1 }
   0x9   : > { %p5468_p4 = por %p99_p2, %p98_p1  ;;  %s83_s20 = ssub.s32 %s5398_s13, %s10360_s17 }
   0xa   : > { %p3896_p6 = scmp.ge.s32.totalorder %s5402_s14, 1  ;;  %p86_p7 = scmp.eq.s32.totalorder %s83_s20, 0 }
   0xb   : > { %p5475_p8 = por %p105_p5, %p104_p3  ;;  %p139_p9 = scmp.lt.s32.totalorder %s5402_s14, 3 }
   0xc   : > { %s5481_s22 = scalar_select %p86_p7, %s5390_s11, %s88_s18  }
   0xd   : > { %p140_p10 = pnand %p3896_p6, %p139_p9 }
   0xf   : > { %143 = sbr.rel (%p140_p10) target bundleno = 1810 (0x712), region = 28 }
  0x16   : > { %p166_p11 = scmp.lt.s32.totalorder %s5394_s12, 1  ;;  %v9194_v11 = vmov 0   ;;  %s5405_s4 = smov 127   ;;  %v9520_v17 = vmov 0  ;;  %v9522_v22 = vmov 0  ;;  %v9526_v27 = vmov 0 }
  0x17   : > { %v9528_v28 = vmov 0  ;;  %s5406_s5 = smov 126   ;;  %s5407_s6 = smov 1   ;;  %v9533_v55 = vmov 0  ;;  %v9535_v57 = vmov 0  ;;  %v9537_v59 = vmov 0 }
  0x18   : > { %s167_s23 = scalar_select %p166_p11, %s5394_s12, 1  ;;  %v9539_v60 = vmov 0 }
  0x19   : > { %s163_s7 = sand.u32 1, %s5386_s10   ;;  %s4461_s16 = sshll.u32 %s5394_s12, 14 }
  0x1a   : > { %s4460_s24 = sshll.u32 %s167_s23, 6  ;;  %s4459_s25 = sshll.u32 %s167_s23, 9 }
  0x1b   : > { %s5488_s28 = scalar_lea.vmem %s9164_s1, %s4460_s24  ;;  %s5493_s3 = scalar_lea.vmem %s9163_s0, %s4459_s25 }
  0x1c   : > { %v184_v0 = vld [vmem:[%s5488_s28] sm:$0xff]  ;;  %v185_v1 = vld [vmem:[%s5488_s28 + $0x8] sm:$0xff]  ;;  %v5498_v2 = vld [vmem:[%s5493_s3 + $0x10] sm:$0xff]  ;;  %s3897_s8 = sshll.u32 %s163_s7, 10  ;;  %s9109_s24 = scalar_lea.hbm %s9165_s2, %s4461_s16 }
  0x1d   : > { %504 = vxpose.xlu0.b32.start [1/8] (short) (narrow) %v184_v0, 64  ;;  %v4656_v3 = vround.rtne.f32 %v5498_v2  ;;  %v195_v4 = vld [vmem:[%s5493_s3 + $0x18] sm:$0xff]  ;;  %v5503_v5 = vld [vmem:[%s5493_s3 + $0x28] sm:$0xff]  ;;  %v186_v10 = vld [vmem:[%s5488_s28 + $0x10] sm:$0xff]  ;;  %s7982_s15 = scalar_lea.vmem [#allocation2], %s3897_s8  ;;  %s9117_s12 = scalar_lea.sflag [#allocation3], %s163_s7 }
  0x1e   : > { %v4657_v6 = vround.rtne.f32 %v195_v4  ;;  %v4659_v9 = vround.rtne.f32 %v5503_v5  ;;  %v199_v14 = vld [vmem:[%s5493_s3 + $0x38] sm:$0xff]  ;;  %v5545_v20 = vld [vmem:[%s5493_s3 + $0x8] sm:$0xff]  ;;  %v188_v25 = vld [vmem:[%s5488_s28 + $0x20] sm:$0xff]  ;;  %v4973_v36 = vpack.i.bf16 %v195_v4, %v5498_v2  ;;  %v3911_v41 = vmax.f32 %v195_v4, 0.0  ;;  %s3807_s18 = sshll.u32 %s7982_s15, 4  ;;  %s5410_s26 = smov [#allocation2]   ;;  %s9111_s18 = int_to_ptr.vmem [resolvable:$true] %s3807_s18 }
  0x1f   : > { %vm5505_vm0 = vcmp.ge.f32.partialorder %v4656_v3, 0.0  ;;  %vm5509_vm1 = vcmp.lt.f32.partialorder %v4656_v3, 16.0  ;;  %v4661_v18 = vround.rtne.f32 %v199_v14  ;;  %v187_v19 = vld [vmem:[%s5488_s28 + $0x18] sm:$0xff]  ;;  %v4655_v24 = vround.rtne.f32 %v5545_v20  ;;  %v189_v29 = vld [vmem:[%s5488_s28 + $0x28] sm:$0xff]  ;;  %v190_v31 = vld [vmem:[%s5488_s28 + $0x30] sm:$0xff]  ;;  %s5324_s25 = scalar_lea.vmem %s9111_s18, 16384 }
  0x20   : > { %v234_v12 = vsel %vm5505_vm0, 1, %v9194_v11  ;;  %vm5522_vm3 = vcmp.ge.f32.partialorder %v4657_v6, 0.0  ;;  %vm5531_vm4 = vcmp.lt.f32.partialorder %v4657_v6, 16.0  ;;  %vm5535_vm5 = vcmp.ge.f32.partialorder %v4659_v9, 0.0  ;;  %v191_v33 = vld [vmem:[%s5488_s28 + $0x38] sm:$0xff]  ;;  %v5604_v38 = vld [vmem:[%s5493_s3 + $0x30] sm:$0xff]  ;;  %p5325_p12 = scmp.ne.s32.totalorder %s9111_s18, %s5324_s25 }
  0x21   : > { %505 = vxpose.xlu0.b32.cont [2/8] (short) (narrow) %v185_v1, 64  ;;  %244 = vrot.lane.b32.xlu1 %v234_v12, %s5405_s4  ;;  %v235_v15 = vsel %vm5522_vm3, 1, %v9194_v11  ;;  %v9521_v17 = vsel %vm5535_vm5, 4294967295, %v9520_v17  ;;  %v237_v21 = vsel %vm5535_vm5, 1, %v9194_v11  ;;  %vm5551_vm7 = vcmp.lt.f32.partialorder %v4659_v9, 16.0  ;;  %v5622_v48 = vld [vmem:[%s5493_s3] sm:$0xff] }
  0x22   : > { %v9523_v22 = vsel %vm5551_vm7, 4294967295, %v9522_v22  ;;  %vm5555_vm8 = vcmp.ge.f32.partialorder %v4661_v18, 0.0  ;;  %vm5569_vm10 = vcmp.lt.f32.partialorder %v4661_v18, 16.0  ;;  %vm5573_vm11 = vcmp.lt.f32.partialorder %v4655_v24, 16.0  ;;  %v5625_v49 = vld [vmem:[%s5493_s3 + $0x40] sm:$0xff]  ;;  %v5636_v54 = vld [vmem:[%s5493_s3 + $0x48] sm:$0xff]  ;;  %p5326_p13 = pnand %p5325_p12, %p5468_p4 }
  0x23   : > { %v239_v26 = vsel %vm5555_vm8, 1, %v9194_v11  ;;  %v9527_v27 = vsel %vm5569_vm10, 4294967295, %v9526_v27  ;;  %v9529_v28 = vsel %vm5573_vm11, 4294967295, %v9528_v28  ;;  %v273_v30 = vsel %vm5573_vm11, 1, %v9194_v11  ;;  %v5643_v56 = vld [vmem:[%s5493_s3 + $0x20] sm:$0xff]  ;;  %v5670_v63 = vld [vmem:[%s5493_s3 + $0x50] sm:$0xff] }
  0x24   : > { %v275_v32 = vsel %vm5531_vm4, 1, %v9194_v11  ;;  %v277_v34 = vsel %vm5551_vm7, 1, %v9194_v11  ;;  %v279_v35 = vsel %vm5569_vm10, 1, %v9194_v11  ;;  %v3905_v37 = vmax.f32 %v5545_v20, 0.0  ;;  %p5327_p0 = pneg %p5326_p13  ;;  %s5328_s27 = sshll.u32 %s5410_s26, 4  ;;  %s5329_s27 = int_to_ptr.vmem [resolvable:$false] %s5328_s27 }
  0x25   : > { %506 = vxpose.xlu0.b32.cont [3/8] (short) (narrow) %v186_v10, 64  ;;  %246 = vrot.lane.b32.xlu1 %v235_v15, %s5405_s4  ;;  %v4978_v39 = vpack.i.bf16 %v199_v14, %v5604_v38  ;;  %v5612_v43 = vmin.f32 %v3911_v41, 15.0  ;;  %v3917_v44 = vmax.f32 %v5503_v5, 0.0  ;;  %v3923_v47 = vmax.f32 %v199_v14, 0.0  ;;  %v5697_v10 = vld [vmem:[%s5493_s3 + $0x58] sm:$0xff]  ;;  %s5330_s28 = scalar_lea.vmem %s5329_s27, 32768  ;;  %p5331_p1 = scmp.lt.s32.totalorder %s9111_s18, %s5329_s27 }
  0x26   : > { %v5608_v40 = vmin.f32 %v3905_v37, 15.0  ;;  %v4654_v50 = vround.rtne.f32 %v5622_v48  ;;  %v4686_v53 = vround.rtne.f32 %v5625_v49  ;;  %vm5657_vm9 = vcmp.ge.f32.partialorder %v4655_v24, 0.0  ;;  %p5332_p2 = scmp.lt.s32.totalorder %s5330_s28, %s5324_s25 }
  0x27   : > { %9530 = vst [vmem:[#allocation5_spill] sm:$0xff] %v5612_v43  ;;  %v9184_v45 = vcvt.f32.s32 %v5612_v43  ;;  %v5619_v46 = vmin.f32 %v3917_v44, 15.0  ;;  %v5632_v52 = vmin.f32 %v3923_v47, 15.0  ;;  %v9538_v59 = vsel %vm5657_vm9, 4294967295, %v9537_v59  ;;  %v5778_v44 = vld [vmem:[%s5493_s3 + $0x78] sm:$0xff] }
  0x28   : > { %v4667_v42 = vcvt.f32.s32 %v5608_v40  ;;  %vm5638_vm13 = vcmp.ge.f32.partialorder %v4654_v50, 0.0  ;;  %vm5645_vm14 = vcmp.lt.f32.partialorder %v4654_v50, 16.0  ;;  %vm5663_vm12 = vcmp.ge.f32.partialorder %v4686_v53, 0.0  ;;  %p5333_p3 = por %p5332_p2, %p5331_p1 }
  0x29   : > { %507 = vxpose.xlu0.b32.cont [4/8] (short) (narrow) %v187_v19, 64  ;;  %250 = vrot.lane.b32.xlu1 %v237_v21, %s5405_s4  ;;  %9531 = vst [vmem:[#allocation6_spill] sm:$0xff] %v5619_v46  ;;  %v9183_v51 = vcvt.f32.s32 %v5619_v46  ;;  %9532 = vst [vmem:[#allocation7_spill] sm:$0xff] %v5632_v52  ;;  %v9534_v55 = vsel %vm5638_vm13, 4294967295, %v9533_v55  ;;  %v9536_v57 = vsel %vm5645_vm14, 4294967295, %v9535_v57  ;;  %v9182_v58 = vcvt.f32.s32 %v5632_v52  ;;  %v5721_v21 = vld [vmem:[%s5493_s3 + $0x60] sm:$0xff] }
  0x2a   : > { %v9540_v60 = vsel %vm5663_vm12, 4294967295, %v9539_v60  ;;  %v4687_v61 = vround.rtne.f32 %v5636_v54  ;;  %v4658_v62 = vround.rtne.f32 %v5643_v56  ;;  %v731_v0 = vsel %vm5663_vm12, 1, %v9194_v11  ;;  %p5334_p5 = pnand %p5333_p3, %p5327_p0 }
  0x2b   : > { %v4660_v1 = vround.rtne.f32 %v5604_v38  ;;  %v9541_v3 = vmov 0  ;;  %v4688_v4 = vround.rtne.f32 %v5670_v63  ;;  %v9543_v6 = vmov 0 }
  0x2c   : > { %vm5683_vm2 = vcmp.ge.f32.partialorder %v4687_v61, 0.0  ;;  %vm5688_vm6 = vcmp.ge.f32.partialorder %v4658_v62, 0.0  ;;  %vm5692_vm15 = vcmp.lt.f32.partialorder %v4658_v62, 16.0  ;;  %v9545_v9 = vmov 0 }
  0x2d   : > { %508 = vxpose.xlu0.b32.cont [5/8] (short) (narrow) %v188_v25, 64  ;;  %254 = vrot.lane.b32.xlu1 %v239_v26, %s5405_s4  ;;  %v9542_v3 = vsel %vm5683_vm2, 4294967295, %v9541_v3  ;;  %v9544_v6 = vsel %vm5688_vm6, 4294967295, %v9543_v6  ;;  %v9546_v9 = vsel %vm5692_vm15, 4294967295, %v9545_v9  ;;  %v732_v12 = vsel %vm5683_vm2, 1, %v9194_v11 }
  0x2e   : > { %vm5707_vm7 = vcmp.ge.f32.partialorder %v4660_v1, 0.0  ;;  %v9547_v14 = vmov 0  ;;  %vm5711_vm5 = vcmp.lt.f32.partialorder %v4660_v1, 16.0  ;;  %v9549_v15 = vmov 0 }
  0x2f   : > { %v9548_v14 = vsel %vm5707_vm7, 4294967295, %v9547_v14  ;;  %v9550_v15 = vsel %vm5711_vm5, 4294967295, %v9549_v15  ;;  %vm5715_vm11 = vcmp.ge.f32.partialorder %v4688_v4, 0.0  ;;  %v9551_v18 = vmov 0 }
  0x30   : > { %v9552_v18 = vsel %vm5715_vm11, 4294967295, %v9551_v18  ;;  %v4689_v19 = vround.rtne.f32 %v5697_v10  ;;  %v232_v24 = vsel %vm5638_vm13, 1, %v9194_v11  ;;  %v733_v25 = vsel %vm5715_vm11, 1, %v9194_v11  ;;  %vm9580_vm13 = vmand %vm5505_vm0, %vm5509_vm1 }
  0x31   : > { %509 = vxpose.xlu0.b32.cont [6/8] (short) (narrow) %v189_v29, 64  ;;  %282 = vrot.lane.b32.xlu1 %v273_v30, %s5405_s4  ;;  %v9553_v26 = vmov 0  ;;  %v9190_v29 = vround.rtne.f32 %v5721_v21  ;;  %v5741_v30 = vld [vmem:[%s5493_s3 + $0x68] sm:$0xff]  ;;  %v238_v47 = vsel %vm5707_vm7, 1, %v9194_v11  ;;  %v9559_v62 = vmov 0 }
  0x32   : > { %vm5734_vm2 = vcmp.ge.f32.partialorder %v4689_v19, 0.0  ;;  %v272_v1 = vsel %vm5645_vm14, 1, %v9194_v11  ;;  %vm5830_vm11 = vcmp.lt.f32.partialorder %v4687_v61, 16.0  ;;  %v4983_v61 = vpack.i.bf16 %v5545_v20, %v5622_v48 }
  0x33   : > { %v9554_v26 = vsel %vm5734_vm2, 4294967295, %v9553_v26  ;;  %vm5753_vm12 = vcmp.ge.f32.partialorder %v9190_v29, 0.0  ;;  %v4988_v20 = vpack.i.bf16 %v5503_v5, %v5643_v56  ;;  %v9583_v8 = vround.rtne.f32 %v5778_v44 }
  0x34   : > { %v735_v37 = vsel %vm5753_vm12, 1, %v9194_v11 }
  0x35   : > { %510 = vxpose.xlu0.b32.cont [7/8] (short) (narrow) %v190_v31, 64  ;;  %286 = vrot.lane.b32.xlu1 %v275_v32, %s5405_s4  ;;  %v233_v31 = vsel %vm5657_vm9, 1, %v9194_v11  ;;  %v734_v32 = vsel %vm5734_vm2, 1, %v9194_v11  ;;  %vm5937_vm0 = vcmp.lt.f32.partialorder %v9583_v8, 16.0 }
  0x39   : > { %511 = vxpose.xlu0.b32.end [8/8] (short) (narrow) %v191_v33, 64  ;;  %290 = vrot.lane.b32.xlu1 %v277_v34, %s5405_s4  ;;  %v9555_v33 = vmov 0  ;;  %v9189_v34 = vround.rtne.f32 %v5741_v30 }
  0x3a   : > { %v9556_v33 = vsel %vm5753_vm12, 4294967295, %v9555_v33 }
  0x3b   : > { %vm5771_vm2 = vcmp.ge.f32.partialorder %v9189_v34, 0.0 }
  0x3c   : > { %v736_v50 = vsel %vm5771_vm2, 1, %v9194_v11 }
  0x3d   : > { %294 = vrot.lane.b32.xlu1 %v279_v35, %s5405_s4  ;;  %v5760_v35 = vld [vmem:[%s5493_s3 + $0x70] sm:$0xff] }
  0x3e   : > { %v9186_v41 = vround.rtne.f32 %v5760_v35  ;;  %v3976_v13 = vmax.f32 %v5760_v35, 0.0 }
  0x40   : > { %vm5789_vm12 = vcmp.ge.f32.partialorder %v9186_v41, 0.0 }
  0x41   : > { %4974 = vrot.lane.b32.xlu1 %v4973_v36, %s5406_s5  ;;  %v236_v36 = vsel %vm5688_vm6, 1, %v9194_v11  ;;  %v9560_v62 = vsel %vm5789_vm12, 4294967295, %v9559_v62 }
  0x45   : > { %4979 = vrot.lane.b32.xlu1 %v4978_v39, %s5406_s5  ;;  %v9557_v39 = vmov 0 }
  0x46   : > { %v9558_v39 = vsel %vm5771_vm2, 4294967295, %v9557_v39 }
  0x49   : > { %386 = vrot.lane.b32.xlu1 %v4667_v42, %s5407_s6 }
  0x4d   : > { %390 = vrot.lane.b32.xlu1 %v9184_v45, %s5407_s6 }
  0x51   : > { %394 = vrot.lane.b32.xlu1 %v9183_v51, %s5407_s6 }
  0x55   : > { %398 = vrot.lane.b32.xlu1 %v9182_v58, %s5407_s6 }
  0x59   : > { %739 = vrot.lane.b32.xlu1 %v731_v0, %s5405_s4  ;;  %v9196_v0 = vround.rtne.f32 %v5778_v44 }
  0x5b   : > { %vm5804_vm2 = vcmp.ge.f32.partialorder %v9196_v0, 0.0 }
  0x5d   : > { %741 = vrot.lane.b32.xlu1 %v732_v12, %s5405_s4  ;;  %v737_v12 = vsel %vm5789_vm12, 1, %v9194_v11  ;;  %vm5818_vm12 = vcmp.lt.f32.partialorder %v4686_v53, 16.0  ;;  %v278_v53 = vsel %vm5711_vm5, 1, %v9194_v11 }
  0x61   : > { %743 = vrot.lane.b32.xlu1 %v733_v25, %s5405_s4  ;;  %v274_v25 = vsel %vm5509_vm1, 1, %v9194_v11 }
  0x62   : > { %240 = vrot.lane.b32.xlu0 %v232_v24, %s5405_s4  ;;  %v9561_v24 = vmov 0 }
  0x63   : > { %5000 = vset.pattern.permute.xlu0 %v9194_v11  ;;  %v9562_v24 = vsel %vm5804_vm2, 4294967295, %v9561_v24 }
  0x65   : > { %745 = vrot.lane.b32.xlu1 %v734_v32, %s5405_s4  ;;  %v9563_v32 = vmov 0 }
  0x66   : > { %242 = vrot.lane.b32.xlu0 %v233_v31, %s5405_s4  ;;  %v738_v31 = vsel %vm5804_vm2, 1, %v9194_v11  ;;  %v9564_v32 = vsel %vm5818_vm12, 4294967295, %v9563_v32  ;;  %vm5842_vm2 = vcmp.lt.f32.partialorder %v4688_v4, 16.0  ;;  %v9569_v4 = vmov 0 }
  0x69   : > { %747 = vrot.lane.b32.xlu1 %v735_v37, %s5405_s4  ;;  %v771_v37 = vsel %vm5818_vm12, 1, %v9194_v11 }
  0x6a   : > { %248 = vrot.lane.b32.xlu0 %v236_v36, %s5405_s4  ;;  %v276_v36 = vsel %vm5692_vm15, 1, %v9194_v11 }
  0x6d   : > { %749 = vrot.lane.b32.xlu1 %v736_v50, %s5405_s4  ;;  %v772_v50 = vsel %vm5830_vm11, 1, %v9194_v11 }
  0x6e   : > { %252 = vrot.lane.b32.xlu0 %v238_v47, %s5405_s4  ;;  %v9565_v47 = vmov 0 }
  0x6f   : > { %v9566_v47 = vsel %vm5830_vm11, 4294967295, %v9565_v47  ;;  %vm5855_vm11 = vcmp.lt.f32.partialorder %v4689_v19, 16.0 }
  0x70   : > { %v9570_v4 = vsel %vm5855_vm11, 4294967295, %v9569_v4 }
  0x71   : > { %751 = vrot.lane.b32.xlu1 %v737_v12, %s5405_s4  ;;  %v3902_v12 = vmax.f32 %v5622_v48, 0.0  ;;  %v3908_v48 = vmax.f32 %v5498_v2, 0.0 }
  0x72   : > { %280 = vrot.lane.b32.xlu0 %v272_v1, %s5405_s4  ;;  %v9567_v1 = vmov 0 }
  0x73   : > { %v9568_v1 = vsel %vm5842_vm2, 4294967295, %v9567_v1 }
  0x75   : > { %753 = vrot.lane.b32.xlu1 %v738_v31, %s5405_s4  ;;  %v773_v31 = vsel %vm5842_vm2, 1, %v9194_v11 }
  0x76   : > { %284 = vrot.lane.b32.xlu0 %v274_v25, %s5405_s4  ;;  %v9187_v25 = vmov 1  }
  0x77   : > { %4993 = vset.pattern.permute.xlu1 %v9187_v25 }
  0x79   : > { %779 = vrot.lane.b32.xlu1 %v771_v37, %s5405_s4  ;;  %v774_v37 = vsel %vm5855_vm11, 1, %v9194_v11  ;;  %vm9579_vm11 = vmand %vm5522_vm3, %vm5531_vm4  ;;  %vm9581_vm3 = vnez %v9527_v27 }
  0x7a   : > { %288 = vrot.lane.b32.xlu0 %v276_v36, %s5405_s4  ;;  %v5862_v36 = vmin.f32 %v3902_v12, 15.0  ;;  %vm9582_vm4 = vmand %vm5555_vm8, %vm9581_vm3  ;;  %vm9589_vm8 = vnez %v9538_v59  ;;  %v9618_v59 = vmov 1  }
  0x7c   : > { %v9185_v19 = vcvt.f32.s32 %v5862_v36 }
  0x7d   : > { %781 = vrot.lane.b32.xlu1 %v772_v50, %s5405_s4  ;;  %v3914_v50 = vmax.f32 %v5643_v56, 0.0 }
  0x7e   : > { %292 = vrot.lane.b32.xlu0 %v278_v53, %s5405_s4  ;;  %v5871_v53 = vmin.f32 %v3908_v48, 15.0 }
  0x7f   : > { %v5879_v5 = vmin.f32 %v3914_v50, 15.0 }
  0x80   : > { %v9193_v2 = vcvt.f32.s32 %v5871_v53 }
  0x81   : > { %783 = vrot.lane.b32.xlu1 %v773_v31, %s5405_s4  ;;  %v9192_v12 = vcvt.f32.s32 %v5879_v5 }
  0x82   : > { %4984 = vrot.lane.b32.xlu0 %v4983_v61, %s5406_s5  ;;  %v3920_v61 = vmax.f32 %v5604_v38, 0.0 }
  0x84   : > { %v5886_v31 = vmin.f32 %v3920_v61, 15.0 }
  0x85   : > { %785 = vrot.lane.b32.xlu1 %v774_v37, %s5405_s4 }
  0x86   : > { %4989 = vrot.lane.b32.xlu0 %v4988_v20, %s5406_s5  ;;  %v9191_v56 = vcvt.f32.s32 %v5886_v31  ;;  %v9611_v8 = vcvt.f32.s32 %v5886_v31  ;;  %v9615_v31 = vround.rtne.f32 %v5741_v30 }
  0x88   : > { %v382_v23 = vmul.u32 16, %v9611_v8 }
  0x8a   : > { %384 = vrot.lane.b32.xlu0 %v9185_v19, %s5407_s6 }
  0x8e   : > { %388 = vrot.lane.b32.xlu0 %v9193_v2, %s5407_s6 }
  0x92   : > { %392 = vrot.lane.b32.xlu0 %v9192_v12, %s5407_s6 }
  0x93   : > { %v245_v20 = vpop.permute.xlu1 %244 }
  0x94   : > { %vm258_vm6 = vcmp.ne.s32.totalorder %v245_v20, 0  ;;  %v5941_v20 = vmin.f32 %v3976_v13, 15.0 }
  0x95   : > { %vm266_vm5 = vmand %vm9580_vm13, %vm258_vm6 }
  0x96   : > { %396 = vrot.lane.b32.xlu0 %v9191_v56, %s5407_s6  ;;  %v377_v56 = vmul.u32 16, %v4667_v42 }
  0x97   : > { %v247_v38 = vpop.permute.xlu1 %246 }
  0x98   : > { %vm259_vm12 = vcmp.ne.s32.totalorder %v247_v38, 0 }
  0x99   : > { %vm267_vm2 = vmand %vm9579_vm11, %vm259_vm12 }
  0x9b   : > { %v5895_v48 = vpop.permute.xlu1 %250 }
  0x9d   : > { %v5897_v50 = vpop.trf.xlu0 }
  0x9e   : > { %9571 = vst [vmem:[#allocation8_spill] sm:$0xff] %v5897_v50 }
  0x9f   : > { %v255_v37 = vpop.permute.xlu1 %254 }
  0xa0   : > { %vm263_vm7 = vcmp.ne.s32.totalorder %v255_v37, 0 }
  0xa1   : > { %v5901_v51 = vpop.trf.xlu0 }
  0xa2   : > { %9572 = vst [vmem:[#allocation9_spill] sm:$0xff] %v5901_v51 }
  0xa3   : > { %v5899_v58 = vpop.permute.xlu1 %282 }
  0xa5   : > { %v5905_v19 = vpop.trf.xlu0 }
  0xa6   : > { %9573 = vst [vmem:[#allocation10_spill] sm:$0xff] %v5905_v19 }
  0xa7   : > { %v287_v61 = vpop.permute.xlu1 %286 }
  0xa8   : > { %vm299_vm15 = vcmp.ne.s32.totalorder %v287_v61, 0 }
  0xa9   : > { %v5907_v34 = vpop.trf.xlu0  ;;  %vm307_vm14 = vmand %vm267_vm2, %vm299_vm15  ;;  %vm9595_vm15 = vnez %v9550_v15 }
  0xaa   : > { %9574 = vst [vmem:[#allocation11_spill] sm:$0xff] %v5907_v34  ;;  %vm271_vm2 = vmand %vm9582_vm4, %vm263_vm7  ;;  %vm261_vm7 = vcmp.ne.s32.totalorder %v5895_v48, 0 }
  0xab   : > { %v5903_v45 = vpop.permute.xlu1 %290 }
  0xad   : > { %v5911_v12 = vpop.trf.xlu0 }
  0xae   : > { %9575 = vst [vmem:[#allocation12_spill] sm:$0xff] %v5911_v12 }
  0xaf   : > { %v295_v41 = vpop.permute.xlu1 %294 }
  0xb0   : > { %vm303_vm11 = vcmp.ne.s32.totalorder %v295_v41, 0  ;;  %v9588_v41 = vmov 0  }
  0xb1   : > { %v5913_v0 = vpop.trf.xlu0  ;;  %vm5943_vm6 = vmand %vm271_vm2, %vm303_vm11  ;;  %v778_v37 = vsel %vm5937_vm0, 1, %v9588_v41  ;;  %vm297_vm11 = vcmp.ne.s32.totalorder %v5899_v58, 0 }
  0xb2   : > { %9576 = vst [vmem:[#allocation13_spill] sm:$0xff] %v5913_v0 }
  0xb3   : > { %v4975_v25 = vpop.permute.xlu1 %4974 }
  0xb4   : > { %v4976_v40 = vunpack.i.l.bf16 %v4975_v25 }
  0xb5   : > { %v5915_v51 = vpop.trf.xlu0 }
  0xb6   : > { %9577 = vst [vmem:[#allocation14_spill] sm:$0xff] %v5915_v51 }
  0xb7   : > { %v4980_v29 = vpop.permute.xlu1 %4979 }
  0xb8   : > { %v4982_v27 = vunpack.i.h.bf16 %v4980_v29  ;;  %v4981_v38 = vunpack.i.l.bf16 %v4980_v29 }
  0xb9   : > { %v5917_v50 = vpop.trf.xlu0 }
  0xba   : > { %9578 = vst [vmem:[#allocation15_spill] sm:$0xff] %v5917_v50  ;;  %v351_v15 = vsel %vm5943_vm6, %v4982_v27, 0.0 }
  0xbb   : > { %v387_v2 = vpop.permute.xlu1 %386 }
  0xbc   : > { %v401_v11 = vadd.s32 %v387_v2, %v377_v56  ;;  %v9584_v56 = vmov 0 }
  0xbd   : > { %v9585_v56 = vsel %vm5937_vm0, 4294967295, %v9584_v56 }
  0xbe   : > { %412 = vperm.xlu1 %4993, %v401_v11   ;;  %v4977_v11 = vunpack.i.h.bf16 %v4975_v25 }
  0xc0   : > { %v347_v2 = vsel %vm307_vm14, %v4977_v11, 0.0  ;;  %vm9594_vm14 = vnez %v9548_v14 }
  0xc1   : > { %vm9596_vm3 = vmand %vm9594_vm14, %vm9595_vm15  ;;  %vm9603_vm14 = vnez %v9536_v57 }
  0xd4   : > { %v241_v19 = vpop.permute.xlu0 %240 }
  0xd5   : > { %vm256_vm13 = vcmp.ne.s32.totalorder %v241_v19, 0 }
  0xd8   : > { %v243_v52 = vpop.permute.xlu0 %242 }
  0xd9   : > { %vm257_vm1 = vcmp.ne.s32.totalorder %v243_v52, 0 }
  0xdc   : > { %v249_v46 = vpop.permute.xlu0 %248 }
  0xe0   : > { %v253_v43 = vpop.permute.xlu0 %252 }
  0xe4   : > { %v281_v34 = vpop.permute.xlu0 %280 }
  0xe8   : > { %v285_v42 = vpop.permute.xlu0 %284 }
  0xe9   : > { %vm298_vm9 = vcmp.ne.s32.totalorder %v285_v42, 0  ;;  %v9609_v42 = vcvt.f32.s32 %v5871_v53  ;;  %v9612_v53 = vround.rtne.f32 %v5721_v21 }
  0xea   : > { %vm306_vm10 = vmand %vm266_vm5, %vm298_vm9  ;;  %vm262_vm5 = vcmp.ne.s32.totalorder %v253_v43, 0  ;;  %vm9590_vm9 = vnez %v9529_v28  ;;  %v9592_v43 = vmov 0  ;;  %v4714_v28 = vcvt.f32.s32 %v5941_v20 }
  0xeb   : > { %v346_v16 = vsel %vm306_vm10, %v4976_v40, 0.0  ;;  %vm9591_vm10 = vmand %vm9589_vm8, %vm9590_vm9  ;;  %vm9598_vm8 = vnez %v9523_v22  ;;  %v378_v13 = vmul.u32 16, %v9609_v42  ;;  %v3964_v42 = vmax.f32 %v5670_v63, 0.0 }
  0xec   : > { %v289_v25 = vpop.permute.xlu0 %288  ;;  %v5001_v7 = vpack.i.bf16 %v347_v2, %v346_v16  ;;  %vm5956_vm12 = vmand %vm9591_vm10, %vm257_vm1  ;;  %vm9597_vm1 = vnez %v9521_v17 }
  0xed   : > { %v9593_v43 = vsel %vm5956_vm12, 4294967295, %v9592_v43  ;;  %vm270_vm4 = vmand %vm9596_vm3, %vm262_vm5  ;;  %vm296_vm12 = vcmp.ne.s32.totalorder %v281_v34, 0  ;;  %vm9602_vm5 = vnez %v9534_v55  ;;  %vm300_vm6 = vcmp.ne.s32.totalorder %v289_v25, 0 }
  0xee   : > { %5002 = vperm.xlu0 %5000, %v5001_v7   ;;  %vm9599_vm9 = vmand %vm9597_vm1, %vm9598_vm8  ;;  %vm260_vm1 = vcmp.ne.s32.totalorder %v249_v46, 0  ;;  %vm9606_vm8 = vnez %v9544_v6  ;;  %v9610_v25 = vcvt.f32.s32 %v5879_v5 }
  0xef   : > { %vm5973_vm10 = vmand %vm9599_vm9, %vm261_vm7  ;;  %vm9605_vm7 = vnez %v9593_v43  ;;  %v9616_v43 = vmov 0 }
  0xf0   : > { %v293_v52 = vpop.permute.xlu0 %292  ;;  %vm9604_vm15 = vmand %vm9602_vm5, %vm9603_vm14  ;;  %v380_v6 = vmul.u32 16, %v9610_v25  ;;  %vm6017_vm14 = vcmp.lt.f32.partialorder %v9615_v31, 16.0  ;;  %v3970_v25 = vmax.f32 %v5721_v21, 0.0 }
  0xf1   : > { %vm302_vm2 = vcmp.ne.s32.totalorder %v293_v52, 0  ;;  %vm264_vm3 = vmand %vm9604_vm15, %vm256_vm13  ;;  %v9617_v43 = vsel %vm6017_vm14, 4294967295, %v9616_v43  ;;  %v776_v52 = vsel %vm6017_vm14, 1, %v9588_v41 }
  0xf2   : > { %vm310_vm0 = vmand %vm270_vm4, %vm302_vm2  ;;  %793 = vrot.lane.b32.xlu0 %v778_v37, %s5405_s4  ;;  %vm301_vm4 = vcmp.ne.s32.totalorder %v5903_v45, 0  ;;  %v9613_v37 = vmov 0 }
  0xf3   : > { %v350_v14 = vsel %vm310_vm0, %v4981_v38, 0.0  ;;  %vm305_vm2 = vmand %vm9605_vm7, %vm297_vm11  ;;  %vm9607_vm11 = vnez %v9546_v9 }
  0xf4   : > { %v4985_v58 = vpop.permute.xlu0 %4984  ;;  %v5011_v17 = vpack.i.bf16 %v351_v15, %v350_v14  ;;  %vm304_vm0 = vmand %vm264_vm3, %vm296_vm12  ;;  %v9619_v14 = vround.rtne.f32 %v5760_v35  ;;  %v9620_v15 = vmov 0  ;;  %vm9629_vm3 = vnez %v9568_v1 }
  0xf5   : > { %v4987_v22 = vunpack.i.h.bf16 %v4985_v58  ;;  %v4986_v29 = vunpack.i.l.bf16 %v4985_v58  ;;  %vm309_vm13 = vmand %vm5973_vm10, %vm301_vm4  ;;  %vm6008_vm10 = vcmp.lt.f32.partialorder %v9612_v53, 16.0  ;;  %vm9630_vm4 = vnez %v9552_v18 }
  0xf6   : > { %895 = vrot.lane.b32.xlu0 %v4714_v28, %s5407_s6  ;;  %vm9608_vm9 = vmand %vm9606_vm8, %vm9607_vm11  ;;  %v9614_v37 = vsel %vm6008_vm10, 4294967295, %v9613_v37  ;;  %v775_v5 = vsel %vm6008_vm10, 1, %v9588_v41  ;;  %vm6028_vm15 = vcmp.lt.f32.partialorder %v9619_v14, 16.0 }
  0xf7   : > { %v344_v55 = vsel %vm304_vm0, %v4986_v29, 0.0  ;;  %v345_v57 = vsel %vm305_vm2, %v4987_v22, 0.0  ;;  %vm268_vm5 = vmand %vm9608_vm9, %vm260_vm1  ;;  %v9621_v15 = vsel %vm6028_vm15, 4294967295, %v9620_v15  ;;  %v777_v58 = vsel %vm6028_vm15, 1, %v9588_v41 }
  0xf8   : > { %v4990_v34 = vpop.permute.xlu0 %4989  ;;  %v4995_v19 = vpack.i.bf16 %v345_v57, %v344_v55  ;;  %vm308_vm12 = vmand %vm268_vm5, %vm300_vm6  ;;  %v5016_v22 = vpack.i.bf16 %v5636_v54, %v5625_v49  ;;  %v5021_v29 = vpack.i.bf16 %v5697_v10, %v5670_v63  ;;  %v5026_v57 = vpack.i.bf16 %v5741_v30, %v5721_v21 }
  0xf9   : > { %v4992_v45 = vunpack.i.h.bf16 %v4990_v34  ;;  %v4991_v46 = vunpack.i.l.bf16 %v4990_v34  ;;  %v3958_v34 = vmax.f32 %v5625_v49, 0.0  ;;  %v3979_v21 = vmax.f32 %v5778_v44, 0.0  ;;  %vm725_vm7 = vmand %vm9630_vm4, %vm9629_vm3 }
  0xfa   : > { %vm9631_vm2 = vnez %v9570_v4  ;;  %vm9632_vm1 = vnez %v9554_v26  ;;  %v6153_v26 = vld [vmem:[%s5493_s3 + $0x80] sm:$0xff] }
  0xfb   : > { %v348_v48 = vsel %vm308_vm12, %v4991_v46, 0.0  ;;  %v349_v61 = vsel %vm309_vm13, %v4992_v45, 0.0  ;;  %v5031_v45 = vpack.i.bf16 %v5778_v44, %v5760_v35  ;;  %v6055_v46 = vmin.f32 %v3958_v34, 15.0  ;;  %vm726_vm0 = vmand %vm9632_vm1, %vm9631_vm2 }
  0xfc   : > { %v5997_v11 = vpop.permute.xlu0 %384  ;;  %v5006_v40 = vpack.i.bf16 %v349_v61, %v348_v48  ;;  %v3961_v48 = vmax.f32 %v5636_v54, 0.0  ;;  %v3967_v54 = vmax.f32 %v5697_v10, 0.0  ;;  %v3973_v10 = vmax.f32 %v5741_v30, 0.0 }
  0xfd   : > { %v9223_v61 = vcvt.f32.s32 %v6055_v46  ;;  %v6099_v53 = vmin.f32 %v3979_v21, 15.0  ;;  %vm9642_vm13 = vnez %v9558_v39 }
  0xff   : > { %v9217_v30 = vcvt.f32.s32 %v6099_v53 }
 0x100   : > { %v389_v16 = vpop.permute.xlu0 %388 }
 0x101   : > { %v402_v2 = vadd.s32 %v389_v16, %v378_v13  ;;  %v6069_v13 = vmin.f32 %v3964_v42, 15.0 }
 0x103   : > { %415 = vperm.xlu1 %4993, %v402_v2   ;;  %v4702_v63 = vcvt.f32.s32 %v6069_v13  ;;  %v6078_v2 = vmin.f32 %v3967_v54, 15.0 }
 0x104   : > { %v393_v9 = vpop.permute.xlu0 %392 }
 0x105   : > { %v404_v7 = vadd.s32 %v393_v9, %v380_v6  ;;  %v9221_v6 = vcvt.f32.s32 %v6078_v2  ;;  %v6085_v9 = vmin.f32 %v3970_v25, 15.0 }
 0x107   : > { %421 = vperm.xlu1 %4993, %v404_v7   ;;  %v4708_v8 = vcvt.f32.s32 %v6085_v9 }
 0x108   : > { %v397_v27 = vpop.permute.xlu0 %396 }
 0x109   : > { %v406_v38 = vadd.s32 %v397_v27, %v382_v23  ;;  %v6092_v23 = vmin.f32 %v3973_v10, 15.0 }
 0x10b   : > { %427 = vperm.xlu1 %4993, %v406_v38   ;;  %v9220_v38 = vcvt.f32.s32 %v6092_v23 }
 0x10f   : > { %4994 = vset.pattern.permute.xlu1 %v9588_v41 }
 0x110   : > { %4996 = vperm.xlu1 %4994, %v4995_v19  }
 0x114   : > { %5007 = vperm.xlu1 %4994, %v5006_v40   ;;  %v6060_v40 = vmin.f32 %v3961_v48, 15.0 }
 0x116   : > { %v4699_v35 = vcvt.f32.s32 %v6060_v40 }
 0x118   : > { %5012 = vperm.xlu1 %4994, %v5011_v17   ;;  %v6036_v17 = vpop.permute.xlu1 %390 }
 0x11c   : > { %787 = vrot.lane.b32.xlu1 %v775_v5, %s5405_s4  ;;  %v6044_v55 = vpop.permute.xlu1 %394 }
 0x11d   : > { %5036 = vset.pattern.permute.xlu1 %v9618_v59 }
 0x120   : > { %789 = vrot.lane.b32.xlu1 %v776_v52, %s5405_s4  ;;  %v6050_v19 = vpop.permute.xlu1 %398 }
 0x124   : > { %791 = vrot.lane.b32.xlu1 %v777_v58, %s5405_s4  ;;  %v6063_v49 = vpop.permute.xlu1 %739 }
 0x128   : > { %5017 = vrot.lane.b32.xlu1 %v5016_v22, %s5406_s5  ;;  %v6072_v16 = vpop.permute.xlu1 %741 }
 0x12c   : > { %5022 = vrot.lane.b32.xlu1 %v5021_v29, %s5406_s5  ;;  %v744_v7 = vpop.permute.xlu1 %743 }
 0x12d   : > { %vm757_vm6 = vcmp.ne.s32.totalorder %v744_v7, 0  ;;  %v4718_v7 = vround.rtne.f32 %v6153_v26 }
 0x12e   : > { %vm765_vm4 = vmand %vm725_vm7, %vm757_vm6  ;;  %vm9640_vm6 = vnez %v9614_v37 }
 0x130   : > { %5027 = vrot.lane.b32.xlu1 %v5026_v57, %s5406_s5  ;;  %v746_v27 = vpop.permute.xlu1 %745 }
 0x131   : > { %vm758_vm11 = vcmp.ne.s32.totalorder %v746_v27, 0 }
 0x132   : > { %vm766_vm1 = vmand %vm726_vm0, %vm758_vm11  ;;  %vm9639_vm0 = vnez %v9556_v33 }
 0x133   : > { %vm9641_vm11 = vmand %vm9639_vm0, %vm9640_vm6 }
 0x134   : > { %5032 = vrot.lane.b32.xlu1 %v5031_v45, %s5406_s5  ;;  %v748_v5 = vpop.permute.xlu1 %747 }
 0x135   : > { %vm759_vm10 = vcmp.ne.s32.totalorder %v748_v5, 0 }
 0x136   : > { %vm767_vm12 = vmand %vm9641_vm11, %vm759_vm10 }
 0x138   : > { %883 = vrot.lane.b32.xlu1 %v9223_v61, %s5407_s6  ;;  %v750_v44 = vpop.permute.xlu1 %749 }
 0x139   : > { %vm760_vm9 = vcmp.ne.s32.totalorder %v750_v44, 0 }
 0x13c   : > { %885 = vrot.lane.b32.xlu1 %v4699_v35, %s5407_s6  ;;  %v752_v31 = vpop.permute.xlu1 %751 }
 0x140   : > { %887 = vrot.lane.b32.xlu1 %v4702_v63, %s5407_s6  ;;  %v6108_v52 = vpop.permute.xlu1 %753 }
 0x141   : > { %vm762_vm10 = vcmp.ne.s32.totalorder %v6108_v52, 0 }
 0x144   : > { %889 = vrot.lane.b32.xlu1 %v9221_v6, %s5407_s6  ;;  %v6110_v14 = vpop.permute.xlu1 %779  ;;  %v6161_v6 = vld [vmem:[%s5493_s3 + $0x90] sm:$0xff] }
 0x145   : > { %v4720_v37 = vround.rtne.f32 %v6161_v6 }
 0x148   : > { %891 = vrot.lane.b32.xlu1 %v4708_v8, %s5407_s6  ;;  %v6112_v58 = vpop.permute.xlu1 %781 }
 0x14c   : > { %893 = vrot.lane.b32.xlu1 %v9220_v38, %s5407_s6  ;;  %v784_v22 = vpop.permute.xlu1 %783 }
 0x14d   : > { %vm797_vm2 = vcmp.ne.s32.totalorder %v784_v22, 0 }
 0x14e   : > { %vm805_vm3 = vmand %vm765_vm4, %vm797_vm2  ;;  %vm9643_vm4 = vnez %v9617_v43 }
 0x14f   : > { %vm9644_vm2 = vmand %vm9642_vm13, %vm9643_vm4 }
 0x150   : > { %897 = vrot.lane.b32.xlu1 %v9217_v30, %s5407_s6  ;;  %v786_v29 = vpop.permute.xlu1 %785  ;;  %vm768_vm5 = vmand %vm9644_vm2, %vm760_vm9  ;;  %vm9647_vm9 = vnez %v9560_v62  ;;  %vm6202_vm2 = vcmp.ge.f32.partialorder %v4720_v37, 0.0 }
 0x151   : > { %vm798_vm8 = vcmp.ne.s32.totalorder %v786_v29, 0 }
 0x152   : > { %vm806_vm15 = vmand %vm766_vm1, %vm798_vm8  ;;  %vm761_vm1 = vcmp.ne.s32.totalorder %v752_v31, 0  ;;  %vm6173_vm8 = vcmp.ge.f32.partialorder %v4718_v7, 0.0 }
 0x153   : > { %v1174_v31 = vsel %vm6173_vm8, 1, %v9588_v41 }
 0x154   : > { %v6114_v57 = vpop.permute.xlu1 %412 }
 0x155   : > { %9622 = vst [vmem:[#allocation16_spill] sm:$0xff] %v6114_v57 }
 0x16d   : > { %v6150_v18 = vpop.permute.xlu0 %5002 }
 0x16e   : > { %9636 = vst [vmem:[#allocation23_spill] sm:$0xff] %v6150_v18 }
 0x171   : > { %v794_v5 = vpop.permute.xlu0 %793 }
 0x175   : > { %v896_v9 = vpop.permute.xlu0 %895 }
 0x182   : > { %v6116_v34 = vpop.permute.xlu1 %415 }
 0x183   : > { %9623 = vst [vmem:[#allocation17_spill] sm:$0xff] %v6116_v34 }
 0x186   : > { %v6118_v45 = vpop.permute.xlu1 %421 }
 0x187   : > { %9624 = vst [vmem:[#allocation18_spill] sm:$0xff] %v6118_v45  ;;  %v6495_v45 = vld [vmem:[%s5493_s3 + $0xc0] sm:$0xff] }
 0x18a   : > { %v6120_v48 = vpop.permute.xlu1 %427 }
 0x18b   : > { %9625 = vst [vmem:[#allocation19_spill] sm:$0xff] %v6120_v48 }
 0x18f   : > { %v6122_v42 = vpop.permute.xlu1 %4996 }
 0x190   : > { %9626 = vst [vmem:[#allocation20_spill] sm:$0xff] %v6122_v42 }
 0x193   : > { %v6124_v54 = vpop.permute.xlu1 %5007 }
 0x194   : > { %9627 = vst [vmem:[#allocation21_spill] sm:$0xff] %v6124_v54 }
 0x197   : > { %v6126_v25 = vpop.permute.xlu1 %5012 }
 0x198   : > { %9628 = vst [vmem:[#allocation22_spill] sm:$0xff] %v6126_v25 }
 0x19b   : > { %v788_v10 = vpop.permute.xlu1 %787 }
 0x19c   : > { %vm799_vm7 = vcmp.ne.s32.totalorder %v788_v10, 0 }
 0x19d   : > { %vm807_vm0 = vmand %vm767_vm12, %vm799_vm7  ;;  %vm9650_vm12 = vnez %v9562_v24 }
 0x19f   : > { %v790_v21 = vpop.permute.xlu1 %789 }
 0x1a0   : > { %vm800_vm14 = vcmp.ne.s32.totalorder %v790_v21, 0 }
 0x1a1   : > { %vm808_vm13 = vmand %vm768_vm5, %vm800_vm14  ;;  %vm9651_vm14 = vnez %v9585_v56 }
 0x1a2   : > { %vm9652_vm5 = vmand %vm9650_vm12, %vm9651_vm14  ;;  %vm9665_vm12 = vnez %v9566_v47  ;;  %vm9666_vm14 = vnez %v9542_v3 }
 0x1a3   : > { %v792_v30 = vpop.permute.xlu1 %791  ;;  %vm770_vm7 = vmand %vm9652_vm5, %vm762_vm10 }
 0x1a4   : > { %vm801_vm4 = vcmp.ne.s32.totalorder %v792_v30, 0  ;;  %vm724_vm5 = vmand %vm9666_vm14, %vm9665_vm12 }
 0x1a7   : > { %v6144_v1 = vpop.permute.xlu1 %5017 }
 0x1a8   : > { %v5020_v3 = vunpack.i.h.bf16 %v6144_v1  ;;  %v5019_v47 = vunpack.i.l.bf16 %v6144_v1  ;;  %v6296_v1 = vld [vmem:[%s5493_s3 + $0x88] sm:$0xff] }
 0x1ab   : > { %v5023_v4 = vpop.permute.xlu1 %5022 }
 0x1ac   : > { %v5025_v27 = vunpack.i.h.bf16 %v5023_v4  ;;  %v5024_v38 = vunpack.i.l.bf16 %v5023_v4 }
 0x1ae   : > { %v845_v22 = vsel %vm805_vm3, %v5024_v38, 0.0  ;;  %v846_v29 = vsel %vm806_vm15, %v5025_v27, 0.0  ;;  %v6180_v27 = vld [vmem:[%s5493_s3 + $0xa0] sm:$0xff]  ;;  %vm802_vm15 = vcmp.ne.s32.totalorder %v794_v5, 0  ;;  %vm9648_vm3 = vnez %v9621_v15 }
 0x1af   : > { %v5028_v44 = vpop.permute.xlu1 %5027  ;;  %v5043_v10 = vpack.i.bf16 %v846_v29, %v845_v22  ;;  %vm9649_vm6 = vmand %vm9647_vm9, %vm9648_vm3  ;;  %v4722_v52 = vround.rtne.f32 %v6180_v27  ;;  %v6208_v22 = vld [vmem:[%s5493_s3 + $0xb0] sm:$0xff]  ;;  %v1176_v29 = vsel %vm6202_vm2, 1, %v9588_v41  ;;  %vm6253_vm9 = vcmp.lt.f32.partialorder %v4720_v37, 16.0 }
 0x1b0   : > { %v5030_v38 = vunpack.i.h.bf16 %v5028_v44  ;;  %v5029_v4 = vunpack.i.l.bf16 %v5028_v44  ;;  %vm769_vm11 = vmand %vm9649_vm6, %vm761_vm1  ;;  %v877_v44 = vmul.u32 16, %v4702_v63  ;;  %vm9663_vm3 = vnez %v9564_v32 }
 0x1b1   : > { %5044 = vperm.xlu0 %5000, %v5043_v10   ;;  %vm810_vm1 = vmand %vm770_vm7, %vm802_vm15  ;;  %vm6222_vm10 = vcmp.ge.f32.partialorder %v4722_v52, 0.0  ;;  %vm9664_vm6 = vnez %v9540_v60  ;;  %v1216_v37 = vsel %vm6253_vm9, 1, %v9588_v41  ;;  %vm756_vm7 = vcmp.ne.s32.totalorder %v6072_v16, 0 }
 0x1b2   : > { %v6188_v39 = vsel %vm808_vm13, %v5030_v38, 0.0  ;;  %v6190_v43 = vsel %vm807_vm0, %v5029_v4, 0.0  ;;  %vm809_vm0 = vmand %vm769_vm11, %vm801_vm4  ;;  %v4724_v4 = vround.rtne.f32 %v6208_v22  ;;  %vm6243_vm13 = vcmp.lt.f32.partialorder %v4718_v7, 16.0 }
 0x1b3   : > { %v5033_v15 = vpop.permute.xlu1 %5032  ;;  %v1214_v13 = vsel %vm6243_vm13, 1, %v9588_v41  ;;  %v879_v7 = vmul.u32 16, %v4708_v8  ;;  %vm723_vm11 = vmand %vm9664_vm6, %vm9663_vm3  ;;  %vm755_vm4 = vcmp.ne.s32.totalorder %v6063_v49, 0  ;;  %v9667_v60 = vmov 0 }
 0x1b4   : > { %v5035_v21 = vunpack.i.h.bf16 %v5033_v15  ;;  %v5034_v5 = vunpack.i.l.bf16 %v5033_v15  ;;  %v1178_v15 = vsel %vm6222_vm10, 1, %v9588_v41  ;;  %vm6233_vm15 = vcmp.ge.f32.partialorder %v4724_v4, 0.0 }
 0x1b5   : > { %1182 = vrot.lane.b32.xlu0 %v1174_v31, %s5405_s4  ;;  %v876_v31 = vmul.u32 16, %v4699_v35  ;;  %v1180_v40 = vsel %vm6233_vm15, 1, %v9588_v41  ;;  %vm795_vm3 = vcmp.ne.s32.totalorder %v6110_v14, 0  ;;  %vm796_vm6 = vcmp.ne.s32.totalorder %v6112_v58, 0 }
 0x1b6   : > { %v6211_v24 = vsel %vm810_vm1, %v5035_v21, 0.0  ;;  %v6213_v56 = vsel %vm809_vm0, %v5034_v5, 0.0  ;;  %v9657_v5 = vmov 0  ;;  %vm6275_vm1 = vcmp.lt.f32.partialorder %v4722_v52, 16.0  ;;  %vm763_vm0 = vmand %vm723_vm11, %vm755_vm4 }
 0x1b7   : > { %v6220_v10 = vpop.permute.xlu1 %883  ;;  %v9658_v5 = vsel %vm6233_vm15, 4294967295, %v9657_v5  ;;  %v9668_v60 = vsel %vm6275_vm1, 4294967295, %v9667_v60  ;;  %vm764_vm15 = vmand %vm724_vm5, %vm756_vm7  ;;  %vm6287_vm11 = vcmp.lt.f32.partialorder %v4724_v4, 16.0  ;;  %v9669_v16 = vmov 0 }
 0x1b8   : > { %v9670_v16 = vsel %vm6287_vm11, 4294967295, %v9669_v16  ;;  %vm803_vm4 = vmand %vm763_vm0, %vm795_vm3  ;;  %v1220_v58 = vsel %vm6287_vm11, 1, %v9588_v41  ;;  %v4030_v4 = vmax.f32 %v6153_v26, 0.0 }
 0x1b9   : > { %1186 = vrot.lane.b32.xlu0 %v1176_v29, %s5405_s4  ;;  %vm804_vm12 = vmand %vm764_vm15, %vm796_vm6  ;;  %v843_v14 = vsel %vm803_vm4, %v5019_v47, 0.0 }
 0x1ba   : > { %v844_v8 = vsel %vm804_vm12, %v5020_v3, 0.0  ;;  %vm1168_vm12 = vmand %vm6202_vm2, %vm6253_vm9 }
 0x1bb   : > { %v886_v21 = vpop.permute.xlu1 %885  ;;  %v5038_v52 = vpack.i.bf16 %v844_v8, %v843_v14 }
 0x1bc   : > { %v900_v61 = vadd.s32 %v886_v21, %v876_v31  ;;  %v6304_v31 = vld [vmem:[%s5493_s3 + $0xa8] sm:$0xff]  ;;  %v4025_v21 = vld [vmem:[%s5493_s3 + $0x98] sm:$0xff] }
 0x1bd   : > { %1190 = vrot.lane.b32.xlu0 %v1178_v15, %s5405_s4  ;;  %v4719_v15 = vround.rtne.f32 %v6296_v1  ;;  %v4723_v3 = vround.rtne.f32 %v6304_v31 }
 0x1be   : > { %911 = vperm.xlu1 %5036, %v900_v61  }
 0x1bf   : > { %v888_v35 = vpop.permute.xlu1 %887  ;;  %vm6317_vm15 = vcmp.ge.f32.partialorder %v4719_v15, 0.0  ;;  %vm6350_vm5 = vcmp.ge.f32.partialorder %v4723_v3, 0.0  ;;  %vm6376_vm0 = vcmp.lt.f32.partialorder %v4719_v15, 16.0  ;;  %vm6395_vm6 = vcmp.lt.f32.partialorder %v4723_v3, 16.0 }
 0x1c0   : > { %v901_v62 = vadd.s32 %v888_v35, %v877_v44  ;;  %v5058_v44 = vpack.i.bf16 %v6296_v1, %v6153_v26  ;;  %v6311_v35 = vmin.f32 %v4030_v4, 15.0  ;;  %v9672_v26 = vpack.i.bf16 %v6188_v39, %v6190_v43 }
 0x1c1   : > { %1194 = vrot.lane.b32.xlu0 %v1180_v40, %s5405_s4  ;;  %v5068_v40 = vpack.i.bf16 %v6304_v31, %v6180_v27  ;;  %v1175_v39 = vsel %vm6317_vm15, 1, %v9588_v41  ;;  %v5063_v3 = vpack.i.bf16 %v4025_v21, %v6161_v6 }
 0x1c2   : > { %914 = vperm.xlu1 %5036, %v901_v62   ;;  %v881_v62 = vmul.u32 16, %v4714_v28  ;;  %v1218_v28 = vsel %vm6275_vm1, 1, %v9588_v41  ;;  %9671 = vst [vmem:[#allocation24_spill] sm:$0xff] %v6311_v35 }
 0x1c3   : > { %v6251_v63 = vpop.permute.xlu1 %889 }
 0x1c4   : > { %v905_v20 = vadd.s32 %v896_v9, %v881_v62  ;;  %v9673_v62 = vmov 0  ;;  %v4042_v9 = vmax.f32 %v6180_v27, 0.0 }
 0x1c5   : > { %1222 = vrot.lane.b32.xlu0 %v1214_v13, %s5405_s4  ;;  %v4036_v13 = vmax.f32 %v6161_v6, 0.0  ;;  %v9674_v62 = vsel %vm6317_vm15, 4294967295, %v9673_v62 }
 0x1c6   : > { %v6341_v47 = vmin.f32 %v4042_v9, 15.0 }
 0x1c7   : > { %v892_v32 = vpop.permute.xlu1 %891 }
 0x1c8   : > { %v903_v49 = vadd.s32 %v892_v32, %v879_v7  ;;  %v4721_v7 = vround.rtne.f32 %v4025_v21  ;;  %v6323_v32 = vmin.f32 %v4036_v13, 15.0  ;;  %v9231_v14 = vcvt.f32.s32 %v6341_v47 }
 0x1c9   : > { %1226 = vrot.lane.b32.xlu0 %v1216_v37, %s5405_s4  ;;  %v9228_v37 = vcvt.f32.s32 %v6311_v35  ;;  %v9682_v13 = vmov 0 }
 0x1ca   : > { %920 = vperm.xlu1 %5036, %v903_v49   ;;  %v9675_v49 = vpack.i.bf16 %v6211_v24, %v6213_v56  ;;  %vm6332_vm14 = vcmp.ge.f32.partialorder %v4721_v7, 0.0  ;;  %v9232_v27 = vcvt.f32.s32 %v6323_v32  ;;  %v4048_v24 = vmax.f32 %v6208_v22, 0.0  ;;  %v4029_v56 = vld [vmem:[%s5493_s3 + $0xb8] sm:$0xff] }
 0x1cb   : > { %v4725_v8 = vround.rtne.f32 %v4029_v56  ;;  %v9683_v13 = vsel %vm6376_vm0, 4294967295, %v9682_v13  ;;  %vm6387_vm3 = vcmp.lt.f32.partialorder %v4721_v7, 16.0  ;;  %v9688_v7 = vmov 0 }
 0x1cc   : > { %v1217_v15 = vsel %vm6387_vm3, 1, %v9588_v41 }
 0x1cd   : > { %1230 = vrot.lane.b32.xlu0 %v1218_v28, %s5405_s4  ;;  %v9678_v28 = vmov 0  ;;  %vm6364_vm7 = vcmp.ge.f32.partialorder %v4725_v8, 0.0  ;;  %vm6403_vm4 = vcmp.lt.f32.partialorder %v4725_v8, 16.0 }
 0x1ce   : > { %926 = vperm.xlu1 %5036, %v905_v20   ;;  %v1177_v20 = vsel %vm6332_vm14, 1, %v9588_v41  ;;  %v9679_v28 = vsel %vm6350_vm5, 4294967295, %v9678_v28  ;;  %v9689_v7 = vsel %vm6403_vm4, 4294967295, %v9688_v7 }
 0x1d1   : > { %1234 = vrot.lane.b32.xlu0 %v1220_v58, %s5405_s4  ;;  %v6358_v58 = vmin.f32 %v4048_v24, 15.0  ;;  %v1221_v24 = vsel %vm6403_vm4, 1, %v9588_v41 }
 0x1d2   : > { %5037 = vset.pattern.permute.xlu1 %v9588_v41 }
 0x1d3   : > { %5039 = vperm.xlu1 %5037, %v5038_v52   ;;  %v1179_v52 = vsel %vm6350_vm5, 1, %v9588_v41  ;;  %v9230_v4 = vcvt.f32.s32 %v6358_v58 }
 0x1d5   : > { %5059 = vrot.lane.b32.xlu0 %v5058_v44, %s5406_s5  ;;  %v9680_v44 = vmov 0 }
 0x1d6   : > { %v9681_v44 = vsel %vm6364_vm7, 4294967295, %v9680_v44 }
 0x1d7   : > { %5049 = vperm.xlu1 %5037, %v9672_v26   ;;  %v1215_v26 = vsel %vm6376_vm0, 1, %v9588_v41 }
 0x1d9   : > { %5069 = vrot.lane.b32.xlu0 %v5068_v40, %s5406_s5  ;;  %v1181_v40 = vsel %vm6364_vm7, 1, %v9588_v41 }
 0x1db   : > { %5054 = vperm.xlu1 %5037, %v9675_v49   ;;  %v9686_v49 = vmov 0 }
 0x1dc   : > { %v9687_v49 = vsel %vm6395_vm6, 4294967295, %v9686_v49 }
 0x1dd   : > { %1326 = vrot.lane.b32.xlu0 %v9228_v37, %s5407_s6 }
 0x1df   : > { %1184 = vrot.lane.b32.xlu1 %v1175_v39, %s5405_s4  ;;  %v1219_v39 = vsel %vm6395_vm6, 1, %v9588_v41  ;;  %vm1169_vm6 = vmand %vm6332_vm14, %vm6387_vm3 }
 0x1e0   : > { %5078 = vset.pattern.permute.xlu1 %v9618_v59 }
 0x1e1   : > { %1330 = vrot.lane.b32.xlu0 %v9232_v27, %s5407_s6 }
 0x1e3   : > { %1188 = vrot.lane.b32.xlu1 %v1177_v20, %s5405_s4  ;;  %v4033_v20 = vmax.f32 %v6296_v1, 0.0 }
 0x1e5   : > { %1334 = vrot.lane.b32.xlu0 %v9231_v14, %s5407_s6  ;;  %v6416_v8 = vmin.f32 %v4033_v20, 15.0 }
 0x1e7   : > { %1192 = vrot.lane.b32.xlu1 %v1179_v52, %s5405_s4  ;;  %v5073_v52 = vpack.i.bf16 %v4029_v56, %v6208_v22  ;;  %v4051_v22 = vmax.f32 %v4029_v56, 0.0  ;;  %v9705_v42 = vcvt.f32.s32 %v6416_v8 }
 0x1e9   : > { %1338 = vrot.lane.b32.xlu0 %v9230_v4, %s5407_s6 }
 0x1eb   : > { %1196 = vrot.lane.b32.xlu1 %v1181_v40, %s5405_s4  ;;  %v4039_v40 = vmax.f32 %v4025_v21, 0.0 }
 0x1ef   : > { %1224 = vrot.lane.b32.xlu1 %v1215_v26, %s5405_s4  ;;  %v9233_v26 = vcvt.f32.s32 %v6416_v8  ;;  %v6530_v8 = vld [vmem:[%s5493_s3 + $0xf0] sm:$0xff] }
 0x1f3   : > { %1228 = vrot.lane.b32.xlu1 %v1217_v15, %s5405_s4  ;;  %v6420_v15 = vmin.f32 %v4039_v40, 15.0 }
 0x1f5   : > { %9690 = vst [vmem:[#allocation25_spill] sm:$0xff] %v6420_v15  ;;  %v9227_v6 = vcvt.f32.s32 %v6420_v15 }
 0x1f7   : > { %1232 = vrot.lane.b32.xlu1 %v1219_v39, %s5405_s4  ;;  %v4045_v39 = vmax.f32 %v6304_v31, 0.0 }
 0x1f9   : > { %v6427_v1 = vmin.f32 %v4045_v39, 15.0 }
 0x1fb   : > { %1236 = vrot.lane.b32.xlu1 %v1221_v24, %s5405_s4  ;;  %9691 = vst [vmem:[#allocation26_spill] sm:$0xff] %v6427_v1  ;;  %v9226_v21 = vcvt.f32.s32 %v6427_v1  ;;  %v6433_v24 = vmin.f32 %v4051_v22, 15.0 }
 0x1fd   : > { %9692 = vst [vmem:[#allocation27_spill] sm:$0xff] %v6433_v24  ;;  %v9229_v31 = vcvt.f32.s32 %v6433_v24  ;;  %v1319_v24 = vmul.u32 16, %v9705_v42 }
 0x1ff   : > { %5064 = vrot.lane.b32.xlu1 %v5063_v3, %s5406_s5  ;;  %v6442_v3 = vpop.permute.xlu1 %893 }
 0x203   : > { %5074 = vrot.lane.b32.xlu1 %v5073_v52, %s5406_s5  ;;  %v6444_v56 = vpop.permute.xlu1 %897 }
 0x204   : > { %9693 = vst [vmem:[#allocation28_spill] sm:$0xff] %v6444_v56  ;;  %v9710_v56 = vmov 0 }
 0x207   : > { %1328 = vrot.lane.b32.xlu1 %v9233_v26, %s5407_s6 }
 0x20b   : > { %1332 = vrot.lane.b32.xlu1 %v9227_v6, %s5407_s6 }
 0x20f   : > { %1336 = vrot.lane.b32.xlu1 %v9226_v21, %s5407_s6 }
 0x213   : > { %1340 = vrot.lane.b32.xlu1 %v9229_v31, %s5407_s6 }
 0x230   : > { %v6448_v52 = vpop.permute.xlu0 %5044 }
 0x231   : > { %9695 = vst [vmem:[#allocation30_spill] sm:$0xff] %v6448_v52 }
 0x234   : > { %v6450_v40 = vpop.permute.xlu0 %1182 }
 0x238   : > { %v1187_v21 = vpop.permute.xlu0 %1186 }
 0x239   : > { %vm1200_vm7 = vcmp.ne.s32.totalorder %v1187_v21, 0  ;;  %v4750_v21 = vround.rtne.f32 %v6495_v45 }
 0x23a   : > { %vm1208_vm4 = vmand %vm1168_vm12, %vm1200_vm7 }
 0x23b   : > { %vm6509_vm14 = vcmp.ge.f32.partialorder %v4750_v21, 0.0 }
 0x23c   : > { %v6458_v37 = vpop.permute.xlu0 %1190 }
 0x23d   : > { %v6446_v20 = vpop.permute.xlu1 %911  ;;  %vm1202_vm11 = vcmp.ne.s32.totalorder %v6458_v37, 0 }
 0x23e   : > { %9694 = vst [vmem:[#allocation29_spill] sm:$0xff] %v6446_v20 }
 0x240   : > { %v6462_v4 = vpop.permute.xlu0 %1194 }
 0x241   : > { %v6452_v39 = vpop.permute.xlu1 %914 }
 0x242   : > { %9696 = vst [vmem:[#allocation31_spill] sm:$0xff] %v6452_v39 }
 0x244   : > { %v6468_v26 = vpop.permute.xlu0 %1222 }
 0x248   : > { %v1227_v51 = vpop.permute.xlu0 %1226 }
 0x249   : > { %v6454_v22 = vpop.permute.xlu1 %920  ;;  %vm1240_vm5 = vcmp.ne.s32.totalorder %v1227_v51, 0  ;;  %v6505_v51 = vld [vmem:[%s5493_s3 + $0xd0] sm:$0xff] }
 0x24a   : > { %9697 = vst [vmem:[#allocation32_spill] sm:$0xff] %v6454_v22  ;;  %vm1248_vm2 = vmand %vm1208_vm4, %vm1240_vm5  ;;  %v4752_v18 = vround.rtne.f32 %v6505_v51 }
 0x24d   : > { %v6456_v6 = vpop.permute.xlu1 %926 }
 0x24e   : > { %9698 = vst [vmem:[#allocation33_spill] sm:$0xff] %v6456_v6  ;;  %v6474_v6 = vpop.permute.xlu0 %1230 }
 0x252   : > { %v6460_v31 = vpop.permute.xlu1 %5039  ;;  %v6478_v39 = vpop.permute.xlu0 %1234 }
 0x253   : > { %9699 = vst [vmem:[#allocation34_spill] sm:$0xff] %v6460_v31 }
 0x256   : > { %v6464_v14 = vpop.permute.xlu1 %5049  ;;  %v6482_v52 = vpop.permute.xlu0 %5059 }
 0x257   : > { %9700 = vst [vmem:[#allocation35_spill] sm:$0xff] %v6464_v14  ;;  %v5062_v33 = vunpack.i.h.bf16 %v6482_v52 }
 0x25a   : > { %v6466_v27 = vpop.permute.xlu1 %5054  ;;  %v6490_v31 = vpop.permute.xlu0 %5069 }
 0x25b   : > { %9701 = vst [vmem:[#allocation36_spill] sm:$0xff] %v6466_v27  ;;  %v5072_v38 = vunpack.i.h.bf16 %v6490_v31 }
 0x25e   : > { %v6470_v50 = vpop.permute.xlu1 %1184  ;;  %v6501_v61 = vpop.permute.xlu0 %1326 }
 0x25f   : > { %9702 = vst [vmem:[#allocation37_spill] sm:$0xff] %v6501_v61  ;;  %vm1199_vm3 = vcmp.ne.s32.totalorder %v6470_v50, 0 }
 0x262   : > { %v1189_v0 = vpop.permute.xlu1 %1188  ;;  %v1331_v57 = vpop.permute.xlu0 %1330 }
 0x263   : > { %vm1201_vm15 = vcmp.ne.s32.totalorder %v1189_v0, 0 }
 0x264   : > { %vm1209_vm9 = vmand %vm1169_vm6, %vm1201_vm15  ;;  %vm6524_vm15 = vcmp.ge.f32.partialorder %v4752_v18, 0.0  ;;  %vm1198_vm6 = vcmp.ne.s32.totalorder %v6450_v40, 0  ;;  %v9716_v40 = vmov 0 }
 0x265   : > { %v1619_v35 = vsel %vm6524_vm15, 1, %v9588_v41 }
 0x266   : > { %v6472_v12 = vpop.permute.xlu1 %1192  ;;  %v1335_v42 = vpop.permute.xlu0 %1334 }
 0x26a   : > { %v6476_v22 = vpop.permute.xlu1 %1196 }
 0x26e   : > { %v6480_v20 = vpop.permute.xlu1 %1224 }
 0x272   : > { %v1229_v14 = vpop.permute.xlu1 %1228 }
 0x273   : > { %vm1241_vm0 = vcmp.ne.s32.totalorder %v1229_v14, 0  ;;  %v9703_v14 = vmov 0 }
 0x274   : > { %vm1249_vm7 = vmand %vm1209_vm9, %vm1241_vm0  ;;  %v9704_v14 = vsel %vm6509_vm14, 4294967295, %v9703_v14  ;;  %vm9715_vm9 = vnez %v9674_v62  ;;  %v9725_v62 = vmov 0  ;;  %vm1238_vm0 = vcmp.ne.s32.totalorder %v6468_v26, 0 }
 0x276   : > { %v6484_v27 = vpop.permute.xlu1 %1232 }
 0x27a   : > { %v6492_v48 = vpop.permute.xlu1 %1236 }
 0x27e   : > { %v5065_v30 = vpop.permute.xlu1 %5064 }
 0x27f   : > { %v5067_v25 = vunpack.i.h.bf16 %v5065_v30  ;;  %v5066_v54 = vunpack.i.l.bf16 %v5065_v30  ;;  %v6517_v30 = vld [vmem:[%s5493_s3 + $0xe0] sm:$0xff] }
 0x280   : > { %v4754_v15 = vround.rtne.f32 %v6517_v30 }
 0x281   : > { %v1288_v34 = vsel %vm1248_vm2, %v5066_v54, 0.0  ;;  %v1289_v9 = vsel %vm1249_vm7, %v5067_v25, 0.0  ;;  %v9706_v54 = vcvt.f32.s32 %v6323_v32  ;;  %vm9714_vm2 = vnez %v9683_v13 }
 0x282   : > { %v6507_v43 = vpop.permute.xlu1 %5074  ;;  %v5085_v0 = vpack.i.bf16 %v1289_v9, %v1288_v34  ;;  %v1617_v34 = vsel %vm6509_vm14, 1, %v9588_v41  ;;  %v9707_v9 = vmov 0  ;;  %vm6540_vm5 = vcmp.ge.f32.partialorder %v4754_v15, 0.0  ;;  %vm1167_vm7 = vmand %vm9715_vm9, %vm9714_vm2 }
 0x283   : > { %v1320_v1 = vmul.u32 16, %v9706_v54  ;;  %v9708_v9 = vsel %vm6524_vm15, 4294967295, %v9707_v9  ;;  %v9711_v56 = vsel %vm6540_vm5, 4294967295, %v9710_v56  ;;  %vm9719_vm14 = vnez %v9679_v28  ;;  %vm9720_vm2 = vmand %vm6173_vm8, %vm6243_vm13 }
 0x284   : > { %5086 = vperm.xlu0 %5000, %v5085_v0   ;;  %v9709_v0 = vcvt.f32.s32 %v6341_v47  ;;  %v9713_v47 = vcvt.f32.s32 %v6358_v58  ;;  %vm6585_vm9 = vmand %vm9720_vm2, %vm1198_vm6  ;;  %vm6595_vm15 = vcmp.lt.f32.partialorder %v4750_v21, 16.0  ;;  %vm1203_vm13 = vcmp.ne.s32.totalorder %v6472_v12, 0 }
 0x285   : > { %v1344_v32 = vadd.s32 %v1331_v57, %v1320_v1  ;;  %v9726_v62 = vsel %vm6595_vm15, 4294967295, %v9725_v62  ;;  %vm1207_vm8 = vmand %vm1167_vm7, %vm1199_vm3  ;;  %v9730_v58 = vmov 0  ;;  %v5061_v13 = vunpack.i.l.bf16 %v6482_v52 }
 0x286   : > { %v1329_v25 = vpop.permute.xlu1 %1328  ;;  %v1322_v54 = vmul.u32 16, %v9709_v0  ;;  %v1324_v1 = vmul.u32 16, %v9713_v47  ;;  %vm9727_vm2 = vmmov %vm6222_vm10  ;;  %vm9728_vm10 = vnez %v9668_v60  ;;  %vm1243_vm3 = vcmp.ne.s32.totalorder %v6484_v27, 0 }
 0x287   : > { %v1343_v61 = vadd.s32 %v1329_v25, %v1319_v24  ;;  %v4756_v24 = vround.rtne.f32 %v6530_v8  ;;  %vm9729_vm4 = vmand %vm9727_vm2, %vm9728_vm10  ;;  %vm1204_vm7 = vcmp.ne.s32.totalorder %v6462_v4, 0  ;;  %v1657_v12 = vsel %vm6595_vm15, 1, %v9588_v41 }
 0x288   : > { %1625 = vrot.lane.b32.xlu0 %v1617_v34, %s5405_s4  ;;  %v1346_v57 = vadd.s32 %v1335_v42, %v1322_v54  ;;  %vm6610_vm1 = vmand %vm9729_vm4, %vm1202_vm11  ;;  %vm1242_vm10 = vcmp.ne.s32.totalorder %v6474_v6, 0  ;;  %vm9732_vm11 = vnez %v9687_v49  ;;  %vm9737_vm2 = vnez %v9670_v16  ;;  %v6693_v42 = vld [vmem:[%s5493_s3 + $0xe8] sm:$0xff] }
 0x289   : > { %1354 = vperm.xlu1 %5078, %v1343_v61   ;;  %v1621_v61 = vsel %vm6540_vm5, 1, %v9588_v41  ;;  %vm6571_vm12 = vcmp.ge.f32.partialorder %v4756_v24, 0.0  ;;  %vm1239_vm5 = vcmp.ne.s32.totalorder %v6480_v20, 0  ;;  %v9731_v58 = vsel %vm6610_vm1, 4294967295, %v9730_v58 }
 0x28a   : > { %v9717_v40 = vsel %vm6571_vm12, 4294967295, %v9716_v40  ;;  %v1623_v37 = vsel %vm6571_vm12, 1, %v9588_v41  ;;  %vm1247_vm6 = vmand %vm1207_vm8, %vm1239_vm5  ;;  %vm6630_vm8 = vcmp.lt.f32.partialorder %v4752_v18, 16.0  ;;  %v5071_v49 = vunpack.i.l.bf16 %v6490_v31  ;;  %v6657_v31 = vld [vmem:[%s5493_s3 + $0xc8] sm:$0xff] }
 0x28b   : > { %vm1246_vm12 = vmand %vm6585_vm9, %vm1238_vm0  ;;  %v1287_v60 = vsel %vm1247_vm6, %v5062_v33, 0.0  ;;  %vm9736_vm9 = vnez %v9658_v5  ;;  %v1659_v5 = vsel %vm6630_vm8, 1, %v9588_v41  ;;  %v5077_v26 = vunpack.i.h.bf16 %v6507_v43 }
 0x28c   : > { %1629 = vrot.lane.b32.xlu0 %v1619_v35, %s5405_s4  ;;  %v1339_v35 = vpop.permute.xlu0 %1338  ;;  %vm9733_vm5 = vmand %vm9719_vm14, %vm9732_vm11  ;;  %vm1244_vm14 = vcmp.ne.s32.totalorder %v6478_v39, 0  ;;  %v1286_v4 = vsel %vm1246_vm12, %v5061_v13, 0.0  ;;  %vm1205_vm11 = vcmp.ne.s32.totalorder %v6476_v22, 0  ;;  %v5076_v6 = vunpack.i.l.bf16 %v6507_v43 }
 0x28d   : > { %1357 = vperm.xlu1 %5078, %v1344_v32   ;;  %v1348_v29 = vadd.s32 %v1339_v35, %v1324_v1  ;;  %vm1211_vm4 = vmand %vm9733_vm5, %vm1203_vm13  ;;  %vm9741_vm13 = vnez %v9731_v58  ;;  %v5080_v18 = vpack.i.bf16 %v1287_v60, %v1286_v4  ;;  %v4751_v39 = vround.rtne.f32 %v6657_v31  ;;  %v4101_v1 = vld [vmem:[%s5493_s3 + $0xf8] sm:$0xff] }
 0x28e   : > { %vm1251_vm0 = vmand %vm1211_vm4, %vm1243_vm3  ;;  %vm6663_vm3 = vcmp.lt.f32.partialorder %v4754_v15, 16.0  ;;  %v6675_v15 = vld [vmem:[%s5493_s3 + $0xd8] sm:$0xff]  ;;  %v9749_v34 = vmov 0  ;;  %v4755_v54 = vround.rtne.f32 %v6693_v42  ;;  %v4102_v47 = vmax.f32 %v6495_v45, 0.0 }
 0x28f   : > { %vm9738_vm15 = vmand %vm9736_vm9, %vm9737_vm2  ;;  %v1291_v16 = vsel %vm1251_vm0, %v5072_v38, 0.0  ;;  %v1661_v43 = vsel %vm6663_vm3, 1, %v9588_v41  ;;  %vm6686_vm9 = vcmp.ge.f32.partialorder %v4751_v39, 0.0  ;;  %v4753_v25 = vround.rtne.f32 %v6675_v15 }
 0x290   : > { %1633 = vrot.lane.b32.xlu0 %v1621_v61, %s5405_s4  ;;  %vm6639_vm1 = vmand %vm9738_vm15, %vm1204_vm7  ;;  %vm1245_vm15 = vcmp.ne.s32.totalorder %v6492_v48, 0  ;;  %vm9744_vm7 = vnez %v9681_v44  ;;  %v9747_v44 = vmov 0  ;;  %v9750_v34 = vsel %vm6686_vm9, 4294967295, %v9749_v34 }
 0x291   : > { %1363 = vperm.xlu1 %5078, %v1346_v57   ;;  %vm1250_vm6 = vmand %vm9741_vm13, %vm1242_vm10  ;;  %vm9745_vm10 = vnez %v9689_v7  ;;  %v1618_v0 = vsel %vm6686_vm9, 1, %v9588_v41  ;;  %vm6702_vm2 = vcmp.ge.f32.partialorder %v4753_v25, 0.0  ;;  %v5100_v57 = vpack.i.bf16 %v6657_v31, %v6495_v45 }
 0x292   : > { %vm1252_vm12 = vmand %vm6639_vm1, %vm1244_vm14  ;;  %v1290_v48 = vsel %vm1250_vm6, %v5071_v49, 0.0  ;;  %vm6682_vm1 = vcmp.lt.f32.partialorder %v4756_v24, 16.0  ;;  %v1620_v61 = vsel %vm6702_vm2, 1, %v9588_v41  ;;  %vm6715_vm14 = vcmp.ge.f32.partialorder %v4755_v54, 0.0 }
 0x293   : > { %vm9746_vm5 = vmand %vm9744_vm7, %vm9745_vm10  ;;  %v5090_v52 = vpack.i.bf16 %v1291_v16, %v1290_v48  ;;  %v1292_v21 = vsel %vm1252_vm12, %v5076_v6, 0.0  ;;  %v9748_v44 = vsel %vm6682_vm1, 4294967295, %v9747_v44  ;;  %v1663_v32 = vsel %vm6682_vm1, 1, %v9588_v41 }
 0x294   : > { %1637 = vrot.lane.b32.xlu0 %v1623_v37, %s5405_s4  ;;  %vm1213_vm4 = vmand %vm9746_vm5, %vm1205_vm11  ;;  %v9753_v35 = vmov 0  ;;  %v4757_v50 = vround.rtne.f32 %v4101_v1  ;;  %v5110_v33 = vpack.i.bf16 %v6693_v42, %v6517_v30  ;;  %v6723_v45 = vmin.f32 %v4102_v47, 15.0 }
 0x295   : > { %1369 = vperm.xlu1 %5078, %v1348_v29   ;;  %vm1253_vm0 = vmand %vm1213_vm4, %vm1245_vm15  ;;  %v9754_v35 = vsel %vm6715_vm14, 4294967295, %v9753_v35  ;;  %v4108_v29 = vmax.f32 %v6505_v51, 0.0  ;;  %v1622_v37 = vsel %vm6715_vm14, 1, %v9588_v41  ;;  %v9756_v58 = vmov 0 }
 0x296   : > { %v1293_v22 = vsel %vm1253_vm0, %v5077_v26, 0.0  ;;  %9755 = vst [vmem:[#allocation38_spill] sm:$0xff] %v6723_v45  ;;  %vm6730_vm13 = vcmp.ge.f32.partialorder %v4757_v50, 0.0  ;;  %v9283_v13 = vcvt.f32.s32 %v6723_v45  ;;  %v4114_v38 = vmax.f32 %v6517_v30, 0.0 }
 0x297   : > { %v5095_v7 = vpack.i.bf16 %v1293_v22, %v1292_v21  ;;  %v9757_v58 = vsel %vm6730_vm13, 4294967295, %v9756_v58  ;;  %v1624_v60 = vsel %vm6730_vm13, 1, %v9588_v41  ;;  %vm6743_vm6 = vcmp.lt.f32.partialorder %v4751_v39, 16.0 }
 0x298   : > { %1665 = vrot.lane.b32.xlu0 %v1657_v12, %s5405_s4  ;;  %v6736_v12 = vmin.f32 %v4108_v29, 15.0  ;;  %v6751_v49 = vmin.f32 %v4114_v38, 15.0  ;;  %v4120_v30 = vmax.f32 %v6530_v8, 0.0  ;;  %vm6758_vm11 = vcmp.lt.f32.partialorder %v4753_v25, 16.0 }
 0x299   : > { %5079 = vset.pattern.permute.xlu1 %v9588_v41  ;;  %v1660_v6 = vsel %vm6758_vm11, 1, %v9588_v41  ;;  %vm6772_vm15 = vcmp.lt.f32.partialorder %v4755_v54, 16.0  ;;  %v9762_v48 = vmov 0  ;;  %vm6784_vm12 = vcmp.lt.f32.partialorder %v4757_v50, 16.0  ;;  %v6826_v50 = vpop.permute.xlu1 %1332  ;;  %vm1612_vm13 = vmand %vm6702_vm2, %vm6758_vm11 }
 0x29a   : > { %5081 = vperm.xlu1 %5079, %v5080_v18   ;;  %v9286_v4 = vcvt.f32.s32 %v6736_v12  ;;  %v1658_v18 = vsel %vm6743_vm6, 1, %v9588_v41  ;;  %v9285_v16 = vcvt.f32.s32 %v6751_v49  ;;  %v6766_v26 = vmin.f32 %v4120_v30, 15.0 }
 0x29b   : > { %v9763_v48 = vsel %vm6772_vm15, 4294967295, %v9762_v48  ;;  %v1662_v39 = vsel %vm6772_vm15, 1, %v9588_v41  ;;  %v9764_v22 = vmov 0  ;;  %v1664_v21 = vsel %vm6784_vm12, 1, %v9588_v41 }
 0x29c   : > { %1669 = vrot.lane.b32.xlu0 %v1659_v5, %s5405_s4  ;;  %v9765_v22 = vsel %vm6784_vm12, 4294967295, %v9764_v22  ;;  %v5115_v25 = vpack.i.bf16 %v4101_v1, %v6530_v8  ;;  %v4117_v47 = vmax.f32 %v6693_v42, 0.0  ;;  %vm9777_vm7 = vnez %v9708_v9 }
 0x29d   : > { %vm1611_vm10 = vmand %vm9777_vm7, %vm6630_vm8  ;;  %v9779_v5 = vcvt.f32.s32 %v5862_v36  ;;  %v9783_v36 = vcvt.f32.s32 %v6751_v49  ;;  %vm9787_vm2 = vnez %v9704_v14  ;;  %v9800_v28 = vcvt.f32.s32 %v6055_v46 }
 0x29e   : > { %5091 = vperm.xlu1 %5079, %v5090_v52   ;;  %v9284_v52 = vcvt.f32.s32 %v6766_v26  ;;  %vm9805_vm1 = vnez %v9763_v48 }
 0x29f   : > { %v376_v24 = vmul.u32 16, %v9779_v5 }
 0x2a0   : > { %1673 = vrot.lane.b32.xlu0 %v1661_v43, %s5405_s4  ;;  %v5105_v43 = vpack.i.bf16 %v6675_v15, %v6505_v51 }
 0x2a2   : > { %5096 = vperm.xlu1 %5079, %v5095_v7   ;;  %v4105_v7 = vmax.f32 %v6657_v31, 0.0  ;;  %v6811_v31 = vmin.f32 %v4117_v47, 15.0 }
 0x2a4   : > { %1677 = vrot.lane.b32.xlu0 %v1663_v32, %s5405_s4  ;;  %v6801_v32 = vmin.f32 %v4105_v7, 15.0  ;;  %9767 = vst [vmem:[#allocation40_spill] sm:$0xff] %v6811_v31  ;;  %v9281_v8 = vcvt.f32.s32 %v6811_v31 }
 0x2a6   : > { %1627 = vrot.lane.b32.xlu1 %v1618_v0, %s5405_s4  ;;  %v4111_v0 = vmax.f32 %v6675_v15, 0.0  ;;  %v4763_v54 = vcvt.f32.s32 %v6801_v32 }
 0x2a7   : > { %5120 = vset.pattern.permute.xlu1 %v9618_v59 }
 0x2a8   : > { %5101 = vrot.lane.b32.xlu0 %v5100_v57, %s5406_s5  ;;  %v6806_v57 = vmin.f32 %v4111_v0, 15.0 }
 0x2aa   : > { %1631 = vrot.lane.b32.xlu1 %v1620_v61, %s5405_s4  ;;  %9766 = vst [vmem:[#allocation39_spill] sm:$0xff] %v6806_v57  ;;  %v9282_v51 = vcvt.f32.s32 %v6806_v57  ;;  %v4123_v61 = vmax.f32 %v4101_v1, 0.0  ;;  %v6828_v1 = vpop.permute.xlu1 %1336  ;;  %v9781_v57 = vld [vmem:[#allocation5_spill] sm:$0xff] }
 0x2ac   : > { %5111 = vrot.lane.b32.xlu0 %v5110_v33, %s5406_s5  ;;  %v6817_v15 = vmin.f32 %v4123_v61, 15.0 }
 0x2ae   : > { %1635 = vrot.lane.b32.xlu1 %v1622_v37, %s5405_s4  ;;  %9768 = vst [vmem:[#allocation41_spill] sm:$0xff] %v6817_v15  ;;  %v9280_v42 = vcvt.f32.s32 %v6817_v15  ;;  %v6830_v33 = vpop.permute.xlu1 %1340  ;;  %v1762_v15 = vmul.u32 16, %v4763_v54 }
 0x2b0   : > { %1769 = vrot.lane.b32.xlu0 %v9283_v13, %s5407_s6 }
 0x2b2   : > { %1639 = vrot.lane.b32.xlu1 %v1624_v60, %s5405_s4 }
 0x2b4   : > { %1773 = vrot.lane.b32.xlu0 %v9286_v4, %s5407_s6 }
 0x2b6   : > { %1667 = vrot.lane.b32.xlu1 %v1658_v18, %s5405_s4 }
 0x2b8   : > { %1777 = vrot.lane.b32.xlu0 %v9285_v16, %s5407_s6 }
 0x2ba   : > { %1671 = vrot.lane.b32.xlu1 %v1660_v6, %s5405_s4 }
 0x2bc   : > { %1781 = vrot.lane.b32.xlu0 %v9284_v52, %s5407_s6 }
 0x2be   : > { %1675 = vrot.lane.b32.xlu1 %v1662_v39, %s5405_s4 }
 0x2c2   : > { %1679 = vrot.lane.b32.xlu1 %v1664_v21, %s5405_s4 }
 0x2c6   : > { %5106 = vrot.lane.b32.xlu1 %v5105_v43, %s5406_s5 }
 0x2ca   : > { %5116 = vrot.lane.b32.xlu1 %v5115_v25, %s5406_s5 }
 0x2ce   : > { %1771 = vrot.lane.b32.xlu1 %v4763_v54, %s5407_s6  ;;  %v1765_v54 = vmul.u32 16, %v9783_v36 }
 0x2d2   : > { %1775 = vrot.lane.b32.xlu1 %v9282_v51, %s5407_s6 }
 0x2d6   : > { %1779 = vrot.lane.b32.xlu1 %v9281_v8, %s5407_s6 }
 0x2da   : > { %1783 = vrot.lane.b32.xlu1 %v9280_v42, %s5407_s6 }
 0x303   : > { %v6832_v29 = vpop.permute.xlu0 %5086 }
 0x304   : > { %9769 = vst [vmem:[#allocation42_spill] sm:$0xff] %v6832_v29 }
 0x307   : > { %v6836_v38 = vpop.permute.xlu0 %1625 }
 0x308   : > { %v6834_v37 = vpop.permute.xlu1 %1354 }
 0x309   : > { %9770 = vst [vmem:[#allocation43_spill] sm:$0xff] %v6834_v37 }
 0x30b   : > { %v1630_v18 = vpop.permute.xlu0 %1629 }
 0x30c   : > { %v6838_v60 = vpop.permute.xlu1 %1357  ;;  %vm1643_vm5 = vcmp.ne.s32.totalorder %v1630_v18, 0 }
 0x30d   : > { %9771 = vst [vmem:[#allocation44_spill] sm:$0xff] %v6838_v60  ;;  %vm1651_vm4 = vmand %vm1611_vm10, %vm1643_vm5  ;;  %vm9791_vm10 = vnez %v9750_v34 }
 0x30e   : > { %vm1610_vm5 = vmand %vm9791_vm10, %vm6743_vm6 }
 0x30f   : > { %v6844_v39 = vpop.permute.xlu0 %1633 }
 0x310   : > { %v6840_v30 = vpop.permute.xlu1 %1363  ;;  %vm1645_vm10 = vcmp.ne.s32.totalorder %v6844_v39, 0 }
 0x311   : > { %9772 = vst [vmem:[#allocation45_spill] sm:$0xff] %v6840_v30 }
 0x313   : > { %v6850_v7 = vpop.permute.xlu0 %1637 }
 0x314   : > { %v6842_v6 = vpop.permute.xlu1 %1369 }
 0x315   : > { %9773 = vst [vmem:[#allocation46_spill] sm:$0xff] %v6842_v6 }
 0x317   : > { %v6854_v32 = vpop.permute.xlu0 %1665 }
 0x318   : > { %vm1681_vm7 = vcmp.ne.s32.totalorder %v6854_v32, 0  ;;  %v9817_v32 = vcvt.f32.s32 %v6099_v53 }
 0x319   : > { %v6846_v21 = vpop.permute.xlu1 %5081 }
 0x31a   : > { %9774 = vst [vmem:[#allocation47_spill] sm:$0xff] %v6846_v21 }
 0x31b   : > { %v1670_v47 = vpop.permute.xlu0 %1669 }
 0x31c   : > { %vm1683_vm0 = vcmp.ne.s32.totalorder %v1670_v47, 0 }
 0x31d   : > { %v6848_v43 = vpop.permute.xlu1 %5091  ;;  %vm1691_vm15 = vmand %vm1651_vm4, %vm1683_vm0 }
 0x31e   : > { %9775 = vst [vmem:[#allocation48_spill] sm:$0xff] %v6848_v43 }
 0x31f   : > { %v6860_v8 = vpop.permute.xlu0 %1673 }
 0x321   : > { %v6852_v25 = vpop.permute.xlu1 %5096 }
 0x322   : > { %9776 = vst [vmem:[#allocation49_spill] sm:$0xff] %v6852_v25 }
 0x323   : > { %v6864_v13 = vpop.permute.xlu0 %1677 }
 0x325   : > { %v6856_v0 = vpop.permute.xlu1 %1627 }
 0x326   : > { %vm1642_vm4 = vcmp.ne.s32.totalorder %v6856_v0, 0  ;;  %v882_v0 = vmul.u32 16, %v9817_v32 }
 0x327   : > { %v6868_v4 = vpop.permute.xlu0 %5101  ;;  %vm1650_vm0 = vmand %vm1610_vm5, %vm1642_vm4 }
 0x328   : > { %v5103_v39 = vunpack.i.l.bf16 %v6868_v4 }
 0x329   : > { %v1632_v61 = vpop.permute.xlu1 %1631 }
 0x32a   : > { %vm1644_vm12 = vcmp.ne.s32.totalorder %v1632_v61, 0  ;;  %v9780_v61 = vcvt.f32.s32 %v6736_v12  ;;  %v9784_v12 = vld [vmem:[#allocation6_spill] sm:$0xff] }
 0x32b   : > { %v6876_v25 = vpop.permute.xlu0 %5111  ;;  %vm1652_vm9 = vmand %vm1612_vm13, %vm1644_vm12  ;;  %vm9788_vm13 = vnez %v9711_v56  ;;  %v9807_v56 = vcvt.f32.s32 %v6078_v2 }
 0x32c   : > { %v5114_v46 = vunpack.i.h.bf16 %v6876_v25  ;;  %v5113_v48 = vunpack.i.l.bf16 %v6876_v25 }
 0x32d   : > { %v6858_v42 = vpop.permute.xlu1 %1635  ;;  %v878_v20 = vmul.u32 16, %v9807_v56 }
 0x32f   : > { %v6884_v43 = vpop.permute.xlu0 %1769 }
 0x330   : > { %9778 = vst [vmem:[#allocation50_spill] sm:$0xff] %v6884_v43  ;;  %v400_v43 = vadd.s32 %v5997_v11, %v376_v24 }
 0x331   : > { %v6862_v51 = vpop.permute.xlu1 %1639 }
 0x333   : > { %v1774_v47 = vpop.permute.xlu0 %1773 }
 0x335   : > { %v6866_v52 = vpop.permute.xlu1 %1667 }
 0x336   : > { %vm1682_vm11 = vcmp.ne.s32.totalorder %v6866_v52, 0 }
 0x339   : > { %v1672_v16 = vpop.permute.xlu1 %1671 }
 0x33a   : > { %vm1684_vm14 = vcmp.ne.s32.totalorder %v1672_v16, 0  ;;  %v1763_v16 = vmul.u32 16, %v9780_v61  ;;  %v7021_v61 = vld [vmem:[%s5493_s3 + $0x128] sm:$0xff] }
 0x33b   : > { %vm1692_vm8 = vmand %vm1652_vm9, %vm1684_vm14  ;;  %vm9786_vm9 = vnez %v9726_v62  ;;  %v4787_v36 = vround.rtne.f32 %v7021_v61 }
 0x33c   : > { %vm1609_vm14 = vmand %vm9787_vm2, %vm9786_vm9  ;;  %vm1646_vm9 = vcmp.ne.s32.totalorder %v6858_v42, 0  ;;  %v902_v42 = vadd.s32 %v6251_v63, %v878_v20 }
 0x33d   : > { %v6870_v6 = vpop.permute.xlu1 %1675  ;;  %vm1690_vm2 = vmand %vm1650_vm0, %vm1682_vm11  ;;  %vm1647_vm11 = vcmp.ne.s32.totalorder %v6850_v7, 0  ;;  %vm1685_vm0 = vcmp.ne.s32.totalorder %v6860_v8, 0 }
 0x33e   : > { %vm1686_vm5 = vcmp.ne.s32.totalorder %v6870_v6, 0 }
 0x341   : > { %v6878_v30 = vpop.permute.xlu1 %1679 }
 0x345   : > { %v5107_v27 = vpop.permute.xlu1 %5106 }
 0x346   : > { %v5109_v9 = vunpack.i.h.bf16 %v5107_v27  ;;  %v5108_v18 = vunpack.i.l.bf16 %v5107_v27  ;;  %v9782_v27 = vcvt.f32.s32 %v9781_v57 }
 0x348   : > { %v1732_v60 = vsel %vm1692_vm8, %v5109_v9, 0.0  ;;  %v1731_v29 = vsel %vm1691_vm15, %v5108_v18, 0.0  ;;  %v379_v45 = vmul.u32 16, %v9782_v27  ;;  %v9785_v18 = vcvt.f32.s32 %v9784_v12 }
 0x349   : > { %v5127_v37 = vpack.i.bf16 %v1732_v60, %v1731_v29  ;;  %v6886_v21 = vpop.permute.xlu1 %5116  ;;  %v1778_v29 = vpop.permute.xlu0 %1777  ;;  %v1787_v60 = vadd.s32 %v1774_v47, %v1763_v16  ;;  %vm1641_vm15 = vcmp.ne.s32.totalorder %v6836_v38, 0  ;;  %vm9795_vm8 = vnez %v9754_v35  ;;  %v9820_v16 = vld [vmem:[#allocation28_spill] sm:$0xff] }
 0x34a   : > { %v381_v5 = vmul.u32 16, %v9785_v18  ;;  %v1789_v11 = vadd.s32 %v1778_v29, %v1765_v54  ;;  %vm6934_vm6 = vmand %vm1609_vm14, %vm1641_vm15  ;;  %v906_v27 = vadd.s32 %v9820_v16, %v882_v0  ;;  %v7035_v54 = vld [vmem:[%s5493_s3 + $0x138] sm:$0xff]  ;;  %v9826_v18 = vld [vmem:[#allocation25_spill] sm:$0xff] }
 0x34b   : > { %5128 = vperm.xlu0 %5000, %v5127_v37   ;;  %v403_v37 = vadd.s32 %v6036_v17, %v379_v45  ;;  %v9790_v17 = vcvt.f32.s32 %v6766_v26  ;;  %v875_v26 = vmul.u32 16, %v9800_v28  ;;  %vm9801_vm14 = vmmov %vm6663_vm3 }
 0x34c   : > { %v405_v57 = vadd.s32 %v6044_v55, %v381_v5  ;;  %v5104_v55 = vunpack.i.h.bf16 %v6868_v4  ;;  %vm9802_vm15 = vmand %vm9788_vm13, %vm9801_vm14  ;;  %v9827_v5 = vcvt.f32.s32 %v9826_v18 }
 0x34d   : > { %v1772_v31 = vpop.permute.xlu1 %1771  ;;  %v1767_v45 = vmul.u32 16, %v9790_v17  ;;  %v1782_v49 = vpop.permute.xlu0 %1781  ;;  %vm6954_vm3 = vmand %vm9802_vm15, %vm1645_vm10  ;;  %v899_v4 = vadd.s32 %v6220_v10, %v875_v26 }
 0x34e   : > { %v1786_v9 = vadd.s32 %v1772_v31, %v1762_v15  ;;  %v9792_v31 = vld [vmem:[#allocation7_spill] sm:$0xff]  ;;  %vm1689_vm4 = vmand %vm6934_vm6, %vm1681_vm7  ;;  %vm9808_vm7 = vnez %v9717_v40  ;;  %vm9809_vm6 = vnez %v9748_v44  ;;  %v5119_v40 = vunpack.i.h.bf16 %v6886_v21 }
 0x34f   : > { %5132 = vset.pattern.permute.xlu0 %v9618_v59  ;;  %v9793_v15 = vcvt.f32.s32 %v9792_v31  ;;  %v1791_v14 = vadd.s32 %v1782_v49, %v1767_v45  ;;  %vm9806_vm13 = vmand %vm9795_vm8, %vm9805_vm1  ;;  %vm1687_vm1 = vcmp.ne.s32.totalorder %v6864_v13, 0  ;;  %v1729_v35 = vsel %vm1689_vm4, %v5103_v39, 0.0  ;;  %v6992_v13 = vld [vmem:[%s5493_s3 + $0x108] sm:$0xff] }
 0x350   : > { %1797 = vperm.xlu1 %5120, %v1786_v9   ;;  %409 = vperm.xlu0 %5132, %v400_v43   ;;  %vm1654_vm10 = vmand %vm9806_vm13, %vm1646_vm9  ;;  %vm1648_vm9 = vcmp.ne.s32.totalorder %v6862_v51, 0  ;;  %v5118_v44 = vunpack.i.l.bf16 %v6886_v21  ;;  %v9813_v51 = vcvt.f32.s32 %v6092_v23  ;;  %v9333_v43 = vmov 0.0   ;;  %v9821_v9 = vld [vmem:[#allocation24_spill] sm:$0xff]  ;;  %v9830_v31 = vld [vmem:[#allocation26_spill] sm:$0xff] }
 0x351   : > { %v383_v38 = vmul.u32 16, %v9793_v15  ;;  %vm1694_vm14 = vmand %vm1654_vm10, %vm1686_vm5  ;;  %vm9814_vm5 = vnez %v9757_v58  ;;  %625 = vmatprep.mubr.f32.mxu0 %v9333_v43  ;;  %1067 = vmatprep.mubr.f32.mxu1 %v9333_v43  ;;  %v4783_v23 = vround.rtne.f32 %v6992_v13  ;;  %v9822_v29 = vcvt.f32.s32 %v9821_v9  ;;  %v1776_v39 = vpop.permute.xlu1 %1775 }
 0x352   : > { %vm9810_vm15 = vmand %vm9808_vm7, %vm9809_vm6  ;;  %v1734_v8 = vsel %vm1694_vm14, %v5114_v46, 0.0  ;;  %v880_v6 = vmul.u32 16, %v9813_v51  ;;  %vm7045_vm14 = vcmp.ge.f32.partialorder %v4787_v36, 0.0  ;;  %v9828_v45 = vmov 0  ;;  %v9839_v46 = vld [vmem:[#allocation38_spill] sm:$0xff]  ;;  %v9848_v51 = vld [vmem:[#allocation40_spill] sm:$0xff] }
 0x353   : > { %v407_v62 = vadd.s32 %v6050_v19, %v383_v38  ;;  %v1730_v19 = vsel %vm1690_vm2, %v5104_v55, 0.0  ;;  %vm1655_vm12 = vmand %vm9810_vm15, %vm1647_vm11  ;;  %vm1688_vm2 = vcmp.ne.s32.totalorder %v6878_v30, 0  ;;  %vm9815_vm11 = vnez %v9765_v22  ;;  %v7010_v22 = vld [vmem:[%s5493_s3 + $0x118] sm:$0xff] }
 0x354   : > { %418 = vperm.xlu0 %5132, %v403_v37   ;;  %1800 = vperm.xlu1 %5120, %v1787_v60   ;;  %vm6982_vm8 = vmand %vm6954_vm3, %vm1685_vm0  ;;  %v5122_v10 = vpack.i.bf16 %v1730_v19, %v1729_v35  ;;  %v904_v25 = vadd.s32 %v6442_v3, %v880_v6  ;;  %vm7015_vm13 = vcmp.ge.f32.partialorder %v4783_v23, 0.0  ;;  %v4785_v30 = vround.rtne.f32 %v7010_v22  ;;  %v9825_v37 = vld [vmem:[#allocation37_spill] sm:$0xff]  ;;  %v9843_v35 = vld [vmem:[#allocation39_spill] sm:$0xff] }
 0x355   : > { %vm1695_vm3 = vmand %vm1655_vm12, %vm1687_vm1  ;;  %v1733_v21 = vsel %vm6982_vm8, %v5113_v48, 0.0  ;;  %v1318_v60 = vmul.u32 16, %v9822_v29  ;;  %v2061_v53 = vsel %vm7015_vm13, 1, %v9588_v41  ;;  %v9829_v45 = vsel %vm7045_vm14, 4294967295, %v9828_v45 }
 0x356   : > { %vm9816_vm4 = vmand %vm9814_vm5, %vm9815_vm11  ;;  %v5133_v7 = vpack.i.bf16 %v1734_v8, %v1733_v21  ;;  %v1735_v58 = vsel %vm1695_vm3, %v5118_v44, 0.0  ;;  %vm7029_vm10 = vcmp.ge.f32.partialorder %v4785_v30, 0.0  ;;  %v4789_v49 = vround.rtne.f32 %v7035_v54 }
 0x357   : > { %vm1656_vm0 = vmand %vm9816_vm4, %vm1648_vm9  ;;  %v1342_v12 = vadd.s32 %v9825_v37, %v1318_v60  ;;  %v2063_v17 = vsel %vm7029_vm10, 1, %v9588_v41  ;;  %v9831_v15 = vcvt.f32.s32 %v9830_v31  ;;  %v2065_v34 = vsel %vm7045_vm14, 1, %v9588_v41  ;;  %v4170_v37 = vld [vmem:[%s5493_s3 + $0x120] sm:$0xff] }
 0x358   : > { %424 = vperm.xlu0 %5132, %v405_v57   ;;  %1806 = vperm.xlu1 %5120, %v1789_v11   ;;  %vm1696_vm12 = vmand %vm1656_vm0, %vm1688_vm2  ;;  %v1321_v11 = vmul.u32 16, %v9827_v5  ;;  %vm7057_vm7 = vcmp.ge.f32.partialorder %v4789_v49, 0.0  ;;  %v9832_v55 = vmov 0  ;;  %vm7068_vm6 = vcmp.lt.f32.partialorder %v4783_v23, 16.0  ;;  %v7101_v23 = vld [vmem:[%s5493_s3 + $0x100] sm:$0xff] }
 0x359   : > { %v1736_v63 = vsel %vm1696_vm12, %v5119_v40, 0.0  ;;  %v1323_v38 = vmul.u32 16, %v9831_v15  ;;  %v9833_v55 = vsel %vm7057_vm7, 4294967295, %v9832_v55  ;;  %v9840_v56 = vcvt.f32.s32 %v9839_v46  ;;  %v1780_v40 = vpop.permute.xlu1 %1779 }
 0x35a   : > { %v5138_v47 = vpack.i.bf16 %v1736_v63, %v1735_v58  ;;  %v1345_v57 = vadd.s32 %v6826_v50, %v1321_v11  ;;  %9834 = vst [vmem:[#allocation5_spill] sm:$0xff] %v9833_v55  ;;  %v2067_v50 = vsel %vm7057_vm7, 1, %v9588_v41  ;;  %v2101_v20 = vsel %vm7068_vm6, 1, %v9588_v41 }
 0x35b   : > { %vm7079_vm15 = vcmp.lt.f32.partialorder %v4785_v30, 16.0  ;;  %v9844_v48 = vcvt.f32.s32 %v9843_v35  ;;  %vm7090_vm1 = vcmp.lt.f32.partialorder %v4787_v36, 16.0  ;;  %v9846_v44 = vmov 0 }
 0x35c   : > { %430 = vperm.xlu0 %5132, %v407_v62   ;;  %1812 = vperm.xlu1 %5120, %v1791_v14   ;;  %v1347_v14 = vadd.s32 %v6828_v1, %v1323_v38  ;;  %v9835_v62 = vld [vmem:[#allocation27_spill] sm:$0xff]  ;;  %v1761_v1 = vmul.u32 16, %v9840_v56  ;;  %v2103_v8 = vsel %vm7079_vm15, 1, %v9588_v41  ;;  %v9847_v44 = vsel %vm7090_vm1, 4294967295, %v9846_v44 }
 0x35d   : > { %v9836_v28 = vcvt.f32.s32 %v9835_v62  ;;  %v1764_v2 = vmul.u32 16, %v9844_v48  ;;  %v9849_v6 = vcvt.f32.s32 %v9848_v51  ;;  %vm7103_vm8 = vcmp.lt.f32.partialorder %v4789_v49, 16.0 }
 0x35e   : > { %v9850_v63 = vmov 0  ;;  %v4782_v30 = vround.rtne.f32 %v7101_v23  ;;  %v2107_v16 = vsel %vm7103_vm8, 1, %v9588_v41  ;;  %v4177_v60 = vmax.f32 %v6992_v13, 0.0 }
 0x35f   : > { %v1325_v26 = vmul.u32 16, %v9836_v28  ;;  %v1766_v21 = vmul.u32 16, %v9849_v6  ;;  %v9851_v63 = vsel %vm7103_vm8, 4294967295, %v9850_v63  ;;  %v9857_v49 = vmov 0 }
 0x360   : > { %908 = vperm.xlu0 %5132, %v899_v4   ;;  %5121 = vset.pattern.permute.xlu1 %v9588_v41  ;;  %9852 = vst [vmem:[#allocation6_spill] sm:$0xff] %v9851_v63  ;;  %vm7118_vm9 = vcmp.ge.f32.partialorder %v4782_v30, 0.0  ;;  %v7129_v11 = vmin.f32 %v4177_v60, 15.0  ;;  %vm7174_vm11 = vcmp.lt.f32.partialorder %v4782_v30, 16.0  ;;  %v9866_v35 = vmov 0 }
 0x361   : > { %5123 = vperm.xlu1 %5121, %v5122_v10   ;;  %v1349_v19 = vadd.s32 %v6830_v33, %v1325_v26  ;;  %v9845_v10 = vld [vmem:[#allocation50_spill] sm:$0xff]  ;;  %v1790_v58 = vadd.s32 %v1780_v40, %v1766_v21  ;;  %v2060_v18 = vsel %vm7118_vm9, 1, %v9588_v41  ;;  %v5143_v40 = vpack.i.bf16 %v6992_v13, %v7101_v23 }
 0x362   : > { %v1785_v33 = vadd.s32 %v9845_v10, %v1761_v1  ;;  %v4795_v15 = vcvt.f32.s32 %v7129_v11  ;;  %v2100_v1 = vsel %vm7174_vm11, 1, %v9588_v41  ;;  %v5153_v51 = vpack.i.bf16 %v7021_v61, %v4170_v37 }
 0x363   : > { %v178_v30 = vlaneseq }
 0x364   : > { %917 = vperm.xlu0 %5132, %v902_v42   ;;  %v1788_v42 = vadd.s32 %v1776_v39, %v1764_v2  ;;  %v9861_v39 = vmov 0  ;;  %v9868_v2 = vmov 0 }
 0x365   : > { %5134 = vperm.xlu1 %5121, %v5133_v7   ;;  %v2105_v7 = vsel %vm7090_vm1, 1, %v9588_v41 }
 0x368   : > { %923 = vperm.xlu0 %5132, %v904_v25   ;;  %v9853_v25 = vld [vmem:[#allocation41_spill] sm:$0xff] }
 0x369   : > { %5139 = vperm.xlu1 %5121, %v5138_v47   ;;  %v9854_v32 = vcvt.f32.s32 %v9853_v25  ;;  %v1784_v47 = vpop.permute.xlu1 %1783  ;;  %v4186_v25 = vmax.f32 %v4170_v37, 0.0 }
 0x36b   : > { %v1768_v0 = vmul.u32 16, %v9854_v32 }
 0x36c   : > { %929 = vperm.xlu0 %5132, %v906_v27   ;;  %v4168_v27 = vld [vmem:[%s5493_s3 + $0x110] sm:$0xff] }
 0x36d   : > { %2070 = vrot.lane.b32.xlu1 %v2061_v53, %s5405_s4  ;;  %v1792_v9 = vadd.s32 %v1784_v47, %v1768_v0  ;;  %v5148_v29 = vpack.i.bf16 %v7010_v22, %v4168_v27  ;;  %v4784_v36 = vround.rtne.f32 %v4168_v27  ;;  %v4180_v21 = vmax.f32 %v4168_v27, 0.0 }
 0x36e   : > { %5163 = vset.pattern.permute.xlu1 %v9618_v59 }
 0x36f   : > { %vm7132_vm2 = vcmp.ge.f32.partialorder %v4784_v36, 0.0  ;;  %vm7186_vm4 = vcmp.lt.f32.partialorder %v4784_v36, 16.0 }
 0x370   : > { %1351 = vperm.xlu0 %5132, %v1342_v12   ;;  %v4172_v12 = vld [vmem:[%s5493_s3 + $0x130] sm:$0xff]  ;;  %v9858_v49 = vsel %vm7132_vm2, 4294967295, %v9857_v49  ;;  %v2062_v31 = vsel %vm7132_vm2, 1, %v9588_v41  ;;  %v9867_v35 = vsel %vm7186_vm4, 4294967295, %v9866_v35  ;;  %v2102_v48 = vsel %vm7186_vm4, 1, %v9588_v41 }
 0x371   : > { %2074 = vrot.lane.b32.xlu1 %v2063_v17, %s5405_s4  ;;  %v5158_v5 = vpack.i.bf16 %v7035_v54, %v4172_v12  ;;  %v4183_v17 = vmax.f32 %v7010_v22, 0.0  ;;  %v9859_v22 = vmov 0  ;;  %v4192_v32 = vmax.f32 %v4172_v12, 0.0 }
 0x373   : > { %v7142_v38 = vmin.f32 %v4183_v17, 15.0  ;;  %v7235_v0 = vmin.f32 %v4192_v32, 15.0  ;;  %v9882_v32 = vld [vmem:[#allocation19_spill] sm:$0xff] }
 0x374   : > { %1360 = vperm.xlu0 %5132, %v1345_v57   ;;  %v4786_v57 = vround.rtne.f32 %v4170_v37  ;;  %v9876_v37 = vld [vmem:[#allocation23_spill] sm:$0xff] }
 0x375   : > { %2078 = vrot.lane.b32.xlu1 %v2065_v34, %s5405_s4  ;;  %v4189_v34 = vmax.f32 %v7021_v61, 0.0  ;;  %v4801_v28 = vcvt.f32.s32 %v7142_v38  ;;  %v9326_v47 = vcvt.f32.s32 %v7235_v0 }
 0x376   : > { %vm7145_vm3 = vcmp.ge.f32.partialorder %v4786_v57, 0.0  ;;  %vm7197_vm0 = vcmp.lt.f32.partialorder %v4786_v57, 16.0  ;;  %v9877_v57 = vld [vmem:[#allocation16_spill] sm:$0xff] }
 0x377   : > { %v9860_v22 = vsel %vm7145_vm3, 4294967295, %v9859_v22  ;;  %v2064_v62 = vsel %vm7145_vm3, 1, %v9588_v41  ;;  %v7157_v26 = vmin.f32 %v4189_v34, 15.0  ;;  %v9869_v2 = vsel %vm7197_vm0, 4294967295, %v9868_v2 }
 0x378   : > { %1366 = vperm.xlu0 %5132, %v1347_v14   ;;  %v4788_v14 = vround.rtne.f32 %v4172_v12  ;;  %v2104_v10 = vsel %vm7197_vm0, 1, %v9588_v41  ;;  %v5005_v12 = vunpack.i.h.bf16 %v9876_v37 }
 0x379   : > { %2082 = vrot.lane.b32.xlu1 %v2067_v50, %s5405_s4  ;;  %v4195_v50 = vmax.f32 %v7035_v54, 0.0  ;;  %v9329_v46 = vcvt.f32.s32 %v7157_v26 }
 0x37a   : > { %vm7160_vm5 = vcmp.ge.f32.partialorder %v4788_v14, 0.0  ;;  %vm7205_vm12 = vcmp.lt.f32.partialorder %v4788_v14, 16.0  ;;  %v9878_v14 = vld [vmem:[#allocation17_spill] sm:$0xff] }
 0x37b   : > { %v9862_v39 = vsel %vm7160_vm5, 4294967295, %v9861_v39  ;;  %v7172_v56 = vmin.f32 %v4195_v50, 15.0 }
 0x37c   : > { %1372 = vperm.xlu0 %5132, %v1349_v19   ;;  %9863 = vst [vmem:[#allocation7_spill] sm:$0xff] %v9862_v39  ;;  %v2066_v19 = vsel %vm7160_vm5, 1, %v9588_v41  ;;  %v9950_v39 = vmov 0 }
 0x37d   : > { %2110 = vrot.lane.b32.xlu1 %v2101_v20, %s5405_s4  ;;  %v9327_v20 = vcvt.f32.s32 %v7172_v56 }
 0x380   : > { %1794 = vperm.xlu0 %5132, %v1785_v33   ;;  %v9870_v33 = vmov 0 }
 0x381   : > { %2114 = vrot.lane.b32.xlu1 %v2103_v8, %s5405_s4  ;;  %v9871_v33 = vsel %vm7205_vm12, 4294967295, %v9870_v33  ;;  %v2106_v8 = vsel %vm7205_vm12, 1, %v9588_v41 }
 0x382   : > { %9872 = vst [vmem:[#allocation28_spill] sm:$0xff] %v9871_v33  ;;  %v9953_v33 = vmov 0 }
 0x384   : > { %1803 = vperm.xlu0 %5132, %v1788_v42   ;;  %v4174_v42 = vmax.f32 %v7101_v23, 0.0  ;;  %v7229_v23 = vmin.f32 %v4186_v25, 15.0 }
 0x385   : > { %2118 = vrot.lane.b32.xlu1 %v2105_v7, %s5405_s4 }
 0x386   : > { %v7219_v6 = vmin.f32 %v4174_v42, 15.0  ;;  %v9328_v61 = vcvt.f32.s32 %v7229_v23 }
 0x388   : > { %1809 = vperm.xlu0 %5132, %v1790_v58   ;;  %v4792_v7 = vcvt.f32.s32 %v7219_v6  ;;  %v7223_v58 = vmin.f32 %v4180_v21, 15.0  ;;  %v9881_v21 = vld [vmem:[#allocation18_spill] sm:$0xff] }
 0x389   : > { %2122 = vrot.lane.b32.xlu1 %v2107_v16, %s5405_s4  ;;  %v7244_v16 = vand.u32 127, %v178_v30 }
 0x38a   : > { %v4798_v13 = vcvt.f32.s32 %v7223_v58 }
 0x38b   : > { %9873 = vst [vmem:[#allocation24_spill] sm:$0xff] %v7244_v16  ;;  %vm434_vm3 = vcmp.eq.s32.totalorder %v7244_v16, %v9877_v57 }
 0x38c   : > { %1815 = vperm.xlu0 %5132, %v1792_v9   ;;  %v7249_v9 = vadd.s32 128, %v7244_v16 }
 0x38d   : > { %5149 = vrot.lane.b32.xlu1 %v5148_v29, %s5406_s5  ;;  %v9875_v29 = vld [vmem:[#allocation20_spill] sm:$0xff] }
 0x38e   : > { %9874 = vst [vmem:[#allocation37_spill] sm:$0xff] %v7249_v9  ;;  %v4999_v60 = vunpack.i.h.bf16 %v9875_v29  ;;  %v4998_v36 = vunpack.i.l.bf16 %v9875_v29  ;;  %vm435_vm12 = vcmp.eq.s32.totalorder %v7249_v9, %v9877_v57  ;;  %vm437_vm14 = vcmp.eq.s32.totalorder %v7249_v9, %v9878_v14 }
 0x390   : > { %2068 = vrot.lane.b32.xlu0 %v2060_v18, %s5405_s4  ;;  %v5004_v18 = vunpack.i.l.bf16 %v9876_v37 }
 0x391   : > { %5159 = vrot.lane.b32.xlu1 %v5158_v5, %s5406_s5 }
 0x392   : > { %v4468_v34 = vpack.c.bf16 %v5005_v12, %v5004_v18  ;;  %v9884_v18 = vld [vmem:[#allocation30_spill] sm:$0xff] }
 0x393   : > { %v5046_v57 = vunpack.i.l.bf16 %v9884_v18 }
 0x394   : > { %2072 = vrot.lane.b32.xlu0 %v2062_v31, %s5405_s4  ;;  %v4462_v31 = vpack.c.bf16 %v4999_v60, %v4998_v36  ;;  %v9883_v36 = vld [vmem:[#allocation34_spill] sm:$0xff] }
 0x395   : > { %2214 = vrot.lane.b32.xlu1 %v4795_v15, %s5407_s6  ;;  %v5042_v37 = vunpack.i.h.bf16 %v9883_v36  ;;  %v5041_v12 = vunpack.i.l.bf16 %v9883_v36  ;;  %v9891_v36 = vld [vmem:[#allocation36_spill] sm:$0xff] }
 0x398   : > { %2076 = vrot.lane.b32.xlu0 %v2064_v62, %s5405_s4 }
 0x399   : > { %2218 = vrot.lane.b32.xlu1 %v4801_v28, %s5407_s6 }
 0x39c   : > { %2080 = vrot.lane.b32.xlu0 %v2066_v19, %s5405_s4  ;;  %v9879_v19 = vld [vmem:[#allocation21_spill] sm:$0xff] }
 0x39d   : > { %2222 = vrot.lane.b32.xlu1 %v9329_v46, %s5407_s6 }
 0x3a0   : > { %2108 = vrot.lane.b32.xlu0 %v2100_v1, %s5405_s4  ;;  %v5010_v1 = vunpack.i.h.bf16 %v9879_v19 }
 0x3a1   : > { %2226 = vrot.lane.b32.xlu1 %v9327_v20, %s5407_s6  ;;  %v9907_v20 = vld [vmem:[#allocation15_spill] sm:$0xff] }
 0x3a4   : > { %2112 = vrot.lane.b32.xlu0 %v2102_v48, %s5405_s4  ;;  %v5009_v48 = vunpack.i.l.bf16 %v9879_v19  ;;  %v9886_v19 = vld [vmem:[#allocation8_spill] sm:$0xff] }
 0x3a6   : > { %v4474_v25 = vpack.c.bf16 %v5010_v1, %v5009_v48  ;;  %v9887_v1 = vld [vmem:[#allocation35_spill] sm:$0xff] }
 0x3a7   : > { %v5052_v48 = vunpack.i.h.bf16 %v9887_v1 }
 0x3a8   : > { %2116 = vrot.lane.b32.xlu0 %v2104_v10, %s5405_s4  ;;  %v9880_v10 = vld [vmem:[#allocation22_spill] sm:$0xff] }
 0x3ac   : > { %2120 = vrot.lane.b32.xlu0 %v2106_v8, %s5405_s4  ;;  %v5015_v8 = vunpack.i.h.bf16 %v9880_v10 }
 0x3b0   : > { %5144 = vrot.lane.b32.xlu0 %v5143_v40, %s5406_s5  ;;  %v5014_v40 = vunpack.i.l.bf16 %v9880_v10  ;;  %v5051_v10 = vunpack.i.l.bf16 %v9887_v1  ;;  %v9894_v1 = vld [vmem:[#allocation47_spill] sm:$0xff] }
 0x3b2   : > { %v4480_v30 = vpack.c.bf16 %v5015_v8, %v5014_v40 }
 0x3b4   : > { %5154 = vrot.lane.b32.xlu0 %v5153_v51, %s5406_s5 }
 0x3b8   : > { %2212 = vrot.lane.b32.xlu0 %v4792_v7, %s5407_s6 }
 0x3bc   : > { %2216 = vrot.lane.b32.xlu0 %v4798_v13, %s5407_s6 }
 0x3c0   : > { %2220 = vrot.lane.b32.xlu0 %v9328_v61, %s5407_s6 }
 0x3c4   : > { %2224 = vrot.lane.b32.xlu0 %v9326_v47, %s5407_s6  ;;  %v9905_v47 = vld [vmem:[#allocation14_spill] sm:$0xff] }
 0x3ca   : > { %v7246_v27 = vpop.permute.xlu0 %5128 }
 0x3cf   : > { %v410_v5 = vpop.permute.xlu0 %409  ;;  %v7255_v17 = vpop.permute.xlu1 %1797 }
 0x3d0   : > { %vm433_vm5 = vcmp.eq.s32.totalorder %v7249_v9, %v410_v5  ;;  %vm432_vm7 = vcmp.eq.s32.totalorder %v7244_v16, %v410_v5  ;;  %v5047_v5 = vunpack.i.h.bf16 %v9884_v18 }
 0x3d1   : > { %vm4463_vm8 = vmpackc.low %vm435_vm12, %vm433_vm5 }
 0x3d2   : > { %4464 = vmatprep.subr.msk.bf16.mxu0 %vm4463_vm8, %v4462_v31  ;;  %vm4466_vm0 = vmpackc.low %vm434_vm3, %vm432_vm7  ;;  %vm436_vm8 = vcmp.eq.s32.totalorder %v7244_v16, %v9878_v14  ;;  %v9885_v14 = vld [vmem:[#allocation29_spill] sm:$0xff]  ;;  %v4492_v40 = vpack.c.bf16 %v5047_v5, %v5046_v57  ;;  %v9892_v5 = vld [vmem:[#allocation10_spill] sm:$0xff] }
 0x3d3   : > { %v419_v62 = vpop.permute.xlu0 %418  ;;  %4467 = vmatpush1.bf16.msk.msra.mxu0 %vm4466_vm0, %v4462_v31  ;;  %v7265_v50 = vpop.permute.xlu1 %1800  ;;  %vm441_vm0 = vcmp.eq.s32.totalorder %v7249_v9, %v9881_v21 }
 0x3d4   : > { %vm438_vm1 = vcmp.eq.s32.totalorder %v7244_v16, %v419_v62  ;;  %vm439_vm5 = vcmp.eq.s32.totalorder %v7249_v9, %v419_v62  ;;  %v4486_v62 = vpack.c.bf16 %v5042_v37, %v5041_v12  ;;  %v5057_v37 = vunpack.i.h.bf16 %v9891_v36 }
 0x3d5   : > { %vm4469_vm7 = vmpackc.low %vm439_vm5, %vm437_vm14  ;;  %vm440_vm14 = vcmp.eq.s32.totalorder %v7244_v16, %v9881_v21  ;;  %v5056_v12 = vunpack.i.l.bf16 %v9891_v36 }
 0x3d6   : > { %4470 = vmatprep.subr.msk.bf16.mxu0 %vm4469_vm7, %v4468_v34  ;;  %vm4472_vm3 = vmpackc.low %vm438_vm1, %vm436_vm8  ;;  %vm445_vm8 = vcmp.eq.s32.totalorder %v7249_v9, %v9882_v32 }
 0x3d7   : > { %v425_v42 = vpop.permute.xlu0 %424  ;;  %4473 = vmatpush1.bf16.msk.msra.mxu0 %vm4472_vm3, %v4468_v34  ;;  %v7275_v51 = vpop.permute.xlu1 %1806 }
 0x3d8   : > { %vm442_vm12 = vcmp.eq.s32.totalorder %v7244_v16, %v425_v42  ;;  %vm443_vm2 = vcmp.eq.s32.totalorder %v7249_v9, %v425_v42  ;;  %v9888_v42 = vld [vmem:[#allocation31_spill] sm:$0xff] }
 0x3d9   : > { %vm4475_vm1 = vmpackc.low %vm443_vm2, %vm441_vm0  ;;  %vm444_vm2 = vcmp.eq.s32.totalorder %v7244_v16, %v9882_v32  ;;  %v9890_v32 = vld [vmem:[#allocation32_spill] sm:$0xff] }
 0x3da   : > { %4476 = vmatprep.subr.msk.bf16.mxu0 %vm4475_vm1, %v4474_v25  ;;  %vm4478_vm5 = vmpackc.low %vm442_vm12, %vm440_vm14  ;;  %vm9342_vm14 = vcmask 523264  }
 0x3db   : > { %v431_v29 = vpop.permute.xlu0 %430  ;;  %4479 = vmatpush1.bf16.msk.msra.mxu0 %vm4478_vm5, %v4474_v25  ;;  %v7285_v60 = vpop.permute.xlu1 %1812  ;;  %vm934_vm5 = vcmp.eq.s32.totalorder %v7249_v9, %v9885_v14  ;;  %v9889_v25 = vld [vmem:[#allocation9_spill] sm:$0xff] }
 0x3dc   : > { %vm446_vm7 = vcmp.eq.s32.totalorder %v7244_v16, %v431_v29  ;;  %vm447_vm3 = vcmp.eq.s32.totalorder %v7249_v9, %v431_v29 }
 0x3dd   : > { %vm4481_vm0 = vmpackc.low %vm447_vm3, %vm445_vm8 }
 0x3de   : > { %4482 = vmatprep.subr.msk.bf16.mxu0 %vm4481_vm0, %v4480_v30  ;;  %vm4484_vm12 = vmpackc.low %vm446_vm7, %vm444_vm2  ;;  %vm933_vm7 = vcmp.eq.s32.totalorder %v7244_v16, %v9885_v14  ;;  %vm936_vm2 = vcmp.eq.s32.totalorder %v7249_v9, %v9888_v42  ;;  %v4504_v14 = vpack.c.bf16 %v5057_v37, %v5056_v12  ;;  %v9898_v12 = vld [vmem:[#allocation12_spill] sm:$0xff] }
 0x3df   : > { %v909_v31 = vpop.permute.xlu0 %908  ;;  %4485 = vmatpush1.bf16.msk.msra.mxu0 %vm4484_vm12, %v4480_v30  ;;  %v4498_v30 = vpack.c.bf16 %v5052_v48, %v5051_v10  ;;  %v5084_v48 = vunpack.i.h.bf16 %v9894_v1  ;;  %v5083_v10 = vunpack.i.l.bf16 %v9894_v1 }
 0x3e0   : > { %v7295_v34 = vpop.permute.xlu1 %5123  ;;  %vm932_vm1 = vcmp.eq.s32.totalorder %v7249_v9, %v909_v31  ;;  %vm931_vm4 = vcmp.eq.s32.totalorder %v7244_v16, %v909_v31  ;;  %v9893_v31 = vld [vmem:[#allocation33_spill] sm:$0xff] }
 0x3e1   : > { %vm4487_vm8 = vmpackc.low %vm934_vm5, %vm932_vm1  ;;  %v4510_v37 = vpack.c.bf16 %v5084_v48, %v5083_v10  ;;  %v9900_v48 = vld [vmem:[#allocation48_spill] sm:$0xff] }
 0x3e2   : > { %3942 = vmatmul.mubr.msk.f32.vlgmr.msra.gmra.mrb[0].mxu0 %vm9342_vm14, %v9886_v19  ;;  %4488 = vmatprep.subr.msk.bf16.mxu1 %vm4487_vm8, %v4486_v62  ;;  %vm4490_vm3 = vmpackc.low %vm933_vm7, %vm931_vm4  ;;  %vm935_vm4 = vcmp.eq.s32.totalorder %v7244_v16, %v9888_v42  ;;  %vm940_vm8 = vcmp.eq.s32.totalorder %v7249_v9, %v9890_v32  ;;  %v9896_v42 = vld [vmem:[#allocation43_spill] sm:$0xff]  ;;  %v5094_v10 = vunpack.i.h.bf16 %v9900_v48 }
 0x3e3   : > { %v918_v8 = vpop.permute.xlu0 %917  ;;  %4491 = vmatpush1.bf16.msk.msra.mxu1 %vm4490_vm3, %v4486_v62  ;;  %631 = vmatprep.mubr.f32.mxu0 %v9333_v43 }
 0x3e4   : > { %vm937_vm0 = vcmp.eq.s32.totalorder %v7244_v16, %v918_v8  ;;  %vm938_vm12 = vcmp.eq.s32.totalorder %v7249_v9, %v918_v8  ;;  %v7312_v21 = vpop.permute.xlu1 %5134  ;;  %v9895_v8 = vld [vmem:[#allocation11_spill] sm:$0xff] }
 0x3e5   : > { %vm4493_vm1 = vmpackc.low %vm938_vm12, %vm936_vm2  ;;  %vm939_vm2 = vcmp.eq.s32.totalorder %v7244_v16, %v9890_v32 }
 0x3e6   : > { %3943 = vmatmul.mubr.msk.f32.gmra.mrb[2].mxu0 %vm9342_vm14, %v9889_v25  ;;  %4494 = vmatprep.subr.msk.bf16.mxu1 %vm4493_vm1, %v4492_v40  ;;  %vm4496_vm5 = vmpackc.low %vm937_vm0, %vm935_vm4  ;;  %vm944_vm4 = vcmp.eq.s32.totalorder %v7249_v9, %v9893_v31 }
 0x3e7   : > { %v924_v29 = vpop.permute.xlu0 %923  ;;  %4497 = vmatpush1.bf16.msk.msra.mxu1 %vm4496_vm5, %v4492_v40  ;;  %637 = vmatprep.mubr.f32.mxu0 %v9333_v43 }
 0x3e8   : > { %vm941_vm7 = vcmp.eq.s32.totalorder %v7244_v16, %v924_v29  ;;  %vm942_vm3 = vcmp.eq.s32.totalorder %v7249_v9, %v924_v29  ;;  %v7325_v18 = vpop.permute.xlu1 %5139 }
 0x3e9   : > { %vm4499_vm0 = vmpackc.low %vm942_vm3, %vm940_vm8  ;;  %vm943_vm8 = vcmp.eq.s32.totalorder %v7244_v16, %v9893_v31  ;;  %v9899_v31 = vld [vmem:[#allocation44_spill] sm:$0xff] }
 0x3ea   : > { %3944 = vmatmul.mubr.msk.f32.gmra.mrb[4].mxu0 %vm9342_vm14, %v9892_v5  ;;  %4500 = vmatprep.subr.msk.bf16.mxu1 %vm4499_vm0, %v4498_v30  ;;  %vm4502_vm12 = vmpackc.low %vm941_vm7, %vm939_vm2  ;;  %vm1376_vm2 = vcmp.eq.s32.totalorder %v7244_v16, %v9896_v42 }
 0x3eb   : > { %v930_v57 = vpop.permute.xlu0 %929  ;;  %4503 = vmatpush1.bf16.msk.msra.mxu1 %vm4502_vm12, %v4498_v30  ;;  %643 = vmatprep.mubr.f32.mxu0 %v9333_v43  ;;  %v9897_v30 = vld [vmem:[#allocation42_spill] sm:$0xff] }
 0x3ec   : > { %vm945_vm1 = vcmp.eq.s32.totalorder %v7244_v16, %v930_v57  ;;  %vm946_vm5 = vcmp.eq.s32.totalorder %v7249_v9, %v930_v57  ;;  %v7336_v62 = vpop.permute.xlu1 %2070  ;;  %v5089_v29 = vunpack.i.h.bf16 %v9897_v30  ;;  %v5088_v36 = vunpack.i.l.bf16 %v9897_v30 }
 0x3ed   : > { %vm4505_vm7 = vmpackc.low %vm946_vm5, %vm944_vm4  ;;  %vm1377_vm4 = vcmp.eq.s32.totalorder %v7249_v9, %v9896_v42  ;;  %v9901_v42 = vld [vmem:[#allocation13_spill] sm:$0xff] }
 0x3ee   : > { %3945 = vmatmul.mubr.msk.f32.gmra.mrb[6].mxu0 %vm9342_vm14, %v9895_v8  ;;  %4506 = vmatprep.subr.msk.bf16.mxu1 %vm4505_vm7, %v4504_v14  ;;  %vm4508_vm3 = vmpackc.low %vm945_vm1, %vm943_vm8  ;;  %vm1378_vm8 = vcmp.eq.s32.totalorder %v7244_v16, %v9899_v31  ;;  %v4516_v1 = vpack.c.bf16 %v5089_v29, %v5088_v36  ;;  %v9902_v29 = vld [vmem:[#allocation45_spill] sm:$0xff] }
 0x3ef   : > { %v1352_v40 = vpop.permute.xlu0 %1351  ;;  %4509 = vmatpush1.bf16.msk.msra.mxu1 %vm4508_vm3, %v4504_v14  ;;  %649 = vmatprep.mubr.f32.mxu0 %v9333_v43 }
 0x3f0   : > { %vm1374_vm0 = vcmp.eq.s32.totalorder %v7244_v16, %v1352_v40  ;;  %vm1375_vm12 = vcmp.eq.s32.totalorder %v7249_v9, %v1352_v40  ;;  %v7349_v32 = vpop.permute.xlu1 %2074  ;;  %v5093_v40 = vunpack.i.l.bf16 %v9900_v48 }
 0x3f1   : > { %vm4514_vm1 = vmpackc.low %vm1376_vm2, %vm1374_vm0  ;;  %vm1379_vm2 = vcmp.eq.s32.totalorder %v7249_v9, %v9899_v31 }
 0x3f2   : > { %3946 = vmatmul.mubr.msk.f32.gmra.mrb[8].mxu0 %vm9342_vm14, %v9898_v12  ;;  %3998 = vmatmul.mubr.msk.f32.vlgmr.msra.gmra.mrb[0].mxu1 %vm9342_vm14, %v9886_v19  ;;  %vm4511_vm5 = vmpackc.low %vm1377_vm4, %vm1375_vm12  ;;  %vm1382_vm4 = vcmp.eq.s32.totalorder %v7244_v16, %v9902_v29 }
 0x3f3   : > { %4512 = vmatprep.subr.msk.bf16.mxu0 %vm4511_vm5, %v4510_v37  ;;  %v1361_v57 = vpop.permute.xlu0 %1360  ;;  %655 = vmatprep.mubr.f32.mxu0 %v9333_v43 }
 0x3f4   : > { %vm1380_vm7 = vcmp.eq.s32.totalorder %v7244_v16, %v1361_v57  ;;  %vm1381_vm3 = vcmp.eq.s32.totalorder %v7249_v9, %v1361_v57  ;;  %4515 = vmatpush1.bf16.msk.msra.mxu0 %vm4514_vm1, %v4510_v37  ;;  %1073 = vmatprep.mubr.f32.mxu1 %v9333_v43  ;;  %v7365_v14 = vpop.permute.xlu1 %2078  ;;  %v4522_v37 = vpack.c.bf16 %v5094_v10, %v5093_v40  ;;  %v9904_v57 = vld [vmem:[#allocation49_spill] sm:$0xff] }
 0x3f5   : > { %vm4520_vm0 = vmpackc.low %vm1380_vm7, %vm1378_vm8  ;;  %vm1383_vm8 = vcmp.eq.s32.totalorder %v7249_v9, %v9902_v29  ;;  %v5099_v31 = vunpack.i.h.bf16 %v9904_v57  ;;  %v5098_v48 = vunpack.i.l.bf16 %v9904_v57  ;;  %v5126_v29 = vunpack.i.h.bf16 %v7295_v34 }
 0x3f6   : > { %3947 = vmatmul.mubr.msk.f32.gmra.mrb[10].mxu0 %vm9342_vm14, %v9901_v42  ;;  %3999 = vmatmul.mubr.msk.f32.gmra.mrb[2].mxu1 %vm9342_vm14, %v9889_v25  ;;  %vm4517_vm12 = vmpackc.low %vm1381_vm3, %vm1379_vm2  ;;  %v5125_v57 = vunpack.i.l.bf16 %v7295_v34 }
 0x3f7   : > { %4518 = vmatprep.subr.msk.bf16.mxu0 %vm4517_vm12, %v4516_v1  ;;  %v1367_v30 = vpop.permute.xlu0 %1366  ;;  %661 = vmatprep.mubr.f32.mxu0 %v9333_v43  ;;  %v4528_v40 = vpack.c.bf16 %v5099_v31, %v5098_v48  ;;  %v5131_v31 = vunpack.i.h.bf16 %v7246_v27  ;;  %v5130_v48 = vunpack.i.l.bf16 %v7246_v27 }
 0x3f8   : > { %vm1384_vm1 = vcmp.eq.s32.totalorder %v7244_v16, %v1367_v30  ;;  %vm1385_vm5 = vcmp.eq.s32.totalorder %v7249_v9, %v1367_v30  ;;  %4521 = vmatpush1.bf16.msk.msra.mxu0 %vm4520_vm0, %v4516_v1  ;;  %1079 = vmatprep.mubr.f32.mxu1 %v9333_v43  ;;  %v7381_v36 = vpop.permute.xlu1 %2082  ;;  %v9906_v30 = vld [vmem:[#allocation46_spill] sm:$0xff] }
 0x3f9   : > { %9903 = vst [vmem:[#allocation25_spill] sm:$0xff] %v7381_v36  ;;  %vm4526_vm7 = vmpackc.low %vm1384_vm1, %vm1382_vm4  ;;  %vm1386_vm2 = vcmp.eq.s32.totalorder %v7244_v16, %v9906_v30  ;;  %vm1387_vm4 = vcmp.eq.s32.totalorder %v7249_v9, %v9906_v30  ;;  %v4383_v36 = vld [vmem:[%s5493_s3 + $0x1c8] sm:$0xff] }
 0x3fa   : > { %3948 = vmatmul.mubr.msk.f32.gmra.mrb[12].mxu0 %vm9342_vm14, %v9905_v47  ;;  %4000 = vmatmul.mubr.msk.f32.gmra.mrb[4].mxu1 %vm9342_vm14, %v9892_v5  ;;  %vm4523_vm3 = vmpackc.low %vm1385_vm5, %vm1383_vm8  ;;  %vm1819_vm8 = vcmp.eq.s32.totalorder %v7244_v16, %v7255_v17  ;;  %v4879_v63 = vround.rtne.f32 %v4383_v36 }
 0x3fb   : > { %4524 = vmatprep.subr.msk.bf16.mxu0 %vm4523_vm3, %v4522_v37  ;;  %v1373_v1 = vpop.permute.xlu0 %1372  ;;  %667 = vmatprep.mubr.f32.mxu0 %v9333_v43 }
 0x3fc   : > { %vm1388_vm0 = vcmp.eq.s32.totalorder %v7244_v16, %v1373_v1  ;;  %vm1389_vm12 = vcmp.eq.s32.totalorder %v7249_v9, %v1373_v1  ;;  %4527 = vmatpush1.bf16.msk.msra.mxu0 %vm4526_vm7, %v4522_v37  ;;  %1085 = vmatprep.mubr.f32.mxu1 %v9333_v43  ;;  %v7397_v10 = vpop.permute.xlu1 %2110  ;;  %v4534_v1 = vpack.c.bf16 %v5126_v29, %v5125_v57  ;;  %v5136_v29 = vunpack.i.l.bf16 %v7312_v21 }
 0x3fd   : > { %vm4532_vm1 = vmpackc.low %vm1388_vm0, %vm1386_vm2  ;;  %vm1820_vm2 = vcmp.eq.s32.totalorder %v7249_v9, %v7255_v17  ;;  %v4540_v17 = vpack.c.bf16 %v5131_v31, %v5130_v48  ;;  %v5141_v31 = vunpack.i.l.bf16 %v7325_v18 }
 0x3fe   : > { %3949 = vmatmul.mubr.msk.f32.gmra.mrb[14].mxu0 %vm9342_vm14, %v9907_v20  ;;  %4001 = vmatmul.mubr.msk.f32.gmra.mrb[6].mxu1 %vm9342_vm14, %v9895_v8  ;;  %vm4529_vm5 = vmpackc.low %vm1389_vm12, %vm1387_vm4  ;;  %vm1821_vm4 = vcmp.eq.s32.totalorder %v7244_v16, %v7265_v50 }
 0x3ff   : > { %4530 = vmatprep.subr.msk.bf16.mxu0 %vm4529_vm5, %v4528_v40  ;;  %v1795_v37 = vpop.permute.xlu0 %1794  ;;  %1091 = vmatprep.mubr.f32.mxu1 %v9333_v43 }
 0x400   : > { %vm1817_vm7 = vcmp.eq.s32.totalorder %v7244_v16, %v1795_v37  ;;  %vm1818_vm3 = vcmp.eq.s32.totalorder %v7249_v9, %v1795_v37  ;;  %4533 = vmatpush1.bf16.msk.msra.mxu0 %vm4532_vm1, %v4528_v40  ;;  %1510 = vmatprep.mubr.f32.mxu0 %v9333_v43  ;;  %v7413_v34 = vpop.permute.xlu1 %2114  ;;  %v5137_v40 = vunpack.i.h.bf16 %v7312_v21  ;;  %v5142_v37 = vunpack.i.h.bf16 %v7325_v18 }
 0x401   : > { %vm4538_vm0 = vmpackc.low %vm1819_vm8, %vm1817_vm7  ;;  %vm1822_vm8 = vcmp.eq.s32.totalorder %v7249_v9, %v7265_v50 }
 0x402   : > { %4002 = vmatmul.mubr.msk.f32.gmra.mrb[8].mxu1 %vm9342_vm14, %v9898_v12  ;;  %vm4535_vm12 = vmpackc.low %vm1820_vm2, %vm1818_vm3  ;;  %vm1825_vm2 = vcmp.eq.s32.totalorder %v7244_v16, %v7275_v51  ;;  %v4546_v21 = vpack.c.bf16 %v5137_v40, %v5136_v29  ;;  %v4552_v18 = vpack.c.bf16 %v5142_v37, %v5141_v31 }
 0x403   : > { %4070 = vmatmul.mubr.msk.f32.vlgmr.msra.gmra.mrb[16].mxu0 %vm9342_vm14, %v9886_v19  ;;  %4536 = vmatprep.subr.msk.bf16.mxu1 %vm4535_vm12, %v4534_v1  ;;  %v1804_v30 = vpop.permute.xlu0 %1803 }
 0x404   : > { %vm1823_vm1 = vcmp.eq.s32.totalorder %v7244_v16, %v1804_v30  ;;  %vm1824_vm5 = vcmp.eq.s32.totalorder %v7249_v9, %v1804_v30  ;;  %4539 = vmatpush1.bf16.msk.msra.mxu1 %vm4538_vm0, %v4534_v1  ;;  %1097 = vmatprep.mubr.f32.mxu1 %v9333_v43  ;;  %v7428_v27 = vpop.permute.xlu1 %2118 }
 0x405   : > { %9908 = vst [vmem:[#allocation26_spill] sm:$0xff] %v7428_v27  ;;  %vm4544_vm7 = vmpackc.low %vm1823_vm1, %vm1821_vm4  ;;  %1516 = vmatprep.mubr.f32.mxu0 %v9333_v43  ;;  %vm1826_vm4 = vcmp.eq.s32.totalorder %v7249_v9, %v7275_v51 }
 0x406   : > { %4003 = vmatmul.mubr.msk.f32.gmra.mrb[10].mxu1 %vm9342_vm14, %v9901_v42  ;;  %vm4541_vm3 = vmpackc.low %vm1824_vm5, %vm1822_vm8  ;;  %vm1829_vm8 = vcmp.eq.s32.totalorder %v7244_v16, %v7285_v60 }
 0x407   : > { %4071 = vmatmul.mubr.msk.f32.gmra.mrb[18].mxu0 %vm9342_vm14, %v9889_v25  ;;  %4542 = vmatprep.subr.msk.bf16.mxu1 %vm4541_vm3, %v4540_v17  ;;  %v1810_v57 = vpop.permute.xlu0 %1809 }
 0x408   : > { %vm1827_vm0 = vcmp.eq.s32.totalorder %v7244_v16, %v1810_v57  ;;  %vm1828_vm12 = vcmp.eq.s32.totalorder %v7249_v9, %v1810_v57  ;;  %4545 = vmatpush1.bf16.msk.msra.mxu1 %vm4544_vm7, %v4540_v17  ;;  %1103 = vmatprep.mubr.f32.mxu1 %v9333_v43  ;;  %v7444_v50 = vpop.permute.xlu1 %2122 }
 0x409   : > { %9909 = vst [vmem:[#allocation27_spill] sm:$0xff] %v7444_v50  ;;  %vm4550_vm1 = vmpackc.low %vm1827_vm0, %vm1825_vm2  ;;  %1522 = vmatprep.mubr.f32.mxu0 %v9333_v43  ;;  %vm1830_vm2 = vcmp.eq.s32.totalorder %v7249_v9, %v7285_v60  ;;  %v2205_v60 = vmul.u32 16, %v4795_v15 }
 0x40a   : > { %4004 = vmatmul.mubr.msk.f32.gmra.mrb[12].mxu1 %vm9342_vm14, %v9905_v47  ;;  %vm4547_vm5 = vmpackc.low %vm1828_vm12, %vm1826_vm4 }
 0x40b   : > { %4072 = vmatmul.mubr.msk.f32.gmra.mrb[20].mxu0 %vm9342_vm14, %v9892_v5  ;;  %4548 = vmatprep.subr.msk.bf16.mxu1 %vm4547_vm5, %v4546_v21  ;;  %v1816_v48 = vpop.permute.xlu0 %1815 }
 0x40c   : > { %vm1831_vm7 = vcmp.eq.s32.totalorder %v7244_v16, %v1816_v48  ;;  %vm1832_vm3 = vcmp.eq.s32.totalorder %v7249_v9, %v1816_v48  ;;  %4551 = vmatpush1.bf16.msk.msra.mxu1 %vm4550_vm1, %v4546_v21  ;;  %1109 = vmatprep.mubr.f32.mxu1 %v9333_v43  ;;  %v7460_v51 = vpop.permute.xlu1 %5149  ;;  %v9942_v16 = vmov 0  ;;  %v9944_v9 = vmov 0 }
 0x40d   : > { %vm4556_vm0 = vmpackc.low %vm1831_vm7, %vm1829_vm8  ;;  %1528 = vmatprep.mubr.f32.mxu0 %v9333_v43 }
 0x40e   : > { %4005 = vmatmul.mubr.msk.f32.gmra.mrb[14].mxu1 %vm9342_vm14, %v9907_v20  ;;  %vm4553_vm12 = vmpackc.low %vm1832_vm3, %vm1830_vm2 }
 0x40f   : > { %4073 = vmatmul.mubr.msk.f32.gmra.mrb[22].mxu0 %vm9342_vm14, %v9895_v8  ;;  %4554 = vmatprep.subr.msk.bf16.mxu1 %vm4553_vm12, %v4552_v18  ;;  %v7469_v1 = vpop.permute.xlu0 %2068 }
 0x410   : > { %4557 = vmatpush1.bf16.msk.msra.mxu1 %vm4556_vm0, %v4552_v18  ;;  %1534 = vmatprep.mubr.f32.mxu0 %v9333_v43  ;;  %v7472_v30 = vpop.permute.xlu1 %5159 }
 0x411   : > { %9910 = vst [vmem:[#allocation38_spill] sm:$0xff] %v7472_v30  ;;  %1953 = vmatprep.mubr.f32.mxu1 %v9333_v43 }
 0x413   : > { %4074 = vmatmul.mubr.msk.f32.gmra.mrb[24].mxu0 %vm9342_vm14, %v9898_v12  ;;  %4142 = vmatmul.mubr.msk.f32.vlgmr.msra.gmra.mrb[16].mxu1 %vm9342_vm14, %v9886_v19  ;;  %v7481_v17 = vpop.permute.xlu0 %2072  ;;  %v4239_v19 = vld [vmem:[%s5493_s3 + $0x148] sm:$0xff] }
 0x414   : > { %1540 = vmatprep.mubr.f32.mxu0 %v9333_v43  ;;  %1959 = vmatprep.mubr.f32.mxu1 %v9333_v43  ;;  %v2215_v40 = vpop.permute.xlu1 %2214 }
 0x415   : > { %v2229_v29 = vadd.s32 %v2215_v40, %v2205_v60  ;;  %v2204_v40 = vmul.u32 16, %v4792_v7  ;;  %v4238_v7 = vld [vmem:[%s5493_s3 + $0x140] sm:$0xff] }
 0x417   : > { %4075 = vmatmul.mubr.msk.f32.gmra.mrb[26].mxu0 %vm9342_vm14, %v9901_v42  ;;  %4143 = vmatmul.mubr.msk.f32.gmra.mrb[18].mxu1 %vm9342_vm14, %v9889_v25  ;;  %v7489_v11 = vpop.permute.xlu0 %2076  ;;  %v9917_v25 = vcvt.f32.s32 %v7229_v23 }
 0x418   : > { %9911 = vst [vmem:[#allocation39_spill] sm:$0xff] %v7489_v11  ;;  %1546 = vmatprep.mubr.f32.mxu0 %v9333_v43  ;;  %1965 = vmatprep.mubr.f32.mxu1 %v9333_v43  ;;  %v2219_v60 = vpop.permute.xlu1 %2218 }
 0x419   : > { %2240 = vperm.xlu1 %5163, %v2229_v29   ;;  %v2207_v29 = vmul.u32 16, %v4801_v28  ;;  %v2208_v6 = vmul.u32 16, %v9917_v25  ;;  %v9918_v28 = vcvt.f32.s32 %v7172_v56 }
 0x41b   : > { %4076 = vmatmul.mubr.msk.f32.gmra.mrb[28].mxu0 %vm9342_vm14, %v9905_v47  ;;  %4144 = vmatmul.mubr.msk.f32.gmra.mrb[20].mxu1 %vm9342_vm14, %v9892_v5  ;;  %v7497_v15 = vpop.permute.xlu0 %2080  ;;  %v2211_v58 = vmul.u32 16, %v9918_v28 }
 0x41c   : > { %9912 = vst [vmem:[#allocation50_spill] sm:$0xff] %v7497_v15  ;;  %1552 = vmatprep.mubr.f32.mxu0 %v9333_v43  ;;  %1971 = vmatprep.mubr.f32.mxu1 %v9333_v43 }
 0x41f   : > { %4077 = vmatmul.mubr.msk.f32.gmra.mrb[30].mxu0 %vm9342_vm14, %v9907_v20  ;;  %4145 = vmatmul.mubr.msk.f32.gmra.mrb[22].mxu1 %vm9342_vm14, %v9895_v8  ;;  %v7505_v57 = vpop.permute.xlu0 %2108 }
 0x420   : > { %1977 = vmatprep.mubr.f32.mxu1 %v9333_v43  ;;  %2396 = vmatprep.mubr.f32.mxu0 %v9333_v43 }
 0x423   : > { %4146 = vmatmul.mubr.msk.f32.gmra.mrb[24].mxu1 %vm9342_vm14, %v9898_v12  ;;  %v7511_v21 = vpop.permute.xlu0 %2112 }
 0x424   : > { %1983 = vmatprep.mubr.f32.mxu1 %v9333_v43 }
 0x427   : > { %4147 = vmatmul.mubr.msk.f32.gmra.mrb[26].mxu1 %vm9342_vm14, %v9901_v42  ;;  %v7516_v37 = vpop.permute.xlu0 %2116  ;;  %v2231_v42 = vadd.s32 %v2219_v60, %v2207_v29  ;;  %v9919_v60 = vcvt.f32.s32 %v7235_v0  ;;  %v4246_v0 = vmax.f32 %v4238_v7, 0.0 }
 0x428   : > { %9913 = vst [vmem:[#allocation40_spill] sm:$0xff] %v7516_v37  ;;  %1989 = vmatprep.mubr.f32.mxu1 %v9333_v43 }
 0x42b   : > { %4148 = vmatmul.mubr.msk.f32.gmra.mrb[28].mxu1 %vm9342_vm14, %v9905_v47  ;;  %v7521_v31 = vpop.permute.xlu0 %2120  ;;  %v2223_v47 = vpop.permute.xlu1 %2222 }
 0x42c   : > { %9914 = vst [vmem:[#allocation41_spill] sm:$0xff] %v7521_v31  ;;  %1995 = vmatprep.mubr.f32.mxu1 %v9333_v43  ;;  %v4245_v31 = vld [vmem:[%s5493_s3 + $0x178] sm:$0xff] }
 0x42f   : > { %4149 = vmatmul.mubr.msk.f32.gmra.mrb[30].mxu1 %vm9342_vm14, %v9907_v20  ;;  %v7526_v48 = vpop.permute.xlu0 %5144  ;;  %v2206_v20 = vmul.u32 16, %v4798_v13 }
 0x430   : > { %2839 = vmatprep.mubr.f32.mxu1 %v9333_v43  ;;  %v9916_v43 = vcvt.f32.s32 %v7157_v26  ;;  %v2210_v26 = vmul.u32 16, %v9919_v60 }
 0x432   : > { %v2209_v12 = vmul.u32 16, %v9916_v43  ;;  %v4814_v43 = vround.rtne.f32 %v4238_v7 }
 0x433   : > { %v7529_v18 = vpop.permute.xlu0 %5154 }
 0x434   : > { %9915 = vst [vmem:[#allocation20_spill] sm:$0xff] %v7529_v18  ;;  %v2233_v38 = vadd.s32 %v2223_v47, %v2209_v12  ;;  %vm7547_vm4 = vcmp.ge.f32.partialorder %v4814_v43, 0.0  ;;  %v4249_v47 = vmax.f32 %v4239_v19, 0.0  ;;  %vm7561_vm5 = vcmp.lt.f32.partialorder %v4814_v43, 16.0  ;;  %v7844_v18 = vld [vmem:[%s5493_s3 + $0x1d8] sm:$0xff] }
 0x435   : > { %v9928_v43 = vmov 0 }
 0x436   : > { %v7574_v28 = vmin.f32 %v4249_v47, 15.0  ;;  %v9932_v47 = vmov 0 }
 0x437   : > { %v2213_v61 = vpop.permute.xlu0 %2212 }
 0x438   : > { %v2228_v46 = vadd.s32 %v2213_v61, %v2204_v40  ;;  %v2227_v61 = vpop.permute.xlu1 %2226  ;;  %v4815_v40 = vround.rtne.f32 %v4239_v19 }
 0x43a   : > { %2237 = vperm.xlu0 %5132, %v2228_v46   ;;  %vm7551_vm1 = vcmp.ge.f32.partialorder %v4815_v40, 0.0  ;;  %vm7565_vm8 = vcmp.lt.f32.partialorder %v4815_v40, 16.0 }
 0x43b   : > { %v2217_v8 = vpop.permute.xlu0 %2216  ;;  %v2504_v12 = vsel %vm7551_vm1, 1, %v9588_v41 }
 0x43c   : > { %v2230_v5 = vadd.s32 %v2217_v8, %v2206_v20  ;;  %v2235_v20 = vadd.s32 %v2227_v61, %v2211_v58  ;;  %v2503_v8 = vsel %vm7547_vm4, 1, %v9588_v41  ;;  %v2543_v58 = vsel %vm7561_vm5, 1, %v9588_v41 }
 0x43e   : > { %2243 = vperm.xlu1 %5163, %v2230_v5   ;;  %2246 = vperm.xlu0 %5132, %v2231_v42   ;;  %v9920_v5 = vmov 0 }
 0x43f   : > { %v2221_v13 = vpop.permute.xlu0 %2220  ;;  %v9921_v5 = vsel %vm7547_vm4, 4294967295, %v9920_v5 }
 0x440   : > { %v2232_v46 = vadd.s32 %v2221_v13, %v2208_v6  ;;  %v4240_v6 = vld [vmem:[%s5493_s3 + $0x150] sm:$0xff]  ;;  %v2544_v13 = vsel %vm7565_vm8, 1, %v9588_v41 }
 0x441   : > { %v4816_v61 = vround.rtne.f32 %v4240_v6 }
 0x442   : > { %2249 = vperm.xlu1 %5163, %v2232_v46   ;;  %2252 = vperm.xlu0 %5132, %v2233_v38   ;;  %v7572_v38 = vmin.f32 %v4246_v0, 15.0  ;;  %v4241_v46 = vld [vmem:[%s5493_s3 + $0x158] sm:$0xff]  ;;  %v9930_v0 = vmov 0 }
 0x443   : > { %v2225_v23 = vpop.permute.xlu0 %2224  ;;  %vm7588_vm7 = vcmp.ge.f32.partialorder %v4816_v61, 0.0  ;;  %v4817_v40 = vround.rtne.f32 %v4241_v46  ;;  %vm7605_vm2 = vcmp.lt.f32.partialorder %v4816_v61, 16.0  ;;  %v4243_v61 = vld [vmem:[%s5493_s3 + $0x168] sm:$0xff] }
 0x444   : > { %v2234_v25 = vadd.s32 %v2225_v23, %v2210_v26  ;;  %v9341_v60 = vcvt.f32.s32 %v7572_v38  ;;  %v9340_v26 = vcvt.f32.s32 %v7574_v28  ;;  %v9929_v43 = vsel %vm7588_vm7, 4294967295, %v9928_v43 }
 0x445   : > { %v4252_v23 = vmax.f32 %v4240_v6, 0.0  ;;  %vm7601_vm3 = vcmp.ge.f32.partialorder %v4817_v40, 0.0  ;;  %v9933_v47 = vsel %vm7605_vm2, 4294967295, %v9932_v47  ;;  %vm7619_vm0 = vcmp.lt.f32.partialorder %v4817_v40, 16.0 }
 0x446   : > { %2255 = vperm.xlu1 %5163, %v2234_v25   ;;  %2258 = vperm.xlu0 %5132, %v2235_v20   ;;  %v5164_v20 = vpack.i.bf16 %v4239_v19, %v4238_v7  ;;  %v2505_v25 = vsel %vm7588_vm7, 1, %v9588_v41  ;;  %v9931_v0 = vsel %vm7601_vm3, 4294967295, %v9930_v0  ;;  %v4255_v19 = vmax.f32 %v4241_v46, 0.0 }
 0x447   : > { %v2506_v7 = vsel %vm7601_vm3, 1, %v9588_v41  ;;  %v4819_v40 = vround.rtne.f32 %v4243_v61  ;;  %vm2124_vm7 = vcmp.ne.s32.totalorder %v7505_v57, 0 }
 0x449   : > { %vm7642_vm14 = vcmp.ge.f32.partialorder %v4819_v40, 0.0 }
 0x44a   : > { %2511 = vrot.lane.b32.xlu1 %v2503_v8, %s5405_s4  ;;  %2513 = vrot.lane.b32.xlu0 %v2504_v12, %s5405_s4  ;;  %v7611_v8 = vmin.f32 %v4252_v23, 15.0  ;;  %v2545_v12 = vsel %vm7605_vm2, 1, %v9588_v41  ;;  %v7628_v23 = vmin.f32 %v4255_v19, 15.0  ;;  %v9940_v19 = vmov 0 }
 0x44b   : > { %5224 = vset.pattern.permute.xlu1 %v9588_v41  ;;  %v9941_v19 = vsel %vm7642_vm14, 4294967295, %v9940_v19 }
 0x44c   : > { %9934 = vst [vmem:[#allocation23_spill] sm:$0xff] %v7611_v8 }
 0x44e   : > { %2551 = vrot.lane.b32.xlu1 %v2543_v58, %s5405_s4  ;;  %2553 = vrot.lane.b32.xlu0 %v2544_v13, %s5405_s4  ;;  %v9935_v58 = vmov 0  ;;  %v4242_v13 = vld [vmem:[%s5493_s3 + $0x160] sm:$0xff] }
 0x44f   : > { %v9936_v58 = vsel %vm7619_vm0, 4294967295, %v9935_v58 }
 0x452   : > { %2655 = vrot.lane.b32.xlu1 %v9341_v60, %s5407_s6  ;;  %2657 = vrot.lane.b32.xlu0 %v9340_v26, %s5407_s6  ;;  %v4818_v26 = vround.rtne.f32 %v4242_v13  ;;  %v9937_v60 = vmov 0 }
 0x454   : > { %vm7638_vm12 = vcmp.ge.f32.partialorder %v4818_v26, 0.0  ;;  %vm7656_vm3 = vcmp.lt.f32.partialorder %v4818_v26, 16.0 }
 0x455   : > { %v9938_v60 = vsel %vm7638_vm12, 4294967295, %v9937_v60  ;;  %v9943_v16 = vsel %vm7656_vm3, 4294967295, %v9942_v16  ;;  %v2547_v26 = vsel %vm7656_vm3, 1, %v9588_v41 }
 0x456   : > { %5165 = vrot.lane.b32.xlu1 %v5164_v20, %s5406_s5  ;;  %2515 = vrot.lane.b32.xlu0 %v2505_v25, %s5405_s4  ;;  %v9343_v20 = vcvt.f32.s32 %v7611_v8  ;;  %v2546_v25 = vsel %vm7619_vm0, 1, %v9588_v41  ;;  %9939 = vst [vmem:[#allocation16_spill] sm:$0xff] %v9938_v60  ;;  %vm7660_vm0 = vcmp.lt.f32.partialorder %v4819_v40, 16.0 }
 0x457   : > { %v9945_v9 = vsel %vm7660_vm0, 4294967295, %v9944_v9  ;;  %v2548_v40 = vsel %vm7660_vm0, 1, %v9588_v41  ;;  %vm7765_vm0 = vcmp.ge.f32.partialorder %v4879_v63, 0.0 }
 0x45a   : > { %2517 = vrot.lane.b32.xlu1 %v2506_v7, %s5405_s4  ;;  %2555 = vrot.lane.b32.xlu0 %v2545_v12, %s5405_s4  ;;  %v9352_v7 = vcvt.f32.s32 %v7628_v23  ;;  %v5169_v12 = vpack.i.bf16 %v4241_v46, %v4240_v6  ;;  %v2507_v6 = vsel %vm7638_vm12, 1, %v9588_v41  ;;  %v2508_v46 = vsel %vm7642_vm14, 1, %v9588_v41 }
 0x45e   : > { %2557 = vrot.lane.b32.xlu1 %v2546_v25, %s5405_s4  ;;  %2659 = vrot.lane.b32.xlu0 %v9343_v20, %s5407_s6  ;;  %v4258_v25 = vmax.f32 %v4242_v13, 0.0  ;;  %v4261_v20 = vmax.f32 %v4243_v61, 0.0 }
 0x460   : > { %v7669_v30 = vmin.f32 %v4261_v20, 15.0  ;;  %v9947_v20 = vmov 0 }
 0x462   : > { %2661 = vrot.lane.b32.xlu1 %v9352_v7, %s5407_s6  ;;  %5170 = vrot.lane.b32.xlu0 %v5169_v12, %s5406_s5  ;;  %v4244_v7 = vld [vmem:[%s5493_s3 + $0x170] sm:$0xff]  ;;  %v7667_v12 = vmin.f32 %v4258_v25, 15.0  ;;  %9946 = vst [vmem:[#allocation17_spill] sm:$0xff] %v7669_v30  ;;  %v9362_v25 = vcvt.f32.s32 %v7669_v30  ;;  %v7734_v30 = vld [vmem:[%s5493_s3 + $0x1c0] sm:$0xff] }
 0x463   : > { %v4820_v50 = vround.rtne.f32 %v4244_v7  ;;  %v4878_v55 = vround.rtne.f32 %v7734_v30 }
 0x465   : > { %vm7682_vm12 = vcmp.ge.f32.partialorder %v4820_v50, 0.0  ;;  %vm7699_vm14 = vcmp.lt.f32.partialorder %v4820_v50, 16.0 }
 0x466   : > { %2519 = vrot.lane.b32.xlu1 %v2507_v6, %s5405_s4  ;;  %2521 = vrot.lane.b32.xlu0 %v2508_v46, %s5405_s4  ;;  %v9364_v6 = vcvt.f32.s32 %v7667_v12  ;;  %v9948_v20 = vsel %vm7682_vm12, 4294967295, %v9947_v20  ;;  %v4821_v46 = vround.rtne.f32 %v4245_v31  ;;  %v2509_v15 = vsel %vm7682_vm12, 1, %v9588_v41 }
 0x467   : > { %9949 = vst [vmem:[#allocation21_spill] sm:$0xff] %v9948_v20  ;;  %v9954_v33 = vsel %vm7699_vm14, 4294967295, %v9953_v33  ;;  %v2549_v50 = vsel %vm7699_vm14, 1, %v9588_v41  ;;  %v7721_v20 = vld [vmem:[%s5493_s3 + $0x188] sm:$0xff]  ;;  %vm7761_vm14 = vcmp.ge.f32.partialorder %v4878_v55, 0.0 }
 0x468   : > { %vm7695_vm3 = vcmp.ge.f32.partialorder %v4821_v46, 0.0  ;;  %9955 = vst [vmem:[#allocation18_spill] sm:$0xff] %v9954_v33  ;;  %vm7713_vm12 = vcmp.lt.f32.partialorder %v4821_v46, 16.0  ;;  %v4847_v33 = vround.rtne.f32 %v7721_v20 }
 0x469   : > { %v9951_v39 = vsel %vm7695_vm3, 4294967295, %v9950_v39 }
 0x46a   : > { %2559 = vrot.lane.b32.xlu1 %v2547_v26, %s5405_s4  ;;  %2561 = vrot.lane.b32.xlu0 %v2548_v40, %s5405_s4  ;;  %v5174_v26 = vpack.i.bf16 %v4243_v61, %v4242_v13  ;;  %v4264_v40 = vmax.f32 %v4244_v7, 0.0  ;;  %9952 = vst [vmem:[#allocation22_spill] sm:$0xff] %v9951_v39  ;;  %v4267_v61 = vmax.f32 %v4245_v31, 0.0  ;;  %v2550_v39 = vsel %vm7713_vm12, 1, %v9588_v41 }
 0x46c   : > { %v7705_v13 = vmin.f32 %v4264_v40, 15.0  ;;  %v7726_v40 = vmin.f32 %v4267_v61, 15.0  ;;  %v5179_v61 = vpack.i.bf16 %v4245_v31, %v4244_v7  ;;  %v9967_v7 = vmov 0 }
 0x46d   : > { %v9968_v7 = vsel %vm7761_vm14, 4294967295, %v9967_v7 }
 0x46e   : > { %2663 = vrot.lane.b32.xlu1 %v9364_v6, %s5407_s6  ;;  %2665 = vrot.lane.b32.xlu0 %v9362_v25, %s5407_s6  ;;  %9956 = vst [vmem:[#allocation19_spill] sm:$0xff] %v7705_v13  ;;  %v2510_v25 = vsel %vm7695_vm3, 1, %v9588_v41  ;;  %v9957_v6 = vmov 0  ;;  %9960 = vst [vmem:[#allocation30_spill] sm:$0xff] %v7726_v40 }
 0x46f   : > { %v9958_v6 = vsel %vm7713_vm12, 4294967295, %v9957_v6  ;;  %vm7746_vm12 = vcmp.ge.f32.partialorder %v4847_v33, 0.0  ;;  %9969 = vst [vmem:[#allocation31_spill] sm:$0xff] %v9968_v7 }
 0x470   : > { %9959 = vst [vmem:[#allocation34_spill] sm:$0xff] %v9958_v6  ;;  %v9964_v6 = vmov 0  ;;  %v2947_v31 = vsel %vm7746_vm12, 1, %v9588_v41 }
 0x471   : > { %v9965_v6 = vsel %vm7746_vm12, 4294967295, %v9964_v6  ;;  %vm7781_vm12 = vcmp.lt.f32.partialorder %v4847_v33, 16.0  ;;  %v9979_v33 = vmov 0 }
 0x472   : > { %5175 = vrot.lane.b32.xlu1 %v5174_v26, %s5406_s5  ;;  %2523 = vrot.lane.b32.xlu0 %v2509_v15, %s5405_s4  ;;  %v7718_v26 = vld [vmem:[%s5493_s3 + $0x180] sm:$0xff]  ;;  %v9381_v15 = vcvt.f32.s32 %v7705_v13  ;;  %9966 = vst [vmem:[#allocation35_spill] sm:$0xff] %v9965_v6  ;;  %v9976_v6 = vmov 0  ;;  %v7828_v13 = vld [vmem:[%s5493_s3 + $0x198] sm:$0xff] }
 0x473   : > { %v4846_v46 = vround.rtne.f32 %v7718_v26  ;;  %v9977_v6 = vsel %vm7781_vm12, 4294967295, %v9976_v6 }
 0x474   : > { %9978 = vst [vmem:[#allocation33_spill] sm:$0xff] %v9977_v6 }
 0x475   : > { %vm7742_vm3 = vcmp.ge.f32.partialorder %v4846_v46, 0.0 }
 0x476   : > { %2525 = vrot.lane.b32.xlu1 %v2510_v25, %s5405_s4  ;;  %2563 = vrot.lane.b32.xlu0 %v2549_v50, %s5405_s4  ;;  %v9382_v25 = vcvt.f32.s32 %v7726_v40  ;;  %v9961_v50 = vmov 0 }
 0x477   : > { %v9962_v50 = vsel %vm7742_vm3, 4294967295, %v9961_v50 }
 0x478   : > { %9963 = vst [vmem:[#allocation29_spill] sm:$0xff] %v9962_v50  ;;  %v9973_v50 = vmov 0 }
 0x47a   : > { %2565 = vrot.lane.b32.xlu1 %v2550_v39, %s5405_s4  ;;  %2667 = vrot.lane.b32.xlu0 %v9381_v15, %s5407_s6  ;;  %v2946_v39 = vsel %vm7742_vm3, 1, %v9588_v41  ;;  %v9970_v15 = vmov 0  ;;  %vm7777_vm3 = vcmp.lt.f32.partialorder %v4846_v46, 16.0  ;;  %v2987_v46 = vsel %vm7781_vm12, 1, %v9588_v41 }
 0x47b   : > { %v9971_v15 = vsel %vm7765_vm0, 4294967295, %v9970_v15  ;;  %v9974_v50 = vsel %vm7777_vm3, 4294967295, %v9973_v50  ;;  %v2986_v7 = vsel %vm7777_vm3, 1, %v9588_v41 }
 0x47c   : > { %9972 = vst [vmem:[#allocation32_spill] sm:$0xff] %v9971_v15  ;;  %9975 = vst [vmem:[#allocation36_spill] sm:$0xff] %v9974_v50  ;;  %v4390_v15 = vmax.f32 %v7734_v30, 0.0 }
 0x47e   : > { %2669 = vrot.lane.b32.xlu1 %v9382_v25, %s5407_s6  ;;  %5180 = vrot.lane.b32.xlu0 %v5179_v61, %s5406_s5  ;;  %v3389_v61 = vsel %vm7761_vm14, 1, %v9588_v41  ;;  %v3390_v25 = vsel %vm7765_vm0, 1, %v9588_v41  ;;  %vm7795_vm14 = vcmp.lt.f32.partialorder %v4878_v55, 16.0  ;;  %vm7799_vm0 = vcmp.lt.f32.partialorder %v4879_v63, 16.0 }
 0x47f   : > { %v9980_v33 = vsel %vm7795_vm14, 4294967295, %v9979_v33  ;;  %v4393_v55 = vmax.f32 %v4383_v36, 0.0  ;;  %v3429_v6 = vsel %vm7795_vm14, 1, %v9588_v41  ;;  %v3430_v63 = vsel %vm7799_vm0, 1, %v9588_v41 }
 0x480   : > { %9981 = vst [vmem:[#allocation47_spill] sm:$0xff] %v9980_v33  ;;  %v7825_v33 = vld [vmem:[%s5493_s3 + $0x190] sm:$0xff] }
 0x482   : > { %2954 = vrot.lane.b32.xlu1 %v2946_v39, %s5405_s4  ;;  %2956 = vrot.lane.b32.xlu0 %v2947_v31, %s5405_s4  ;;  %v4318_v39 = vmax.f32 %v7718_v26, 0.0  ;;  %v4321_v31 = vmax.f32 %v7721_v20, 0.0 }
 0x484   : > { %v7807_v50 = vmin.f32 %v4321_v31, 15.0  ;;  %v7820_v31 = vmin.f32 %v4390_v15, 15.0  ;;  %v4848_v15 = vround.rtne.f32 %v7825_v33 }
 0x486   : > { %3397 = vrot.lane.b32.xlu1 %v3389_v61, %s5405_s4  ;;  %3399 = vrot.lane.b32.xlu0 %v3390_v25, %s5405_s4  ;;  %v9982_v61 = vmov 0  ;;  %v7805_v25 = vmin.f32 %v4318_v39, 15.0  ;;  %9986 = vst [vmem:[#allocation44_spill] sm:$0xff] %v7807_v50  ;;  %v9407_v39 = vcvt.f32.s32 %v7807_v50  ;;  %9987 = vst [vmem:[#allocation48_spill] sm:$0xff] %v7820_v31  ;;  %vm7855_vm3 = vcmp.ge.f32.partialorder %v4848_v15, 0.0 }
 0x487   : > { %v9983_v61 = vsel %vm7799_vm0, 4294967295, %v9982_v61  ;;  %v9992_v50 = vmov 0 }
 0x488   : > { %9984 = vst [vmem:[#allocation43_spill] sm:$0xff] %v9983_v61  ;;  %9985 = vst [vmem:[#allocation42_spill] sm:$0xff] %v7805_v25  ;;  %v7841_v61 = vld [vmem:[%s5493_s3 + $0x1d0] sm:$0xff] }
 0x48a   : > { %2994 = vrot.lane.b32.xlu1 %v2986_v7, %s5405_s4  ;;  %2996 = vrot.lane.b32.xlu0 %v2987_v46, %s5405_s4  ;;  %v9406_v7 = vcvt.f32.s32 %v7805_v25  ;;  %v7822_v46 = vmin.f32 %v4393_v55, 15.0  ;;  %v4849_v55 = vround.rtne.f32 %v7828_v13  ;;  %v9989_v25 = vmov 0 }
 0x48b   : > { %v9990_v25 = vsel %vm7855_vm3, 4294967295, %v9989_v25 }
 0x48c   : > { %9988 = vst [vmem:[#allocation45_spill] sm:$0xff] %v7822_v46  ;;  %9991 = vst [vmem:[#allocation49_spill] sm:$0xff] %v9990_v25  ;;  %vm7859_vm14 = vcmp.ge.f32.partialorder %v4849_v55, 0.0  ;;  %v10004_v25 = vmov 0 }
 0x48d   : > { %v9993_v50 = vsel %vm7859_vm14, 4294967295, %v9992_v50 }
 0x48e   : > { %3437 = vrot.lane.b32.xlu1 %v3429_v6, %s5405_s4  ;;  %3439 = vrot.lane.b32.xlu0 %v3430_v63, %s5405_s4  ;;  %v9414_v6 = vcvt.f32.s32 %v7820_v31  ;;  %v9420_v63 = vcvt.f32.s32 %v7822_v46  ;;  %9994 = vst [vmem:[#allocation46_spill] sm:$0xff] %v9993_v50  ;;  %v4880_v31 = vround.rtne.f32 %v7841_v61  ;;  %v10020_v46 = vmov 0 }
 0x490   : > { %vm7873_vm0 = vcmp.ge.f32.partialorder %v4880_v31, 0.0 }
 0x492   : > { %3098 = vrot.lane.b32.xlu1 %v9406_v7, %s5407_s6  ;;  %3100 = vrot.lane.b32.xlu0 %v9407_v39, %s5407_s6  ;;  %v5184_v7 = vpack.i.bf16 %v7721_v20, %v7718_v26  ;;  %v5189_v39 = vpack.i.bf16 %v4383_v36, %v7734_v30  ;;  %v2948_v36 = vsel %vm7855_vm3, 1, %v9588_v41  ;;  %v2949_v30 = vsel %vm7859_vm14, 1, %v9588_v41 }
 0x493   : > { %v9995_v20 = vmov 0  ;;  %v9998_v26 = vmov 0  ;;  %vm7889_vm3 = vcmp.lt.f32.partialorder %v4848_v15, 16.0  ;;  %vm7893_vm14 = vcmp.lt.f32.partialorder %v4849_v55, 16.0 }
 0x494   : > { %v9996_v20 = vsel %vm7873_vm0, 4294967295, %v9995_v20  ;;  %v10005_v25 = vsel %vm7893_vm14, 4294967295, %v10004_v25  ;;  %v2989_v15 = vsel %vm7893_vm14, 1, %v9588_v41  ;;  %v10007_v55 = vmov 0 }
 0x495   : > { %9997 = vst [vmem:[#allocation51_spill] sm:$0xff] %v9996_v20  ;;  %10006 = vst [vmem:[#allocation54_spill] sm:$0xff] %v10005_v25  ;;  %v2988_v20 = vsel %vm7889_vm3, 1, %v9588_v41  ;;  %v7942_v25 = vld [vmem:[%s5493_s3 + $0x1a8] sm:$0xff] }
 0x496   : > { %3541 = vrot.lane.b32.xlu1 %v9414_v6, %s5407_s6  ;;  %3543 = vrot.lane.b32.xlu0 %v9420_v63, %s5407_s6  ;;  %v4881_v6 = vround.rtne.f32 %v7844_v18  ;;  %v10001_v63 = vmov 0 }
 0x497   : > { %v10002_v63 = vsel %vm7889_vm3, 4294967295, %v10001_v63 }
 0x498   : > { %vm7877_vm12 = vcmp.ge.f32.partialorder %v4881_v6, 0.0  ;;  %10003 = vst [vmem:[#allocation53_spill] sm:$0xff] %v10002_v63  ;;  %v4399_v63 = vmax.f32 %v7844_v18, 0.0 }
 0x499   : > { %v9999_v26 = vsel %vm7877_vm12, 4294967295, %v9998_v26 }
 0x49a   : > { %5185 = vrot.lane.b32.xlu1 %v5184_v7, %s5406_s5  ;;  %5190 = vrot.lane.b32.xlu0 %v5189_v39, %s5406_s5  ;;  %10000 = vst [vmem:[#allocation52_spill] sm:$0xff] %v9999_v26  ;;  %v3391_v7 = vsel %vm7873_vm0, 1, %v9588_v41  ;;  %v3392_v39 = vsel %vm7877_vm12, 1, %v9588_v41  ;;  %vm7907_vm0 = vcmp.lt.f32.partialorder %v4880_v31, 16.0  ;;  %vm7911_vm12 = vcmp.lt.f32.partialorder %v4881_v6, 16.0 }
 0x49b   : > { %v10008_v55 = vsel %vm7907_vm0, 4294967295, %v10007_v55  ;;  %v4396_v31 = vmax.f32 %v7841_v61, 0.0  ;;  %v3431_v6 = vsel %vm7907_vm0, 1, %v9588_v41  ;;  %v7935_v50 = vmin.f32 %v4399_v63, 15.0 }
 0x49c   : > { %10009 = vst [vmem:[#allocation55_spill] sm:$0xff] %v10008_v55  ;;  %v7939_v55 = vld [vmem:[%s5493_s3 + $0x1a0] sm:$0xff] }
 0x49d   : > { %10016 = vst [vmem:[#allocation60_spill] sm:$0xff] %v7935_v50  ;;  %v4850_v63 = vround.rtne.f32 %v7939_v55 }
 0x49e   : > { %2958 = vrot.lane.b32.xlu1 %v2948_v36, %s5405_s4  ;;  %2960 = vrot.lane.b32.xlu0 %v2949_v30, %s5405_s4  ;;  %v4324_v36 = vmax.f32 %v7825_v33, 0.0  ;;  %v4327_v30 = vmax.f32 %v7828_v13, 0.0 }
 0x49f   : > { %vm7972_vm0 = vcmp.ge.f32.partialorder %v4850_v63, 0.0 }
 0x4a0   : > { %v7919_v26 = vmin.f32 %v4327_v30, 15.0 }
 0x4a2   : > { %3401 = vrot.lane.b32.xlu1 %v3391_v7, %s5405_s4  ;;  %3403 = vrot.lane.b32.xlu0 %v3392_v39, %s5405_s4  ;;  %v10010_v7 = vmov 0  ;;  %v7917_v39 = vmin.f32 %v4324_v36, 15.0  ;;  %10014 = vst [vmem:[#allocation58_spill] sm:$0xff] %v7919_v26  ;;  %v9432_v30 = vcvt.f32.s32 %v7919_v26  ;;  %v7970_v26 = vld [vmem:[%s5493_s3 + $0x1e8] sm:$0xff] }
 0x4a3   : > { %v10011_v7 = vsel %vm7911_vm12, 4294967295, %v10010_v7 }
 0x4a4   : > { %10012 = vst [vmem:[#allocation56_spill] sm:$0xff] %v10011_v7  ;;  %10013 = vst [vmem:[#allocation57_spill] sm:$0xff] %v7917_v39  ;;  %v9433_v36 = vcvt.f32.s32 %v7917_v39  ;;  %v7957_v7 = vld [vmem:[%s5493_s3 + $0x1e0] sm:$0xff]  ;;  %v10017_v39 = vmov 0 }
 0x4a5   : > { %v10018_v39 = vsel %vm7972_vm0, 4294967295, %v10017_v39 }
 0x4a6   : > { %2998 = vrot.lane.b32.xlu1 %v2988_v20, %s5405_s4  ;;  %3000 = vrot.lane.b32.xlu0 %v2989_v15, %s5405_s4  ;;  %v3432_v20 = vsel %vm7911_vm12, 1, %v9588_v41  ;;  %v7933_v15 = vmin.f32 %v4396_v31, 15.0  ;;  %v9441_v31 = vcvt.f32.s32 %v7935_v50  ;;  %10019 = vst [vmem:[#allocation61_spill] sm:$0xff] %v10018_v39  ;;  %v10024_v50 = vmov 0 }
 0x4a7   : > { %v10031_v39 = vmov 0 }
 0x4a8   : > { %10015 = vst [vmem:[#allocation59_spill] sm:$0xff] %v7933_v15 }
 0x4aa   : > { %3441 = vrot.lane.b32.xlu1 %v3431_v6, %s5405_s4  ;;  %3443 = vrot.lane.b32.xlu0 %v3432_v20, %s5405_s4  ;;  %v9439_v6 = vcvt.f32.s32 %v7933_v15  ;;  %v4851_v20 = vround.rtne.f32 %v7942_v25 }
 0x4ac   : > { %vm7976_vm12 = vcmp.ge.f32.partialorder %v4851_v20, 0.0 }
 0x4ad   : > { %v10021_v46 = vsel %vm7976_vm12, 4294967295, %v10020_v46 }
 0x4ae   : > { %3102 = vrot.lane.b32.xlu1 %v9433_v36, %s5407_s6  ;;  %3104 = vrot.lane.b32.xlu0 %v9432_v30, %s5407_s6  ;;  %v5194_v30 = vpack.i.bf16 %v7828_v13, %v7825_v33  ;;  %v5199_v36 = vpack.i.bf16 %v7844_v18, %v7841_v61  ;;  %10022 = vst [vmem:[#allocation62_spill] sm:$0xff] %v10021_v46  ;;  %v7988_v13 = vpop.permute.xlu1 %2240  ;;  %v2950_v33 = vsel %vm7972_vm0, 1, %v9588_v41  ;;  %v2951_v61 = vsel %vm7976_vm12, 1, %v9588_v41 }
 0x4af   : > { %10023 = vst [vmem:[#allocation63_spill] sm:$0xff] %v7988_v13  ;;  %vm8016_vm0 = vcmp.lt.f32.partialorder %v4850_v63, 16.0  ;;  %vm8024_vm12 = vcmp.lt.f32.partialorder %v4851_v20, 16.0  ;;  %v4402_v46 = vmax.f32 %v7957_v7, 0.0 }
 0x4b0   : > { %v10032_v39 = vsel %vm8016_vm0, 4294967295, %v10031_v39  ;;  %v2991_v20 = vsel %vm8024_vm12, 1, %v9588_v41 }
 0x4b1   : > { %10033 = vst [vmem:[#allocation67_spill] sm:$0xff] %v10032_v39 }
 0x4b2   : > { %3545 = vrot.lane.b32.xlu1 %v9439_v6, %s5407_s6  ;;  %3547 = vrot.lane.b32.xlu0 %v9441_v31, %s5407_s6  ;;  %v4882_v6 = vround.rtne.f32 %v7957_v7  ;;  %v4883_v31 = vround.rtne.f32 %v7970_v26 }
 0x4b4   : > { %vm7996_vm3 = vcmp.ge.f32.partialorder %v4882_v6, 0.0  ;;  %vm8002_vm14 = vcmp.ge.f32.partialorder %v4883_v31, 0.0 }
 0x4b5   : > { %v627_v15 = vpop.f32.mrb[0].mxu0  ;;  %v10025_v50 = vsel %vm7996_vm3, 4294967295, %v10024_v50  ;;  %v3393_v13 = vsel %vm7996_vm3, 1, %v9588_v41  ;;  %vm8040_vm3 = vcmp.lt.f32.partialorder %v4882_v6, 16.0 }
 0x4b6   : > { %674 = vst [vmem:[%s7982_s15] sm:$0xff] %v627_v15  ;;  %5195 = vrot.lane.b32.xlu1 %v5194_v30, %s5406_s5  ;;  %5200 = vrot.lane.b32.xlu0 %v5199_v36, %s5406_s5  ;;  %v629_v18 = vpop.f32.mrb[1].mxu0  ;;  %10026 = vst [vmem:[#allocation64_spill] sm:$0xff] %v10025_v50  ;;  %v10028_v36 = vmov 0  ;;  %v4330_v50 = vmax.f32 %v7939_v55, 0.0 }
 0x4b7   : > { %675 = vst [vmem:[%s7982_s15 + $0x8] sm:$0xff] %v629_v18  ;;  %v10029_v36 = vsel %vm8002_vm14, 4294967295, %v10028_v36 }
 0x4b8   : > { %10030 = vst [vmem:[#allocation66_spill] sm:$0xff] %v10029_v36  ;;  %v10044_v36 = vmov 0 }
 0x4b9   : > { %v8000_v15 = vpop.permute.xlu0 %2237  ;;  %v633_v30 = vpop.f32.mrb[2].mxu0 }
 0x4ba   : > { %10027 = vst [vmem:[#allocation65_spill] sm:$0xff] %v8000_v15  ;;  %676 = vst [vmem:[%s7982_s15 + $0x10] sm:$0xff] %v633_v30  ;;  %2962 = vrot.lane.b32.xlu1 %v2950_v33, %s5405_s4  ;;  %2964 = vrot.lane.b32.xlu0 %v2951_v61, %s5405_s4  ;;  %v635_v18 = vpop.f32.mrb[3].mxu0  ;;  %v3394_v15 = vsel %vm8002_vm14, 1, %v9588_v41  ;;  %v10036_v61 = vmov 0  ;;  %vm8048_vm14 = vcmp.lt.f32.partialorder %v4883_v31, 16.0 }
 0x4bb   : > { %677 = vst [vmem:[%s7982_s15 + $0x18] sm:$0xff] %v635_v18  ;;  %v10037_v61 = vsel %vm8024_vm12, 4294967295, %v10036_v61  ;;  %v10045_v36 = vsel %vm8048_vm14, 4294967295, %v10044_v36  ;;  %v3433_v31 = vsel %vm8040_vm3, 1, %v9588_v41 }
 0x4bc   : > { %10038 = vst [vmem:[#allocation70_spill] sm:$0xff] %v10037_v61  ;;  %10046 = vst [vmem:[#allocation74_spill] sm:$0xff] %v10045_v36 }
 0x4bd   : > { %v8020_v30 = vpop.permute.xlu0 %2246  ;;  %v8022_v33 = vpop.permute.xlu1 %2243 }
 0x4be   : > { %10034 = vst [vmem:[#allocation68_spill] sm:$0xff] %v8020_v30  ;;  %10035 = vst [vmem:[#allocation69_spill] sm:$0xff] %v8022_v33  ;;  %v639_v18 = vpop.f32.mrb[4].mxu0  ;;  %3405 = vrot.lane.b32.xlu1 %v3393_v13, %s5405_s4  ;;  %3407 = vrot.lane.b32.xlu0 %v3394_v15, %s5405_s4  ;;  %v2990_v30 = vsel %vm8016_vm0, 1, %v9588_v41  ;;  %v4333_v33 = vmax.f32 %v7942_v25, 0.0  ;;  %v10039_v13 = vmov 0 }
 0x4bf   : > { %678 = vst [vmem:[%s7982_s15 + $0x20] sm:$0xff] %v639_v18  ;;  %v641_v63 = vpop.f32.mrb[5].mxu0  ;;  %v10040_v13 = vsel %vm8040_vm3, 4294967295, %v10039_v13 }
 0x4c0   : > { %679 = vst [vmem:[%s7982_s15 + $0x28] sm:$0xff] %v641_v63  ;;  %10041 = vst [vmem:[#allocation71_spill] sm:$0xff] %v10040_v13  ;;  %v8053_v63 = vmin.f32 %v4330_v50, 15.0  ;;  %v3434_v50 = vsel %vm8048_vm14, 1, %v9588_v41  ;;  %v8074_v13 = vmin.f32 %v4402_v46, 15.0 }
 0x4c1   : > { %v8044_v18 = vpop.permute.xlu0 %2252  ;;  %v8046_v15 = vpop.permute.xlu1 %2249 }
 0x4c2   : > { %10042 = vst [vmem:[#allocation72_spill] sm:$0xff] %v8044_v18  ;;  %10043 = vst [vmem:[#allocation73_spill] sm:$0xff] %v8046_v15  ;;  %v645_v39 = vpop.f32.mrb[6].mxu0  ;;  %3002 = vrot.lane.b32.xlu1 %v2990_v30, %s5405_s4  ;;  %3004 = vrot.lane.b32.xlu0 %v2991_v20, %s5405_s4  ;;  %v8061_v15 = vmin.f32 %v4333_v33, 15.0  ;;  %v4405_v18 = vmax.f32 %v7970_v26, 0.0  ;;  %v10057_v40 = vcvt.f32.s32 %v8074_v13 }
 0x4c3   : > { %10047 = vst [vmem:[#allocation75_spill] sm:$0xff] %v8053_v63  ;;  %680 = vst [vmem:[%s7982_s15 + $0x30] sm:$0xff] %v645_v39  ;;  %v647_v6 = vpop.f32.mrb[7].mxu0 }
 0x4c4   : > { %10048 = vst [vmem:[#allocation76_spill] sm:$0xff] %v8061_v15  ;;  %681 = vst [vmem:[%s7982_s15 + $0x38] sm:$0xff] %v647_v6  ;;  %v8080_v36 = vmin.f32 %v4405_v18, 15.0 }
 0x4c5   : > { %v8068_v39 = vpop.permute.xlu0 %2258  ;;  %v8070_v30 = vpop.permute.xlu1 %2255  ;;  %10051 = vst [vmem:[#allocation79_spill] sm:$0xff] %v8074_v13 }
 0x4c6   : > { %10049 = vst [vmem:[#allocation77_spill] sm:$0xff] %v8068_v39  ;;  %10050 = vst [vmem:[#allocation78_spill] sm:$0xff] %v8070_v30  ;;  %v651_v20 = vpop.f32.mrb[8].mxu0  ;;  %v1069_v61 = vpop.f32.mrb[0].mxu1  ;;  %3445 = vrot.lane.b32.xlu1 %v3433_v31, %s5405_s4  ;;  %3447 = vrot.lane.b32.xlu0 %v3434_v50, %s5405_s4  ;;  %v10053_v50 = vcvt.f32.s32 %v8053_v63  ;;  %v8096_v30 = vld [vmem:[%s5493_s3 + $0x1b8] sm:$0xff]  ;;  %v9475_v8 = vcvt.f32.s32 %v8080_v36 }
 0x4c7   : > { %682 = vst [vmem:[%s7982_s15 + $0x40] sm:$0xff] %v651_v20  ;;  %4006 = vst [vmem:[%s7982_s15 + $0x80] sm:$0xff] %v1069_v61  ;;  %v653_v6 = vpop.f32.mrb[9].mxu0  ;;  %v1071_v39 = vpop.f32.mrb[1].mxu1  ;;  %v8089_v20 = vld [vmem:[%s5493_s3 + $0x1b0] sm:$0xff] }
 0x4c8   : > { %10052 = vst [vmem:[#allocation80_spill] sm:$0xff] %v8080_v36  ;;  %683 = vst [vmem:[%s7982_s15 + $0x48] sm:$0xff] %v653_v6  ;;  %v10068_v36 = vmov 0 }
 0x4c9   : > { %4007 = vst [vmem:[%s7982_s15 + $0x88] sm:$0xff] %v1071_v39  ;;  %v8084_v31 = vpop.permute.xlu0 %2513  ;;  %v8086_v46 = vpop.permute.xlu1 %2511  ;;  %v10054_v39 = vcvt.f32.s32 %v8061_v15  ;;  %v8113_v15 = vld [vmem:[%s5493_s3 + $0x1f0] sm:$0xff] }
 0x4ca   : > { %v657_v61 = vpop.f32.mrb[10].mxu0  ;;  %v1075_v33 = vpop.f32.mrb[2].mxu1  ;;  %3106 = vrot.lane.b32.xlu1 %v10053_v50, %s5407_s6  ;;  %v4852_v50 = vround.rtne.f32 %v8089_v20 }
 0x4cb   : > { %684 = vst [vmem:[%s7982_s15 + $0x50] sm:$0xff] %v657_v61  ;;  %4008 = vst [vmem:[%s7982_s15 + $0x90] sm:$0xff] %v1075_v33  ;;  %3108 = vrot.lane.b32.xlu0 %v10054_v39, %s5407_s6  ;;  %v659_v6 = vpop.f32.mrb[11].mxu0  ;;  %v1077_v37 = vpop.f32.mrb[3].mxu1  ;;  %v4853_v61 = vround.rtne.f32 %v8096_v30 }
 0x4cc   : > { %685 = vst [vmem:[%s7982_s15 + $0x58] sm:$0xff] %v659_v6  ;;  %4009 = vst [vmem:[%s7982_s15 + $0x98] sm:$0xff] %v1077_v37  ;;  %v5204_v37 = vpack.i.bf16 %v7942_v25, %v7939_v55  ;;  %v8121_v6 = vld [vmem:[%s5493_s3 + $0x1f8] sm:$0xff]  ;;  %vm8132_vm3 = vcmp.ge.f32.partialorder %v4852_v50, 0.0  ;;  %v4884_v25 = vround.rtne.f32 %v8113_v15 }
 0x4cd   : > { %v8107_v18 = vpop.permute.xlu0 %2553  ;;  %v8109_v33 = vpop.permute.xlu1 %2551  ;;  %vm8141_vm14 = vcmp.ge.f32.partialorder %v4853_v61, 0.0  ;;  %v2952_v13 = vsel %vm8132_vm3, 1, %v9588_v41 }
 0x4ce   : > { %10055 = vst [vmem:[#allocation81_spill] sm:$0xff] %v8107_v18  ;;  %10056 = vst [vmem:[#allocation82_spill] sm:$0xff] %v8109_v33  ;;  %v663_v39 = vpop.f32.mrb[12].mxu0  ;;  %v1081_v63 = vpop.f32.mrb[4].mxu1  ;;  %3549 = vrot.lane.b32.xlu1 %v10057_v40, %s5407_s6  ;;  %v5209_v18 = vpack.i.bf16 %v7970_v26, %v7957_v7  ;;  %v10058_v40 = vmov 0  ;;  %v4885_v26 = vround.rtne.f32 %v8121_v6  ;;  %vm8158_vm0 = vcmp.ge.f32.partialorder %v4884_v25, 0.0 }
 0x4cf   : > { %686 = vst [vmem:[%s7982_s15 + $0x60] sm:$0xff] %v663_v39  ;;  %4010 = vst [vmem:[%s7982_s15 + $0xa0] sm:$0xff] %v1081_v63  ;;  %3551 = vrot.lane.b32.xlu0 %v9475_v8, %s5407_s6  ;;  %v665_v33 = vpop.f32.mrb[13].mxu0  ;;  %v1083_v27 = vpop.f32.mrb[5].mxu1  ;;  %v10059_v40 = vsel %vm8132_vm3, 4294967295, %v10058_v40  ;;  %v10061_v39 = vmov 0 }
 0x4d0   : > { %687 = vst [vmem:[%s7982_s15 + $0x68] sm:$0xff] %v665_v33  ;;  %4011 = vst [vmem:[%s7982_s15 + $0xa8] sm:$0xff] %v1083_v27  ;;  %v10062_v39 = vsel %vm8141_vm14, 4294967295, %v10061_v39  ;;  %vm8166_vm12 = vcmp.ge.f32.partialorder %v4885_v26, 0.0  ;;  %vm8182_vm3 = vcmp.lt.f32.partialorder %v4852_v50, 16.0 }
 0x4d1   : > { %10060 = vst [vmem:[#allocation83_spill] sm:$0xff] %v10059_v40  ;;  %v8137_v55 = vpop.permute.xlu0 %2657  ;;  %v8139_v63 = vpop.permute.xlu1 %2655  ;;  %10063 = vst [vmem:[#allocation84_spill] sm:$0xff] %v10062_v39  ;;  %v10069_v36 = vsel %vm8166_vm12, 4294967295, %v10068_v36  ;;  %v3396_v11 = vsel %vm8166_vm12, 1, %v9588_v41  ;;  %vm8216_vm12 = vcmp.lt.f32.partialorder %v4885_v26, 16.0 }
 0x4d2   : > { %v669_v7 = vpop.f32.mrb[14].mxu0  ;;  %v1087_v27 = vpop.f32.mrb[6].mxu1  ;;  %5205 = vrot.lane.b32.xlu1 %v5204_v37, %s5406_s5  ;;  %v2953_v37 = vsel %vm8141_vm14, 1, %v9588_v41  ;;  %10070 = vst [vmem:[#allocation87_spill] sm:$0xff] %v10069_v36  ;;  %vm8190_vm14 = vcmp.lt.f32.partialorder %v4853_v61, 16.0  ;;  %v2992_v61 = vsel %vm8182_vm3, 1, %v9588_v41 }
 0x4d3   : > { %688 = vst [vmem:[%s7982_s15 + $0x70] sm:$0xff] %v669_v7  ;;  %4012 = vst [vmem:[%s7982_s15 + $0xb0] sm:$0xff] %v1087_v27  ;;  %5210 = vrot.lane.b32.xlu0 %v5209_v18, %s5406_s5  ;;  %v671_v33 = vpop.f32.mrb[15].mxu0  ;;  %v1089_v8 = vpop.f32.mrb[7].mxu1  ;;  %v10064_v7 = vmov 0 }
 0x4d4   : > { %689 = vst [vmem:[%s7982_s15 + $0x78] sm:$0xff] %v671_v33  ;;  %4013 = vst [vmem:[%s7982_s15 + $0xb8] sm:$0xff] %v1089_v8  ;;  %v10065_v7 = vsel %vm8158_vm0, 4294967295, %v10064_v7 }
 0x4d5   : > { %10066 = vst [vmem:[#allocation85_spill] sm:$0xff] %v10065_v7  ;;  %v8162_v27 = vpop.permute.xlu0 %2515  ;;  %v8164_v18 = vpop.permute.xlu1 %5165  ;;  %v4336_v7 = vmax.f32 %v8089_v20, 0.0  ;;  %v10138_v29 = vld [vmem:[#allocation82_spill] sm:$0xff] }
 0x4d6   : > { %10067 = vst [vmem:[#allocation86_spill] sm:$0xff] %v8164_v18  ;;  %v1093_v33 = vpop.f32.mrb[8].mxu1  ;;  %v1512_v40 = vpop.f32.mrb[16].mxu0  ;;  %2966 = vrot.lane.b32.xlu1 %v2952_v13, %s5405_s4  ;;  %v3395_v18 = vsel %vm8158_vm0, 1, %v9588_v41  ;;  %v10071_v13 = vmov 0  ;;  %vm8208_vm0 = vcmp.lt.f32.partialorder %v4884_v25, 16.0 }
 0x4d7   : > { %4014 = vst [vmem:[%s7982_s15 + $0xc0] sm:$0xff] %v1093_v33  ;;  %4078 = vst [vmem:[%s7982_s15 + $0x100] sm:$0xff] %v1512_v40  ;;  %2968 = vrot.lane.b32.xlu0 %v2953_v37, %s5405_s4  ;;  %v1095_v8 = vpop.f32.mrb[9].mxu1  ;;  %v1514_v39 = vpop.f32.mrb[17].mxu0  ;;  %v10072_v13 = vsel %vm8182_vm3, 4294967295, %v10071_v13  ;;  %v10076_v33 = vmov 0 }
 0x4d8   : > { %4015 = vst [vmem:[%s7982_s15 + $0xc8] sm:$0xff] %v1095_v8  ;;  %4079 = vst [vmem:[%s7982_s15 + $0x108] sm:$0xff] %v1514_v39  ;;  %v10077_v33 = vsel %vm8190_vm14, 4294967295, %v10076_v33  ;;  %v4408_v25 = vmax.f32 %v8113_v15, 0.0  ;;  %v3435_v26 = vsel %vm8208_vm0, 1, %v9588_v41 }
 0x4d9   : > { %10073 = vst [vmem:[#allocation88_spill] sm:$0xff] %v10072_v13  ;;  %v8186_v40 = vpop.permute.xlu0 %2555  ;;  %v8188_v37 = vpop.permute.xlu1 %2517  ;;  %10078 = vst [vmem:[#allocation91_spill] sm:$0xff] %v10077_v33  ;;  %v10084_v13 = vmov 0  ;;  %v8221_v33 = vmin.f32 %v4336_v7, 15.0  ;;  %v3436_v7 = vsel %vm8216_vm12, 1, %v9588_v41 }
 0x4da   : > { %10074 = vst [vmem:[#allocation89_spill] sm:$0xff] %v8186_v40  ;;  %10075 = vst [vmem:[#allocation90_spill] sm:$0xff] %v8188_v37  ;;  %v1099_v8 = vpop.f32.mrb[10].mxu1  ;;  %v1518_v39 = vpop.f32.mrb[18].mxu0  ;;  %3409 = vrot.lane.b32.xlu1 %v3395_v18, %s5405_s4  ;;  %v4339_v37 = vmax.f32 %v8096_v30, 0.0  ;;  %v2993_v18 = vsel %vm8190_vm14, 1, %v9588_v41 }
 0x4db   : > { %4016 = vst [vmem:[%s7982_s15 + $0xd0] sm:$0xff] %v1099_v8  ;;  %4080 = vst [vmem:[%s7982_s15 + $0x110] sm:$0xff] %v1518_v39  ;;  %3411 = vrot.lane.b32.xlu0 %v3396_v11, %s5405_s4  ;;  %v1101_v50 = vpop.f32.mrb[11].mxu1  ;;  %v1520_v36 = vpop.f32.mrb[19].mxu0  ;;  %v10079_v8 = vmov 0  ;;  %v10085_v13 = vsel %vm8216_vm12, 4294967295, %v10084_v13 }
 0x4dc   : > { %4017 = vst [vmem:[%s7982_s15 + $0xd8] sm:$0xff] %v1101_v50  ;;  %4081 = vst [vmem:[%s7982_s15 + $0x118] sm:$0xff] %v1520_v36  ;;  %v10080_v8 = vsel %vm8208_vm0, 4294967295, %v10079_v8  ;;  %v8230_v40 = vmin.f32 %v4339_v37, 15.0  ;;  %v4874_v37 = vcvt.f32.s32 %v8221_v33  ;;  %vm2085_vm12 = vcmp.ne.s32.totalorder %v7336_v62, 0  ;;  %v10294_v33 = vld [vmem:[#allocation87_spill] sm:$0xff] }
 0x4dd   : > { %10081 = vst [vmem:[#allocation92_spill] sm:$0xff] %v10080_v8  ;;  %v8212_v11 = vpop.permute.xlu0 %2659  ;;  %v8214_v39 = vpop.permute.xlu1 %2557  ;;  %10086 = vst [vmem:[#allocation95_spill] sm:$0xff] %v10085_v13  ;;  %v8244_v8 = vmin.f32 %v4408_v25, 15.0  ;;  %vm2087_vm14 = vcmp.ne.s32.totalorder %v7349_v32, 0 }
 0x4de   : > { %10082 = vst [vmem:[#allocation93_spill] sm:$0xff] %v8212_v11  ;;  %10083 = vst [vmem:[#allocation94_spill] sm:$0xff] %v8214_v39  ;;  %v1105_v50 = vpop.f32.mrb[12].mxu1  ;;  %v1524_v36 = vpop.f32.mrb[20].mxu0  ;;  %3006 = vrot.lane.b32.xlu1 %v2992_v61, %s5405_s4  ;;  %v4411_v61 = vmax.f32 %v8121_v6, 0.0  ;;  %v4877_v13 = vcvt.f32.s32 %v8230_v40  ;;  %v10298_v40 = vld [vmem:[#allocation85_spill] sm:$0xff] }
 0x4df   : > { %4018 = vst [vmem:[%s7982_s15 + $0xe0] sm:$0xff] %v1105_v50  ;;  %4082 = vst [vmem:[%s7982_s15 + $0x120] sm:$0xff] %v1524_v36  ;;  %3008 = vrot.lane.b32.xlu0 %v2993_v18, %s5405_s4  ;;  %v1107_v11 = vpop.f32.mrb[13].mxu1  ;;  %v1526_v39 = vpop.f32.mrb[21].mxu0  ;;  %v4906_v62 = vcvt.f32.s32 %v8244_v8 }
 0x4e0   : > { %4019 = vst [vmem:[%s7982_s15 + $0xe8] sm:$0xff] %v1107_v11  ;;  %4083 = vst [vmem:[%s7982_s15 + $0x128] sm:$0xff] %v1526_v39 }
 0x4e1   : > { %v8238_v50 = vpop.permute.xlu0 %5170  ;;  %v8240_v18 = vpop.permute.xlu1 %2661  ;;  %vm2053_vm0 = vmand %vm7015_vm13, %vm7068_vm6  ;;  %v10143_v42 = vld [vmem:[#allocation89_spill] sm:$0xff] }
 0x4e2   : > { %10087 = vst [vmem:[#allocation96_spill] sm:$0xff] %v8238_v50  ;;  %v1111_v36 = vpop.f32.mrb[14].mxu1  ;;  %v1530_v60 = vpop.f32.mrb[22].mxu0  ;;  %3449 = vrot.lane.b32.xlu1 %v3435_v26, %s5405_s4  ;;  %v8250_v50 = vmin.f32 %v4411_v61, 15.0  ;;  %vm2055_vm3 = vmand %vm7029_vm10, %vm7079_vm15 }
 0x4e3   : > { %4020 = vst [vmem:[%s7982_s15 + $0xf0] sm:$0xff] %v1111_v36  ;;  %4084 = vst [vmem:[%s7982_s15 + $0x130] sm:$0xff] %v1530_v60  ;;  %3451 = vrot.lane.b32.xlu0 %v3436_v7, %s5405_s4  ;;  %v1113_v11 = vpop.f32.mrb[15].mxu1  ;;  %v1532_v39 = vpop.f32.mrb[23].mxu0 }
 0x4e4   : > { %4021 = vst [vmem:[%s7982_s15 + $0xf8] sm:$0xff] %v1113_v11  ;;  %4085 = vst [vmem:[%s7982_s15 + $0x138] sm:$0xff] %v1532_v39  ;;  %v4909_v36 = vcvt.f32.s32 %v8250_v50  ;;  %v5147_v39 = vunpack.i.h.bf16 %v7526_v48 }
 0x4e5   : > { %v8259_v60 = vpop.permute.xlu0 %2521  ;;  %v8261_v25 = vpop.permute.xlu1 %2519  ;;  %vm8272_vm13 = vmand %vm2053_vm0, %vm2085_vm12  ;;  %vm2084_vm12 = vcmp.ne.s32.totalorder %v7469_v1, 0  ;;  %v5146_v1 = vunpack.i.l.bf16 %v7526_v48  ;;  %vm10092_vm0 = vcmp.ne.s32.totalorder %v7397_v10, 0  ;;  %v5214_v48 = vpack.i.bf16 %v8096_v30, %v8089_v20 }
 0x4e6   : > { %v1536_v24 = vpop.f32.mrb[24].mxu0  ;;  %v1955_v52 = vpop.f32.mrb[16].mxu1  ;;  %3110 = vrot.lane.b32.xlu1 %v4874_v37, %s5407_s6  ;;  %vm8297_vm6 = vmand %vm2055_vm3, %vm2087_vm14  ;;  %vm2127_vm3 = vcmp.ne.s32.totalorder %v7413_v34, 0 }
 0x4e7   : > { %4086 = vst [vmem:[%s7982_s15 + $0x140] sm:$0xff] %v1536_v24  ;;  %4150 = vst [vmem:[%s7982_s15 + $0x180] sm:$0xff] %v1955_v52  ;;  %3112 = vrot.lane.b32.xlu0 %v4877_v13, %s5407_s6  ;;  %v1538_v61 = vpop.f32.mrb[25].mxu0  ;;  %v1957_v7 = vpop.f32.mrb[17].mxu1 }
 0x4e8   : > { %4087 = vst [vmem:[%s7982_s15 + $0x148] sm:$0xff] %v1538_v61  ;;  %4151 = vst [vmem:[%s7982_s15 + $0x188] sm:$0xff] %v1957_v7  ;;  %v5219_v61 = vpack.i.bf16 %v8121_v6, %v8113_v15  ;;  %v10098_v15 = vcvt.f32.s32 %v7572_v38  ;;  %v10101_v38 = vmov 0 }
 0x4e9   : > { %v8304_v24 = vpop.permute.xlu0 %2561  ;;  %v8306_v52 = vpop.permute.xlu1 %2559  ;;  %vm8312_vm10 = vmand %vm8272_vm13, %vm10092_vm0 }
 0x4ea   : > { %v1542_v4 = vpop.f32.mrb[26].mxu0  ;;  %v1961_v32 = vpop.f32.mrb[18].mxu1  ;;  %3553 = vrot.lane.b32.xlu1 %v4906_v62, %s5407_s6  ;;  %vm10095_vm15 = vmand %vm7118_vm9, %vm7174_vm11  ;;  %vm10096_vm9 = vnez %v9867_v35  ;;  %vm10097_vm11 = vnez %v9858_v49  ;;  %v2173_v54 = vsel %vm8312_vm10, %v5147_v39, 0.0  ;;  %v2647_v30 = vmul.u32 16, %v10098_v15 }
 0x4eb   : > { %vm2092_vm14 = vmand %vm10095_vm15, %vm2084_vm12  ;;  %4088 = vst [vmem:[%s7982_s15 + $0x150] sm:$0xff] %v1542_v4  ;;  %3555 = vrot.lane.b32.xlu0 %v4909_v36, %s5407_s6  ;;  %v1544_v10 = vpop.f32.mrb[27].mxu0  ;;  %v1963_v26 = vpop.f32.mrb[19].mxu1  ;;  %vm2086_vm12 = vcmp.ne.s32.totalorder %v7481_v17, 0  ;;  %vm10100_vm15 = vnez %v9829_v45  ;;  %v10108_v49 = vmov 0  ;;  %v10113_v17 = vcvt.f32.s32 %v7574_v28 }
 0x4ec   : > { %4152 = vst [vmem:[%s7982_s15 + $0x190] sm:$0xff] %v1961_v32  ;;  %vm2132_vm13 = vmand %vm2092_vm14, %vm2124_vm7  ;;  %vm10099_vm7 = vnez %v9847_v44  ;;  %v10114_v45 = vcvt.f32.s32 %v7628_v23  ;;  %v5151_v28 = vunpack.i.l.bf16 %v7460_v51 }
 0x4ed   : > { %4089 = vst [vmem:[%s7982_s15 + $0x158] sm:$0xff] %v1544_v10  ;;  %4153 = vst [vmem:[%s7982_s15 + $0x198] sm:$0xff] %v1963_v26  ;;  %v2172_v53 = vsel %vm2132_vm13, %v5146_v1, 0.0  ;;  %v8347_v57 = vpop.permute.xlu0 %2665  ;;  %v8349_v20 = vpop.permute.xlu1 %2663  ;;  %v2648_v11 = vmul.u32 16, %v10113_v17 }
 0x4ee   : > { %v1548_v6 = vpop.f32.mrb[28].mxu0  ;;  %v1967_v7 = vpop.f32.mrb[20].mxu1  ;;  %5215 = vrot.lane.b32.xlu1 %v5214_v48, %s5406_s5  ;;  %vm8362_vm10 = vmand %vm8297_vm6, %vm2127_vm3  ;;  %vm10105_vm6 = vnez %v9860_v22  ;;  %v5225_v34 = vpack.i.bf16 %v2173_v54, %v2172_v53  ;;  %v2650_v3 = vmul.u32 16, %v10114_v45  ;;  %v5152_v48 = vunpack.i.h.bf16 %v7460_v51  ;;  %v10154_v45 = vld [vmem:[#allocation23_spill] sm:$0xff] }
 0x4ef   : > { %v10102_v38 = vsel %vm8362_vm10, 4294967295, %v10101_v38  ;;  %4090 = vst [vmem:[%s7982_s15 + $0x160] sm:$0xff] %v1548_v6  ;;  %4154 = vst [vmem:[%s7982_s15 + $0x1a0] sm:$0xff] %v1967_v7  ;;  %5220 = vrot.lane.b32.xlu0 %v5219_v61, %s5406_s5  ;;  %v1550_v39 = vpop.f32.mrb[29].mxu0  ;;  %v1969_v1 = vpop.f32.mrb[21].mxu1  ;;  %vm10106_vm10 = vcmp.ne.s32.totalorder %v7365_v14, 0  ;;  %v2671_v14 = vadd.s32 %v8139_v63, %v2647_v30  ;;  %v2672_v10 = vadd.s32 %v8137_v55, %v2648_v11 }
 0x4f0   : > { %vm10103_vm13 = vmand %vm10097_vm11, %vm10096_vm9  ;;  %4091 = vst [vmem:[%s7982_s15 + $0x168] sm:$0xff] %v1550_v39  ;;  %vm10110_vm9 = vcmp.ne.s32.totalorder %v7511_v21, 0  ;;  %v2674_v26 = vadd.s32 %v8240_v18, %v2650_v3  ;;  %v10120_v51 = vcvt.f32.s32 %v7667_v12  ;;  %v10124_v12 = vld [vmem:[#allocation16_spill] sm:$0xff]  ;;  %v10126_v30 = vld [vmem:[#allocation39_spill] sm:$0xff]  ;;  %v10155_v3 = vcvt.f32.s32 %v10154_v45 }
 0x4f1   : > { %vm2094_vm14 = vmand %vm10103_vm13, %vm2086_vm12  ;;  %4155 = vst [vmem:[%s7982_s15 + $0x1a8] sm:$0xff] %v1969_v1  ;;  %v8404_v44 = vpop.permute.xlu0 %2523  ;;  %v8406_v4 = vpop.permute.xlu1 %5175  ;;  %vm10115_vm12 = vnez %v9921_v5  ;;  %v10131_v7 = vld [vmem:[#allocation81_spill] sm:$0xff]  ;;  %v10132_v39 = vld [vmem:[#allocation26_spill] sm:$0xff]  ;;  %vm10134_vm13 = vcmp.ne.s32.totalorder %v8086_v46, 0 }
 0x4f2   : > { %vm10107_vm2 = vmand %vm10100_vm15, %vm10099_vm7  ;;  %v1554_v21 = vpop.f32.mrb[30].mxu0  ;;  %v1973_v32 = vpop.f32.mrb[22].mxu1  ;;  %5226 = vperm.xlu1 %5224, %v5225_v34   ;;  %vm10116_vm15 = vnez %v9933_v47  ;;  %v2651_v61 = vmul.u32 16, %v10120_v51  ;;  %vm2568_vm7 = vcmp.ne.s32.totalorder %v10131_v7, 0  ;;  %vm2129_vm0 = vcmp.ne.s32.totalorder %v10132_v39, 0  ;;  %v10176_v39 = vld [vmem:[#allocation20_spill] sm:$0xff] }
 0x4f3   : > { %vm8389_vm4 = vmand %vm10107_vm2, %vm10106_vm10  ;;  %4092 = vst [vmem:[%s7982_s15 + $0x170] sm:$0xff] %v1554_v21  ;;  %2680 = vperm.xlu0 %5132, %v2671_v14   ;;  %v1556_v23 = vpop.f32.mrb[31].mxu0  ;;  %v1975_v63 = vpop.f32.mrb[23].mxu1  ;;  %vm10122_vm10 = vnez %v9941_v19  ;;  %v2649_v22 = vmul.u32 16, %v10155_v3  ;;  %v5156_v56 = vunpack.i.l.bf16 %v10176_v39  ;;  %v10184_v47 = vld [vmem:[#allocation25_spill] sm:$0xff]  ;;  %v10187_v45 = vld [vmem:[#allocation7_spill] sm:$0xff] }
 0x4f4   : > { %v10109_v49 = vsel %vm8389_vm4, 4294967295, %v10108_v49  ;;  %vm8395_vm11 = vmand %vm2094_vm14, %vm10110_vm9  ;;  %4156 = vst [vmem:[%s7982_s15 + $0x1b0] sm:$0xff] %v1973_v32  ;;  %vm10117_vm14 = vnez %v9929_v43  ;;  %vm10127_vm4 = vcmp.ne.s32.totalorder %v8084_v31, 0  ;;  %vm10133_vm9 = vnez %v10102_v38  ;;  %v10182_v43 = vld [vmem:[#allocation5_spill] sm:$0xff]  ;;  %v10189_v3 = vld [vmem:[#allocation50_spill] sm:$0xff] }
 0x4f5   : > { %4093 = vst [vmem:[%s7982_s15 + $0x178] sm:$0xff] %v1556_v23  ;;  %4157 = vst [vmem:[%s7982_s15 + $0x1b8] sm:$0xff] %v1975_v63  ;;  %v8435_v53 = vpop.permute.xlu0 %2563  ;;  %v8437_v54 = vpop.permute.xlu1 %2525  ;;  %v2174_v18 = vsel %vm8395_vm11, %v5151_v28, 0.0  ;;  %v2175_v1 = vsel %vm10133_vm9, %v5152_v48, 0.0  ;;  %v2675_v31 = vadd.s32 %v8349_v20, %v2651_v61  ;;  %v10144_v20 = vld [vmem:[#allocation30_spill] sm:$0xff]  ;;  %vm10147_vm9 = vnez %v9869_v2  ;;  %v10166_v48 = vld [vmem:[#allocation96_spill] sm:$0xff] }
 0x4f6   : > { %v1979_v55 = vpop.f32.mrb[24].mxu1  ;;  %5230 = vset.pattern.permute.xlu1 %v9618_v59  ;;  %vm10128_vm11 = vmand %vm7551_vm1, %vm7565_vm8  ;;  %v5232_v35 = vpack.i.bf16 %v2175_v1, %v2174_v18  ;;  %vm10139_vm8 = vcmp.ne.s32.totalorder %v8162_v27, 0  ;;  %v10145_v17 = vcvt.f32.s32 %v10144_v20  ;;  %v10153_v27 = vld [vmem:[#allocation86_spill] sm:$0xff]  ;;  %v5157_v1 = vunpack.i.h.bf16 %v10176_v39  ;;  %v10191_v21 = vld [vmem:[#allocation17_spill] sm:$0xff] }
 0x4f7   : > { %4158 = vst [vmem:[%s7982_s15 + $0x1c0] sm:$0xff] %v1979_v55  ;;  %2689 = vperm.xlu0 %5132, %v2674_v26   ;;  %v1981_v15 = vpop.f32.mrb[25].mxu1  ;;  %2683 = vperm.xlu1 %5230, %v2672_v10   ;;  %vm8461_vm2 = vmand %vm10128_vm11, %vm10127_vm4  ;;  %v5168_v14 = vunpack.i.h.bf16 %v10153_v27  ;;  %v5167_v28 = vunpack.i.l.bf16 %v10153_v27  ;;  %v10162_v23 = vld [vmem:[#allocation90_spill] sm:$0xff]  ;;  %v5173_v10 = vunpack.i.h.bf16 %v10166_v48  ;;  %v5172_v26 = vunpack.i.l.bf16 %v10166_v48 }
 0x4f8   : > { %4159 = vst [vmem:[%s7982_s15 + $0x1c8] sm:$0xff] %v1981_v15  ;;  %vm10135_vm3 = vmand %vm10115_vm12, %vm7561_vm5  ;;  %vm2569_vm12 = vcmp.ne.s32.totalorder %v10143_v42, 0  ;;  %v2654_v11 = vmul.u32 16, %v10145_v17  ;;  %v10165_v63 = vld [vmem:[#allocation94_spill] sm:$0xff]  ;;  %v10192_v32 = vcvt.f32.s32 %v10191_v21  ;;  %v10227_v21 = vld [vmem:[#allocation36_spill] sm:$0xff] }
 0x4f9   : > { %vm8477_vm4 = vmand %vm10135_vm3, %vm10134_vm13  ;;  %v8483_v34 = vpop.permute.xlu0 %2667  ;;  %v8485_v38 = vpop.permute.xlu1 %2565  ;;  %vm10146_vm13 = vcmp.ne.s32.totalorder %v10126_v30, 0  ;;  %v10171_v30 = vld [vmem:[#allocation40_spill] sm:$0xff]  ;;  %v10194_v48 = vld [vmem:[#allocation38_spill] sm:$0xff] }
 0x4fa   : > { %vm10140_vm5 = vmand %vm10117_vm14, %vm10116_vm15  ;;  %v1985_v46 = vpop.f32.mrb[26].mxu1  ;;  %vm2532_vm14 = vcmp.ne.s32.totalorder %v8259_v60, 0 }
 0x4fb   : > { %vm8494_vm3 = vmand %vm10140_vm5, %vm10139_vm8  ;;  %4160 = vst [vmem:[%s7982_s15 + $0x1d0] sm:$0xff] %v1985_v46  ;;  %2692 = vperm.xlu0 %5132, %v2675_v31   ;;  %v1987_v2 = vpop.f32.mrb[27].mxu1  ;;  %5231 = vset.pattern.permute.xlu1 %v9588_v41  ;;  %vm2530_vm5 = vcmp.ne.s32.totalorder %v10162_v23, 0 }
 0x4fc   : > { %vm10148_vm11 = vmand %vm10105_vm6, %vm10147_vm9  ;;  %vm10156_vm6 = vnez %v10109_v49  ;;  %4161 = vst [vmem:[%s7982_s15 + $0x1d8] sm:$0xff] %v1987_v2  ;;  %5233 = vperm.xlu1 %5231, %v5232_v35   ;;  %v10190_v2 = vld [vmem:[#allocation41_spill] sm:$0xff] }
 0x4fd   : > { %vm8508_vm1 = vmand %vm10148_vm11, %vm10146_vm13  ;;  %v8556_v51 = vpop.permute.xlu0 %5180  ;;  %v2670_v61 = vpop.permute.xlu1 %2669  ;;  %vm10167_vm13 = vnez %v9945_v9  ;;  %vm2128_vm11 = vcmp.ne.s32.totalorder %v10171_v30, 0  ;;  %v10175_v9 = vld [vmem:[#allocation93_spill] sm:$0xff] }
 0x4fe   : > { %vm8516_vm15 = vmand %vm8461_vm2, %vm2568_vm7  ;;  %vm10159_vm7 = vcmp.ne.s32.totalorder %v10138_v29, 0  ;;  %v2678_v18 = vadd.s32 %v2670_v61, %v2654_v11  ;;  %v1991_v15 = vpop.f32.mrb[28].mxu1  ;;  %v2673_v19 = vadd.s32 %v10175_v9, %v2649_v22  ;;  %v10180_v11 = vld [vmem:[#allocation6_spill] sm:$0xff] }
 0x4ff   : > { %vm8530_vm2 = vmand %vm10156_vm6, %vm2129_vm0  ;;  %v2616_v6 = vsel %vm8516_vm15, %v5168_v14, 0.0  ;;  %vm10172_vm6 = vnez %v9931_v0  ;;  %4162 = vst [vmem:[%s7982_s15 + $0x1e0] sm:$0xff] %v1991_v15  ;;  %v1993_v60 = vpop.f32.mrb[29].mxu1  ;;  %v5178_v0 = vunpack.i.h.bf16 %v8406_v4  ;;  %v10185_v14 = vld [vmem:[#allocation28_spill] sm:$0xff] }
 0x500   : > { %vm8538_vm8 = vmand %vm8477_vm4, %vm10159_vm7  ;;  %vm2570_vm4 = vcmp.ne.s32.totalorder %v10165_v63, 0  ;;  %4163 = vst [vmem:[%s7982_s15 + $0x1e8] sm:$0xff] %v1993_v60  ;;  %2701 = vperm.xlu0 %5132, %v2678_v18   ;;  %5237 = vset.pattern.permute.xlu1 %v9618_v59  ;;  %v10193_v63 = vld [vmem:[#allocation27_spill] sm:$0xff]  ;;  %v10195_v15 = vld [vmem:[#allocation44_spill] sm:$0xff] }
 0x501   : > { %vm8549_vm0 = vmand %vm8494_vm3, %vm2569_vm12  ;;  %vm2572_vm12 = vcmp.ne.s32.totalorder %v8304_v24, 0  ;;  %v2615_v7 = vsel %vm8538_vm8, %v5167_v28, 0.0  ;;  %v8602_v35 = vpop.permute.xlu1 %2954  ;;  %2686 = vperm.xlu1 %5237, %v2673_v19   ;;  %v2652_v28 = vmul.u32 16, %v10192_v32  ;;  %v10196_v30 = vcvt.f32.s32 %v10195_v15  ;;  %v10197_v19 = vld [vmem:[#allocation18_spill] sm:$0xff]  ;;  %v10199_v60 = vld [vmem:[#allocation21_spill] sm:$0xff] }
 0x502   : > { %vm10168_vm9 = vmand %vm10122_vm10, %vm10167_vm13  ;;  %vm10173_vm10 = vnez %v9936_v58  ;;  %vm2531_vm13 = vcmp.ne.s32.totalorder %v8261_v25, 0  ;;  %v5177_v58 = vunpack.i.l.bf16 %v8406_v4  ;;  %v2617_v29 = vsel %vm8549_vm0, %v5172_v26, 0.0  ;;  %v8600_v4 = vpop.permute.xlu0 %2956  ;;  %v1997_v5 = vpop.f32.mrb[30].mxu1  ;;  %v10229_v32 = vld [vmem:[#allocation29_spill] sm:$0xff] }
 0x503   : > { %vm8565_vm3 = vmand %vm10168_vm9, %vm2532_vm14  ;;  %vm2571_vm9 = vcmp.ne.s32.totalorder %v8306_v52, 0  ;;  %v5258_v42 = vpack.i.bf16 %v2616_v6, %v2615_v7  ;;  %4164 = vst [vmem:[%s7982_s15 + $0x1f0] sm:$0xff] %v1997_v5  ;;  %v1999_v24 = vpop.f32.mrb[31].mxu1  ;;  %v5162_v26 = vunpack.i.h.bf16 %v10194_v48  ;;  %v2676_v61 = vadd.s32 %v8347_v57, %v2652_v28  ;;  %v10203_v57 = vld [vmem:[#allocation22_spill] sm:$0xff] }
 0x504   : > { %vm10174_vm14 = vmand %vm10172_vm6, %vm10173_vm10  ;;  %4165 = vst [vmem:[%s7982_s15 + $0x1f8] sm:$0xff] %v1999_v24  ;;  %5257 = vset.pattern.permute.xlu0 %v9588_v41  ;;  %v3091_v6 = vmul.u32 16, %v10196_v30  ;;  %v10231_v28 = vld [vmem:[#allocation42_spill] sm:$0xff] }
 0x505   : > { %vm2538_vm7 = vmand %vm10174_vm14, %vm2530_vm5  ;;  %vm10177_vm5 = vnez %v10124_v12  ;;  %v2177_v12 = vsel %vm8530_vm2, %v5157_v1, 0.0  ;;  %v8622_v52 = vpop.permute.xlu1 %3397  ;;  %5259 = vperm.xlu0 %5257, %v5258_v42   ;;  %5238 = vset.pattern.permute.xlu1 %v9588_v41  ;;  %vm2091_vm14 = vcmp.ne.s32.totalorder %v10184_v47, 0 }
 0x506   : > { %vm2578_vm15 = vmand %vm2538_vm7, %vm2570_vm4  ;;  %vm10178_vm4 = vnez %v9943_v16  ;;  %v3400_v17 = vpop.permute.xlu0 %3399  ;;  %vm10186_vm7 = vnez %v10185_v14 }
 0x507   : > { %v2618_v31 = vsel %vm2578_vm15, %v5173_v10, 0.0  ;;  %vm2580_vm8 = vmand %vm8565_vm3, %vm2572_vm12  ;;  %vm10181_vm12 = vnez %v10180_v11  ;;  %vm2090_vm15 = vcmp.ne.s32.totalorder %v10189_v3, 0  ;;  %v5161_v10 = vunpack.i.l.bf16 %v10194_v48 }
 0x508   : > { %vm10179_vm6 = vmand %vm10177_vm5, %vm10178_vm4  ;;  %v5239_v46 = vpack.i.bf16 %v2618_v31, %v2617_v29  ;;  %v2620_v25 = vsel %vm2580_vm8, %v5178_v0, 0.0  ;;  %vm2131_vm5 = vcmp.ne.s32.totalorder %v10193_v63, 0  ;;  %v10201_v0 = vld [vmem:[#allocation34_spill] sm:$0xff]  ;;  %v10205_v29 = vld [vmem:[#allocation48_spill] sm:$0xff]  ;;  %v5182_v11 = vunpack.i.l.bf16 %v8556_v51 }
 0x509   : > { %vm2539_vm0 = vmand %vm10179_vm6, %vm2531_vm13  ;;  %vm10188_vm13 = vnez %v10187_v45  ;;  %v8640_v49 = vpop.permute.xlu1 %2994  ;;  %v10206_v31 = vcvt.f32.s32 %v10205_v29  ;;  %v10232_v63 = vcvt.f32.s32 %v10231_v28 }
 0x50a   : > { %vm2579_vm10 = vmand %vm2539_vm0, %vm2571_vm9  ;;  %5240 = vperm.xlu1 %5238, %v5239_v46   ;;  %vm2130_vm9 = vcmp.ne.s32.totalorder %v10190_v2, 0  ;;  %v8638_v23 = vpop.permute.xlu0 %2996  ;;  %v10209_v46 = vld [vmem:[#allocation33_spill] sm:$0xff] }
 0x50b   : > { %vm2136_vm3 = vmand %vm8508_vm1, %vm2128_vm11  ;;  %v2619_v20 = vsel %vm2579_vm10, %v5177_v58, 0.0  ;;  %vm10183_vm1 = vnez %v10182_v43  ;;  %vm10198_vm10 = vnez %v10197_v19  ;;  %v3533_v5 = vmul.u32 16, %v10206_v31  ;;  %v10240_v31 = vld [vmem:[#allocation54_spill] sm:$0xff] }
 0x50c   : > { %v2176_v16 = vsel %vm2136_vm3, %v5156_v56, 0.0  ;;  %vm2059_vm11 = vmand %vm10183_vm1, %vm10181_vm12  ;;  %v5263_v27 = vpack.i.bf16 %v2620_v25, %v2619_v20  ;;  %vm10200_vm3 = vnez %v10199_v60  ;;  %vm2533_vm1 = vcmp.ne.s32.totalorder %v8404_v44, 0  ;;  %v10207_v44 = vld [vmem:[#allocation19_spill] sm:$0xff]  ;;  %v10236_v60 = vld [vmem:[#allocation45_spill] sm:$0xff] }
 0x50d   : > { %vm2058_vm2 = vmand %vm10188_vm13, %vm10186_vm7  ;;  %v5244_v22 = vpack.i.bf16 %v2177_v12, %v2176_v16  ;;  %v3438_v18 = vpop.permute.xlu1 %3437  ;;  %v10208_v42 = vcvt.f32.s32 %v10207_v44  ;;  %v10211_v25 = vld [vmem:[#allocation35_spill] sm:$0xff]  ;;  %v10215_v16 = vld [vmem:[#allocation32_spill] sm:$0xff]  ;;  %v3090_v48 = vmul.u32 16, %v10232_v63 }
 0x50e   : > { %5264 = vperm.xlu0 %5257, %v5263_v27   ;;  %vm2099_vm8 = vmand %vm2059_vm11, %vm2091_vm14  ;;  %v3440_v55 = vpop.permute.xlu0 %3439  ;;  %vm10204_vm14 = vnez %v10203_v57  ;;  %v10213_v20 = vld [vmem:[#allocation43_spill] sm:$0xff]  ;;  %vm2574_vm11 = vcmp.ne.s32.totalorder %v8485_v38, 0  ;;  %v10244_v44 = vld [vmem:[#allocation58_spill] sm:$0xff] }
 0x50f   : > { %5245 = vperm.xlu1 %5238, %v5244_v22   ;;  %vm2098_vm4 = vmand %vm2058_vm2, %vm2090_vm15  ;;  %vm2573_vm2 = vcmp.ne.s32.totalorder %v8435_v53, 0  ;;  %vm2534_vm15 = vcmp.ne.s32.totalorder %v8437_v54, 0  ;;  %v2653_v24 = vmul.u32 16, %v10208_v42  ;;  %v10217_v53 = vld [vmem:[#allocation47_spill] sm:$0xff]  ;;  %v5183_v54 = vunpack.i.h.bf16 %v8556_v51 }
 0x510   : > { %vm2138_vm6 = vmand %vm2098_vm4, %vm2130_vm9  ;;  %vm10214_vm4 = vnez %v10213_v20  ;;  %v10219_v12 = vld [vmem:[#allocation31_spill] sm:$0xff]  ;;  %v10245_v42 = vcvt.f32.s32 %v10244_v44  ;;  %v10246_v20 = vld [vmem:[#allocation53_spill] sm:$0xff] }
 0x511   : > { %vm2139_vm0 = vmand %vm2099_vm8, %vm2131_vm5  ;;  %v2178_v9 = vsel %vm2138_vm6, %v5161_v10, 0.0  ;;  %v3099_v39 = vpop.permute.xlu1 %3098  ;;  %vm10216_vm6 = vnez %v10215_v16  ;;  %vm10221_vm5 = vnez %v10201_v0  ;;  %vm3413_vm8 = vcmp.ne.s32.totalorder %v8622_v52, 0  ;;  %v10248_v16 = vld [vmem:[#allocation49_spill] sm:$0xff] }
 0x512   : > { %vm2501_vm12 = vmand %vm10200_vm3, %vm10198_vm10  ;;  %v2179_v7 = vsel %vm2139_vm0, %v5162_v26, 0.0  ;;  %v3101_v58 = vpop.permute.xlu0 %3100  ;;  %vm3414_vm10 = vcmp.ne.s32.totalorder %v3400_v17, 0  ;;  %v2677_v27 = vadd.s32 %v8483_v34, %v2653_v24  ;;  %v3093_v24 = vmul.u32 16, %v10245_v42  ;;  %v10274_v42 = vld [vmem:[#allocation74_spill] sm:$0xff] }
 0x513   : > { %5249 = vset.pattern.permute.xlu1 %v9618_v59  ;;  %v5251_v1 = vpack.i.bf16 %v2179_v7, %v2178_v9  ;;  %vm2541_vm13 = vmand %vm2501_vm12, %vm2533_vm1  ;;  %v8659_v56 = vadd.s32 %v3101_v58, %v3091_v6  ;;  %vm3454_vm1 = vcmp.ne.s32.totalorder %v3440_v55, 0  ;;  %vm3453_vm12 = vcmp.ne.s32.totalorder %v3438_v18, 0  ;;  %v10238_v58 = vld [vmem:[#allocation57_spill] sm:$0xff] }
 0x514   : > { %2695 = vperm.xlu1 %5249, %v2676_v61   ;;  %vm2581_vm7 = vmand %vm2541_vm13, %vm2573_vm2  ;;  %v3114_v55 = vadd.s32 %v3099_v39, %v3090_v48  ;;  %v10237_v7 = vcvt.f32.s32 %v10236_v60  ;;  %v10239_v39 = vcvt.f32.s32 %v10238_v58 }
 0x515   : > { %v3542_v47 = vpop.permute.xlu1 %3541  ;;  %vm10222_vm0 = vmand %vm10204_vm14, %vm10221_vm5  ;;  %v2621_v38 = vsel %vm2581_vm7, %v5182_v11, 0.0  ;;  %vm10224_vm14 = vnez %v10219_v12  ;;  %vm10228_vm7 = vnez %v10227_v21  ;;  %v10250_v12 = vld [vmem:[#allocation60_spill] sm:$0xff] }
 0x516   : > { %v3544_v43 = vpop.permute.xlu0 %3543  ;;  %vm2542_vm9 = vmand %vm10222_vm0, %vm2534_vm15  ;;  %v8688_v17 = vadd.s32 %v3542_v47, %v3533_v5  ;;  %vm10225_vm15 = vnez %v10217_v53  ;;  %v10242_v5 = vld [vmem:[#allocation46_spill] sm:$0xff]  ;;  %v10254_v47 = vld [vmem:[#allocation52_spill] sm:$0xff] }
 0x517   : > { %vm10223_vm13 = vmand %vm10216_vm6, %vm10214_vm4  ;;  %vm2971_vm6 = vcmp.ne.s32.totalorder %v8600_v4, 0 }
 0x518   : > { %5250 = vset.pattern.permute.xlu1 %v9588_v41  ;;  %vm3422_vm2 = vmand %vm10223_vm13, %vm3414_vm10 }
 0x519   : > { %5252 = vperm.xlu1 %5250, %v5251_v1   ;;  %vm2582_vm3 = vmand %vm2542_vm9, %vm2574_vm11  ;;  %v5186_v52 = vpop.permute.xlu1 %5185  ;;  %vm10230_vm9 = vnez %v10229_v32  ;;  %v3092_v1 = vmul.u32 16, %v10239_v39  ;;  %v10266_v39 = vld [vmem:[#allocation70_spill] sm:$0xff] }
 0x51a   : > { %v2622_v51 = vsel %vm2582_vm3, %v5183_v54, 0.0  ;;  %vm10226_vm5 = vmand %vm10224_vm14, %vm10225_vm15  ;;  %v5191_v34 = vpop.permute.xlu0 %5190  ;;  %vm2970_vm3 = vcmp.ne.s32.totalorder %v8602_v35, 0  ;;  %vm3010_vm14 = vcmp.ne.s32.totalorder %v8640_v49, 0  ;;  %v5188_v4 = vunpack.i.h.bf16 %v5186_v52 }
 0x51b   : > { %vm3421_vm0 = vmand %vm10226_vm5, %vm3413_vm8  ;;  %v5193_v14 = vunpack.i.h.bf16 %v5191_v34  ;;  %v5192_v45 = vunpack.i.l.bf16 %v5191_v34  ;;  %v5269_v3 = vpack.i.bf16 %v2622_v51, %v2621_v38  ;;  %vm10233_vm8 = vnez %v10211_v25  ;;  %v10258_v38 = vld [vmem:[#allocation51_spill] sm:$0xff] }
 0x51c   : > { %vm3462_vm4 = vmand %vm3422_vm2, %vm3454_vm1  ;;  %vm3011_vm2 = vcmp.ne.s32.totalorder %v8638_v23, 0  ;;  %v5187_v35 = vunpack.i.l.bf16 %v5186_v52  ;;  %v3534_v49 = vmul.u32 16, %v10237_v7  ;;  %v10251_v54 = vcvt.f32.s32 %v10250_v12 }
 0x51d   : > { %5256 = vset.pattern.permute.xlu1 %v9618_v59  ;;  %vm3461_vm11 = vmand %vm3421_vm0, %vm3453_vm12  ;;  %v3502_v22 = vsel %vm3462_vm4, %v5193_v14, 0.0  ;;  %v2959_v61 = vpop.permute.xlu1 %2958  ;;  %vm10234_vm12 = vnez %v10209_v46  ;;  %vm10241_vm4 = vnez %v10240_v31  ;;  %v10272_v31 = vld [vmem:[#allocation61_spill] sm:$0xff] }
 0x51e   : > { %2698 = vperm.xlu1 %5256, %v2677_v27   ;;  %v3501_v2 = vsel %vm3461_vm11, %v5192_v45, 0.0  ;;  %vm2938_vm10 = vmand %vm10230_vm9, %vm10228_vm7  ;;  %v2961_v26 = vpop.permute.xlu0 %2960  ;;  %v3558_v29 = vadd.s32 %v3544_v43, %v3534_v49  ;;  %vm10247_vm9 = vnez %v10246_v20  ;;  %v3536_v11 = vmul.u32 16, %v10251_v54  ;;  %v10252_v43 = vld [vmem:[#allocation56_spill] sm:$0xff]  ;;  %v10256_v27 = vld [vmem:[#allocation55_spill] sm:$0xff] }
 0x51f   : > { %v5282_v10 = vpack.i.bf16 %v3502_v22, %v3501_v2  ;;  %vm10235_vm1 = vmand %vm10233_vm8, %vm10234_vm12  ;;  %vm2973_vm7 = vcmp.ne.s32.totalorder %v2961_v26, 0  ;;  %vm2972_vm8 = vcmp.ne.s32.totalorder %v2959_v61, 0  ;;  %vm10253_vm12 = vnez %v10252_v43  ;;  %v10280_v20 = vld [vmem:[#allocation64_spill] sm:$0xff] }
 0x520   : > { %vm2979_vm13 = vmand %vm10235_vm1, %vm2971_vm6  ;;  %vm10243_vm6 = vnez %v10242_v5  ;;  %vm10255_vm1 = vnez %v10254_v47 }
 0x521   : > { %5283 = vperm.xlu0 %5257, %v5282_v10   ;;  %vm2978_vm15 = vmand %vm2938_vm10, %vm2970_vm3  ;;  %v3402_v15 = vpop.permute.xlu1 %3401  ;;  %vm10249_vm10 = vnez %v10248_v16 }
 0x522   : > { %5268 = vset.pattern.permute.xlu1 %v9588_v41  ;;  %vm3019_vm5 = vmand %vm2979_vm13, %vm3011_vm2  ;;  %v3404_v18 = vpop.permute.xlu0 %3403 }
 0x523   : > { %5270 = vperm.xlu1 %5268, %v5269_v3   ;;  %vm3018_vm0 = vmand %vm2978_vm15, %vm3010_vm14  ;;  %v3059_v30 = vsel %vm3019_vm5, %v5188_v4, 0.0  ;;  %vm3416_vm2 = vcmp.ne.s32.totalorder %v3404_v18, 0  ;;  %vm10257_vm14 = vnez %v10256_v27  ;;  %vm10259_vm15 = vnez %v10258_v38  ;;  %v10262_v3 = vld [vmem:[#allocation59_spill] sm:$0xff]  ;;  %v10282_v38 = vld [vmem:[#allocation80_spill] sm:$0xff] }
 0x524   : > { %v3058_v6 = vsel %vm3018_vm0, %v5187_v35, 0.0  ;;  %vm2941_vm11 = vmand %vm10243_vm6, %vm10241_vm4  ;;  %vm3415_vm4 = vcmp.ne.s32.totalorder %v3402_v15, 0  ;;  %v10263_v22 = vcvt.f32.s32 %v10262_v3 }
 0x525   : > { %v2999_v19 = vpop.permute.xlu1 %2998  ;;  %v5276_v23 = vpack.i.bf16 %v3059_v30, %v3058_v6  ;;  %vm2940_vm3 = vmand %vm10249_vm10, %vm10247_vm9 }
 0x526   : > { %v3001_v9 = vpop.permute.xlu0 %3000  ;;  %vm3384_vm13 = vmand %vm10255_vm1, %vm10253_vm12  ;;  %vm3012_vm12 = vcmp.ne.s32.totalorder %v2999_v19, 0  ;;  %v3535_v2 = vmul.u32 16, %v10263_v22 }
 0x527   : > { %5274 = vset.pattern.permute.xlu1 %v9618_v59  ;;  %vm3383_vm5 = vmand %vm10259_vm15, %vm10257_vm14  ;;  %vm3013_vm9 = vcmp.ne.s32.totalorder %v3001_v9, 0 }
 0x528   : > { %3123 = vperm.xlu1 %5274, %v3114_v55   ;;  %vm2981_vm0 = vmand %vm2941_vm11, %vm2973_vm7 }
 0x529   : > { %v3442_v57 = vpop.permute.xlu1 %3441  ;;  %vm2980_vm6 = vmand %vm2940_vm3, %vm2972_vm8 }
 0x52a   : > { %v3444_v0 = vpop.permute.xlu0 %3443  ;;  %vm8747_vm10 = vmand %vm3384_vm13, %vm3416_vm2  ;;  %vm3455_vm7 = vcmp.ne.s32.totalorder %v3442_v57, 0  ;;  %vm10267_vm13 = vnez %v10266_v39 }
 0x52b   : > { %vm3423_vm1 = vmand %vm3383_vm5, %vm3415_vm4  ;;  %vm3456_vm14 = vcmp.ne.s32.totalorder %v3444_v0, 0  ;;  %v10264_v0 = vld [vmem:[#allocation75_spill] sm:$0xff] }
 0x52c   : > { %5275 = vset.pattern.permute.xlu1 %v9588_v41  ;;  %vm3021_vm11 = vmand %vm2981_vm0, %vm3013_vm9  ;;  %v10265_v57 = vcvt.f32.s32 %v10264_v0  ;;  %v3539_v0 = vmul.u32 16, %v4906_v62 }
 0x52d   : > { %5277 = vperm.xlu1 %5275, %v5276_v23   ;;  %v3103_v25 = vpop.permute.xlu1 %3102  ;;  %vm3020_vm15 = vmand %vm2980_vm6, %vm3012_vm12  ;;  %vm10273_vm6 = vnez %v10272_v31  ;;  %vm10275_vm12 = vnez %v10274_v42 }
 0x52e   : > { %v3105_v46 = vpop.permute.xlu0 %3104  ;;  %v3116_v53 = vadd.s32 %v3103_v25, %v3092_v1  ;;  %vm3464_vm3 = vmand %vm8747_vm10, %vm3456_vm14  ;;  %v3094_v58 = vmul.u32 16, %v10265_v57  ;;  %v10268_v1 = vld [vmem:[#allocation62_spill] sm:$0xff]  ;;  %v10278_v25 = vld [vmem:[#allocation71_spill] sm:$0xff] }
 0x52f   : > { %v3117_v51 = vadd.s32 %v3105_v46, %v3093_v24  ;;  %vm3463_vm8 = vmand %vm3423_vm1, %vm3455_vm7  ;;  %vm10269_vm2 = vnez %v10268_v1  ;;  %v10276_v24 = vld [vmem:[#allocation66_spill] sm:$0xff]  ;;  %vm10279_vm7 = vnez %v10278_v25 }
 0x530   : > { %vm2943_vm5 = vmand %vm10269_vm2, %vm10267_vm13  ;;  %vm10277_vm1 = vnez %v10276_v24 }
 0x531   : > { %5281 = vset.pattern.permute.xlu1 %v9618_v59  ;;  %v3546_v52 = vpop.permute.xlu1 %3545  ;;  %vm3386_vm14 = vmand %vm10277_vm1, %vm10275_vm12 }
 0x532   : > { %3569 = vperm.xlu1 %5281, %v3558_v29   ;;  %v3548_v34 = vpop.permute.xlu0 %3547  ;;  %v3559_v26 = vadd.s32 %v3546_v52, %v3535_v2  ;;  %v10270_v29 = vld [vmem:[#allocation67_spill] sm:$0xff] }
 0x533   : > { %v8745_v14 = vadd.s32 %v3548_v34, %v3536_v11  ;;  %vm10271_vm4 = vnez %v10270_v29 }
 0x534   : > { %vm2942_vm9 = vmand %vm10273_vm6, %vm10271_vm4 }
 0x535   : > { %v5196_v32 = vpop.permute.xlu1 %5195 }
 0x536   : > { %3129 = vperm.xlu1 %5281, %v3116_v53   ;;  %v5201_v21 = vpop.permute.xlu0 %5200  ;;  %v5198_v48 = vunpack.i.h.bf16 %v5196_v32  ;;  %v5197_v10 = vunpack.i.l.bf16 %v5196_v32 }
 0x537   : > { %v5203_v28 = vunpack.i.h.bf16 %v5201_v21  ;;  %v5202_v63 = vunpack.i.l.bf16 %v5201_v21 }
 0x538   : > { %v3061_v61 = vsel %vm3021_vm11, %v5198_v48, 0.0  ;;  %v3060_v4 = vsel %vm3020_vm15, %v5197_v10, 0.0  ;;  %vm10281_vm15 = vnez %v10280_v20 }
 0x539   : > { %v3504_v35 = vsel %vm3464_vm3, %v5203_v28, 0.0  ;;  %v3503_v55 = vsel %vm3463_vm8, %v5202_v63, 0.0  ;;  %v5287_v18 = vpack.i.bf16 %v3061_v61, %v3060_v4  ;;  %v2963_v30 = vpop.permute.xlu1 %2962  ;;  %vm3385_vm3 = vmand %vm10281_vm15, %vm10279_vm7 }
 0x53a   : > { %3132 = vperm.xlu1 %5281, %v3117_v51   ;;  %v2965_v15 = vpop.permute.xlu0 %2964  ;;  %v5293_v6 = vpack.i.bf16 %v3504_v35, %v3503_v55  ;;  %vm2974_vm10 = vcmp.ne.s32.totalorder %v2963_v30, 0  ;;  %v10283_v51 = vcvt.f32.s32 %v10282_v38  ;;  %v3096_v55 = vmul.u32 16, %v4874_v37  ;;  %v10303_v38 = vld [vmem:[#allocation24_spill] sm:$0xff] }
 0x53b   : > { %5288 = vperm.xlu0 %5257, %v5287_v18   ;;  %vm2975_vm0 = vcmp.ne.s32.totalorder %v2965_v15, 0  ;;  %vm2982_vm2 = vmand %vm2942_vm9, %vm2974_vm10  ;;  %v10284_v18 = vld [vmem:[#allocation91_spill] sm:$0xff]  ;;  %v10286_v15 = vld [vmem:[#allocation84_spill] sm:$0xff]  ;;  %v3097_v30 = vmul.u32 16, %v4877_v13 }
 0x53c   : > { %vm2983_vm8 = vmand %vm2943_vm5, %vm2975_vm0  ;;  %v3538_v34 = vmul.u32 16, %v10283_v51 }
 0x53d   : > { %v3406_v19 = vpop.permute.xlu1 %3405 }
 0x53e   : > { %3572 = vperm.xlu1 %5281, %v3559_v26   ;;  %v3408_v9 = vpop.permute.xlu0 %3407  ;;  %vm3417_vm13 = vcmp.ne.s32.totalorder %v3406_v19, 0 }
 0x53f   : > { %vm3418_vm11 = vcmp.ne.s32.totalorder %v3408_v9, 0  ;;  %vm3425_vm12 = vmand %vm3385_vm3, %vm3417_vm13  ;;  %v10290_v9 = vld [vmem:[#allocation83_spill] sm:$0xff] }
 0x540   : > { %vm3426_vm6 = vmand %vm3386_vm14, %vm3418_vm11  ;;  %vm10285_vm14 = vnez %v10284_v18  ;;  %vm10287_vm11 = vnez %v10286_v15 }
 0x541   : > { %v3003_v60 = vpop.permute.xlu1 %3002  ;;  %vm2945_vm3 = vmand %vm10287_vm11, %vm10285_vm14 }
 0x542   : > { %5292 = vset.pattern.permute.xlu1 %v9588_v41  ;;  %v3005_v23 = vpop.permute.xlu0 %3004  ;;  %vm3014_vm1 = vcmp.ne.s32.totalorder %v3003_v60, 0  ;;  %v10292_v60 = vld [vmem:[#allocation95_spill] sm:$0xff] }
 0x543   : > { %5294 = vperm.xlu1 %5292, %v5293_v6   ;;  %vm3015_vm4 = vcmp.ne.s32.totalorder %v3005_v23, 0  ;;  %vm3022_vm5 = vmand %vm2982_vm2, %vm3014_vm1  ;;  %v10288_v6 = vld [vmem:[#allocation88_spill] sm:$0xff]  ;;  %vm10291_vm2 = vnez %v10290_v9  ;;  %vm10293_vm1 = vnez %v10292_v60 }
 0x544   : > { %vm3023_vm15 = vmand %vm2983_vm8, %vm3015_vm4  ;;  %vm10289_vm13 = vnez %v10288_v6 }
 0x545   : > { %v3446_v49 = vpop.permute.xlu1 %3445  ;;  %vm2944_vm4 = vmand %vm10291_vm2, %vm10289_vm13 }
 0x546   : > { %v3448_v7 = vpop.permute.xlu0 %3447  ;;  %vm3457_vm0 = vcmp.ne.s32.totalorder %v3446_v49, 0 }
 0x547   : > { %5298 = vset.pattern.permute.xlu1 %v9618_v59  ;;  %vm3458_vm7 = vcmp.ne.s32.totalorder %v3448_v7, 0  ;;  %vm3465_vm10 = vmand %vm3425_vm12, %vm3457_vm0  ;;  %vm10295_vm12 = vnez %v10294_v33  ;;  %v10296_v7 = vld [vmem:[#allocation92_spill] sm:$0xff] }
 0x548   : > { %vm3466_vm9 = vmand %vm3426_vm6, %vm3458_vm7  ;;  %vm10297_vm0 = vnez %v10296_v7 }
 0x549   : > { %v3107_v44 = vpop.permute.xlu1 %3106  ;;  %vm3388_vm7 = vmand %vm10295_vm12, %vm10293_vm1 }
 0x54a   : > { %v8767_v5 = vpop.permute.xlu0 %3108  ;;  %v3118_v46 = vadd.s32 %v3107_v44, %v3094_v58 }
 0x54c   : > { %3135 = vperm.xlu1 %5298, %v3118_v46  }
 0x54d   : > { %v8777_v53 = vpop.permute.xlu1 %3549 }
 0x54e   : > { %v3552_v16 = vpop.permute.xlu0 %3551 }
 0x54f   : > { %v3562_v63 = vadd.s32 %v3552_v16, %v3538_v34  ;;  %v10300_v16 = vld [vmem:[#allocation65_spill] sm:$0xff] }
 0x550   : > { %5299 = vset.pattern.permute.xlu1 %v9588_v41 }
 0x551   : > { %v5206_v54 = vpop.permute.xlu1 %5205 }
 0x552   : > { %v5211_v12 = vpop.permute.xlu0 %5210  ;;  %v5208_v47 = vunpack.i.h.bf16 %v5206_v54  ;;  %v5207_v27 = vunpack.i.l.bf16 %v5206_v54  ;;  %v10302_v54 = vld [vmem:[#allocation63_spill] sm:$0xff] }
 0x553   : > { %v5213_v11 = vunpack.i.h.bf16 %v5211_v12  ;;  %v5212_v43 = vunpack.i.l.bf16 %v5211_v12  ;;  %v10301_v12 = vld [vmem:[#allocation37_spill] sm:$0xff] }
 0x554   : > { %v3063_v3 = vsel %vm3023_vm15, %v5208_v47, 0.0  ;;  %v3062_v22 = vsel %vm3022_vm5, %v5207_v27, 0.0  ;;  %vm10299_vm5 = vnez %v10298_v40 }
 0x555   : > { %v3506_v52 = vsel %vm3466_vm9, %v5213_v11, 0.0  ;;  %v3505_v45 = vsel %vm3465_vm10, %v5212_v43, 0.0  ;;  %v5300_v21 = vpack.i.bf16 %v3063_v3, %v3062_v22  ;;  %v2967_v28 = vpop.permute.xlu1 %2966  ;;  %vm3387_vm9 = vmand %vm10299_vm5, %vm10297_vm0  ;;  %v10304_v22 = vld [vmem:[#allocation68_spill] sm:$0xff] }
 0x556   : > { %v5306_v2 = vpack.i.bf16 %v3506_v52, %v3505_v45  ;;  %v2969_v32 = vpop.permute.xlu0 %2968  ;;  %vm2976_vm6 = vcmp.ne.s32.totalorder %v2967_v28, 0 }
 0x557   : > { %5301 = vperm.xlu1 %5299, %v5300_v21   ;;  %vm2977_vm8 = vcmp.ne.s32.totalorder %v2969_v32, 0  ;;  %vm2984_vm11 = vmand %vm2944_vm4, %vm2976_vm6 }
 0x558   : > { %5307 = vperm.xlu0 %5257, %v5306_v2   ;;  %vm2985_vm10 = vmand %vm2945_vm3, %vm2977_vm8  ;;  %v10305_v2 = vld [vmem:[#allocation69_spill] sm:$0xff] }
 0x559   : > { %v3410_v10 = vpop.permute.xlu1 %3409 }
 0x55a   : > { %v3412_v48 = vpop.permute.xlu0 %3411  ;;  %vm3419_vm14 = vcmp.ne.s32.totalorder %v3410_v10, 0 }
 0x55b   : > { %5305 = vset.pattern.permute.xlu1 %v9618_v59  ;;  %vm3420_vm15 = vcmp.ne.s32.totalorder %v3412_v48, 0  ;;  %vm3427_vm12 = vmand %vm3387_vm9, %vm3419_vm14  ;;  %vm2260_vm9 = vcmp.eq.s32.totalorder %v10303_v38, %v10300_v16 }
 0x55c   : > { %3581 = vperm.xlu1 %5305, %v3562_v63   ;;  %vm3428_vm2 = vmand %vm3388_vm7, %vm3420_vm15  ;;  %vm2261_vm7 = vcmp.eq.s32.totalorder %v10301_v12, %v10300_v16  ;;  %vm2263_vm15 = vcmp.eq.s32.totalorder %v10301_v12, %v10302_v54  ;;  %v10322_v16 = vld [vmem:[#allocation11_spill] sm:$0xff] }
 0x55d   : > { %v3007_v61 = vpop.permute.xlu1 %3006  ;;  %vm4559_vm14 = vmpackc.low %vm2263_vm15, %vm2261_vm7 }
 0x55e   : > { %v3009_v26 = vpop.permute.xlu0 %3008  ;;  %vm3016_vm1 = vcmp.ne.s32.totalorder %v3007_v61, 0 }
 0x55f   : > { %vm3017_vm13 = vcmp.ne.s32.totalorder %v3009_v26, 0  ;;  %vm3024_vm8 = vmand %vm2984_vm11, %vm3016_vm1  ;;  %vm2266_vm1 = vcmp.eq.s32.totalorder %v10303_v38, %v10304_v22  ;;  %v10308_v26 = vld [vmem:[#allocation79_spill] sm:$0xff] }
 0x560   : > { %vm3025_vm5 = vmand %vm2985_vm10, %vm3017_vm13  ;;  %vm2262_vm10 = vcmp.eq.s32.totalorder %v10303_v38, %v10302_v54  ;;  %vm2267_vm13 = vcmp.eq.s32.totalorder %v10301_v12, %v10304_v22  ;;  %v10309_v61 = vcvt.f32.s32 %v10308_v26  ;;  %v10325_v54 = vld [vmem:[#allocation12_spill] sm:$0xff] }
 0x561   : > { %v3450_v35 = vpop.permute.xlu1 %3449  ;;  %vm4562_vm11 = vmpackc.low %vm2262_vm10, %vm2260_vm9 }
 0x562   : > { %v3452_v4 = vpop.permute.xlu0 %3451  ;;  %vm3459_vm3 = vcmp.ne.s32.totalorder %v3450_v35, 0 }
 0x563   : > { %vm3460_vm0 = vcmp.ne.s32.totalorder %v3452_v4, 0  ;;  %vm3467_vm6 = vmand %vm3427_vm12, %vm3459_vm3  ;;  %vm2264_vm12 = vcmp.eq.s32.totalorder %v10303_v38, %v10305_v2  ;;  %v3537_v4 = vmul.u32 16, %v10309_v61 }
 0x564   : > { %vm3468_vm4 = vmand %vm3428_vm2, %vm3460_vm0  ;;  %vm2265_vm2 = vcmp.eq.s32.totalorder %v10301_v12, %v10305_v2 }
 0x565   : > { %v3111_v23 = vpop.permute.xlu1 %3110  ;;  %vm4565_vm0 = vmpackc.low %vm2267_vm13, %vm2265_vm2 }
 0x566   : > { %v3113_v19 = vpop.permute.xlu0 %3112  ;;  %v3120_v37 = vadd.s32 %v3111_v23, %v3096_v55  ;;  %v3540_v55 = vmul.u32 16, %v4909_v36  ;;  %v10311_v23 = vld [vmem:[#allocation73_spill] sm:$0xff] }
 0x567   : > { %v3121_v13 = vadd.s32 %v3113_v19, %v3097_v30  ;;  %v10310_v19 = vld [vmem:[#allocation72_spill] sm:$0xff]  ;;  %vm2269_vm10 = vcmp.eq.s32.totalorder %v10301_v12, %v10311_v23 }
 0x568   : > { %3141 = vperm.xlu1 %5305, %v3120_v37   ;;  %vm2271_vm9 = vcmp.eq.s32.totalorder %v10301_v12, %v10310_v19 }
 0x569   : > { %v3554_v57 = vpop.permute.xlu1 %3553 }
 0x56a   : > { %v8803_v49 = vpop.permute.xlu0 %3555  ;;  %v3563_v58 = vadd.s32 %v3554_v57, %v3539_v0 }
 0x56b   : > { %v3564_v60 = vadd.s32 %v8803_v49, %v3540_v55 }
 0x56c   : > { %3144 = vperm.xlu1 %5305, %v3121_v13  }
 0x56d   : > { %v5216_v1 = vpop.permute.xlu1 %5215 }
 0x56e   : > { %v5221_v39 = vpop.permute.xlu0 %5220  ;;  %v5218_v44 = vunpack.i.h.bf16 %v5216_v1  ;;  %v5217_v42 = vunpack.i.l.bf16 %v5216_v1 }
 0x56f   : > { %v5223_v29 = vunpack.i.h.bf16 %v5221_v39  ;;  %v5222_v31 = vunpack.i.l.bf16 %v5221_v39  ;;  %v10313_v39 = vld [vmem:[#allocation78_spill] sm:$0xff] }
 0x570   : > { %v3065_v24 = vsel %vm3025_vm5, %v5218_v44, 0.0  ;;  %v3064_v46 = vsel %vm3024_vm8, %v5217_v42, 0.0  ;;  %3584 = vperm.xlu1 %5305, %v3563_v58   ;;  %vm4568_vm5 = vmpackc.low %vm2266_vm1, %vm2264_vm12  ;;  %vm2270_vm1 = vcmp.eq.s32.totalorder %v10303_v38, %v10310_v19  ;;  %vm2268_vm12 = vcmp.eq.s32.totalorder %v10303_v38, %v10311_v23  ;;  %v10312_v58 = vld [vmem:[#allocation77_spill] sm:$0xff]  ;;  %v10314_v44 = vld [vmem:[#allocation8_spill] sm:$0xff] }
 0x571   : > { %v3508_v8 = vsel %vm3468_vm4, %v5223_v29, 0.0  ;;  %v3507_v62 = vsel %vm3467_vm6, %v5222_v31, 0.0  ;;  %v5311_v25 = vpack.i.bf16 %v3065_v24, %v3064_v46  ;;  %v5227_v20 = vpop.permute.xlu1 %5226 }
 0x572   : > { %v2681_v11 = vpop.permute.xlu0 %2680  ;;  %v5229_v43 = vunpack.i.h.bf16 %v5227_v20  ;;  %v5228_v47 = vunpack.i.l.bf16 %v5227_v20  ;;  %v5318_v27 = vpack.i.bf16 %v3508_v8, %v3507_v62  ;;  %v10316_v8 = vmov 0.0   ;;  %v10319_v20 = vld [vmem:[#allocation10_spill] sm:$0xff] }
 0x573   : > { %5312 = vperm.xlu0 %5257, %v5311_v25   ;;  %vm2704_vm4 = vcmp.eq.s32.totalorder %v10301_v12, %v2681_v11  ;;  %vm2703_vm7 = vcmp.eq.s32.totalorder %v10303_v38, %v2681_v11  ;;  %v10317_v25 = vld [vmem:[#allocation9_spill] sm:$0xff] }
 0x574   : > { %v4558_v51 = vpack.c.bf16 %v5229_v43, %v5228_v47  ;;  %5317 = vset.pattern.permute.xlu1 %v9588_v41  ;;  %v10328_v11 = vld [vmem:[#allocation13_spill] sm:$0xff]  ;;  %v10331_v43 = vld [vmem:[#allocation14_spill] sm:$0xff]  ;;  %v10333_v47 = vld [vmem:[#allocation15_spill] sm:$0xff] }
 0x575   : > { %5319 = vperm.xlu1 %5317, %v5318_v27  }
 0x576   : > { %v8816_v34 = vpop.permute.xlu0 %2689  ;;  %v2684_v52 = vpop.permute.xlu1 %2683  ;;  %4560 = vmatprep.subr.msk.bf16.mxu0 %vm4559_vm14, %v4558_v51 }
 0x577   : > { %5316 = vset.pattern.permute.xlu0 %v9618_v59  ;;  %4563 = vmatpush1.bf16.msk.msra.mxu0 %vm4562_vm11, %v4558_v51  ;;  %v10306_v59 = vld [vmem:[#allocation76_spill] sm:$0xff]  ;;  %vm2706_vm3 = vcmp.eq.s32.totalorder %v10301_v12, %v2684_v52  ;;  %vm2705_vm8 = vcmp.eq.s32.totalorder %v10303_v38, %v2684_v52  ;;  %vm2710_vm14 = vcmp.eq.s32.totalorder %v10301_v12, %v8816_v34 }
 0x578   : > { %3126 = vperm.xlu0 %5316, %v8659_v56   ;;  %v10307_v56 = vcvt.f32.s32 %v10306_v59  ;;  %vm4583_vm15 = vmpackc.low %vm2706_vm3, %vm2704_vm4 }
 0x579   : > { %vm4586_vm11 = vmpackc.low %vm2705_vm8, %vm2703_vm7 }
 0x57a   : > { %v8820_v45 = vpop.permute.xlu0 %2692  ;;  %v3095_v28 = vmul.u32 16, %v10307_v56  ;;  %vm4574_vm8 = vmpackc.low %vm2270_vm1, %vm2268_vm12 }
 0x57b   : > { %v5234_v3 = vpop.permute.xlu1 %5233  ;;  %vm2712_vm4 = vcmp.eq.s32.totalorder %v10301_v12, %v8820_v45 }
 0x57c   : > { %v5236_v21 = vunpack.i.h.bf16 %v5234_v3  ;;  %v5235_v32 = vunpack.i.l.bf16 %v5234_v3  ;;  %3566 = vperm.xlu0 %5316, %v8688_v17   ;;  %v3119_v17 = vadd.s32 %v8767_v5, %v3095_v28 }
 0x57e   : > { %v4564_v63 = vpack.c.bf16 %v5236_v21, %v5235_v32 }
 0x57f   : > { %v8833_v48 = vpop.permute.xlu0 %2701 }
 0x580   : > { %3575 = vperm.xlu0 %5316, %v8745_v14   ;;  %v2687_v10 = vpop.permute.xlu1 %2686  ;;  %4566 = vmatprep.subr.msk.bf16.mxu0 %vm4565_vm0, %v4564_v63  ;;  %v3561_v14 = vadd.s32 %v8777_v53, %v3537_v4  ;;  %vm2709_vm0 = vcmp.eq.s32.totalorder %v10303_v38, %v8816_v34 }
 0x581   : > { %4569 = vmatpush1.bf16.msk.msra.mxu0 %vm4568_vm5, %v4564_v63  ;;  %vm2708_vm6 = vcmp.eq.s32.totalorder %v10301_v12, %v2687_v10  ;;  %vm2707_vm13 = vcmp.eq.s32.totalorder %v10303_v38, %v2687_v10  ;;  %vm4571_vm5 = vmpackc.low %vm2271_vm9, %vm2269_vm10  ;;  %vm2275_vm10 = vcmp.eq.s32.totalorder %v10301_v12, %v10312_v58 }
 0x582   : > { %vm4589_vm2 = vmpackc.low %vm2710_vm14, %vm2708_vm6 }
 0x583   : > { %vm4592_vm3 = vmpackc.low %vm2709_vm0, %vm2707_vm13  ;;  %vm2274_vm13 = vcmp.eq.s32.totalorder %v10303_v38, %v10312_v58  ;;  %vm10315_vm0 = vcmask 523264  }
 0x584   : > { %3138 = vperm.xlu0 %5316, %v3119_v17   ;;  %v5260_v35 = vpop.permute.xlu0 %5259 }
 0x585   : > { %v5262_v18 = vunpack.i.h.bf16 %v5260_v35  ;;  %v5261_v15 = vunpack.i.l.bf16 %v5260_v35 }
 0x587   : > { %v4582_v5 = vpack.c.bf16 %v5262_v18, %v5261_v15 }
 0x588   : > { %3578 = vperm.xlu0 %5316, %v3561_v14  }
 0x589   : > { %v5241_v30 = vpop.permute.xlu1 %5240  ;;  %4584 = vmatprep.subr.msk.bf16.mxu1 %vm4583_vm15, %v4582_v5  ;;  %vm2711_vm15 = vcmp.eq.s32.totalorder %v10303_v38, %v8820_v45 }
 0x58a   : > { %v5243_v6 = vunpack.i.h.bf16 %v5241_v30  ;;  %v5242_v9 = vunpack.i.l.bf16 %v5241_v30  ;;  %4587 = vmatpush1.bf16.msk.msra.mxu1 %vm4586_vm11, %v4582_v5  ;;  %vm2273_vm11 = vcmp.eq.s32.totalorder %v10301_v12, %v10313_v39 }
 0x58b   : > { %vm4577_vm1 = vmpackc.low %vm2275_vm10, %vm2273_vm11 }
 0x58c   : > { %v4588_v50 = vpack.c.bf16 %v5243_v6, %v5242_v9  ;;  %3587 = vperm.xlu0 %5316, %v3564_v60   ;;  %vm10323_vm10 = vmmov %vm10315_vm0 }
 0x58d   : > { %v5265_v36 = vpop.permute.xlu0 %5264  ;;  %vm10324_vm11 = vmmov %vm10315_vm0 }
 0x58e   : > { %v5246_v53 = vpop.permute.xlu1 %5245  ;;  %v5267_v7 = vunpack.i.h.bf16 %v5265_v36  ;;  %v5266_v40 = vunpack.i.l.bf16 %v5265_v36  ;;  %4590 = vmatprep.subr.msk.bf16.mxu1 %vm4589_vm2, %v4588_v50  ;;  %vm2272_vm2 = vcmp.eq.s32.totalorder %v10303_v38, %v10313_v39 }
 0x58f   : > { %v5248_v33 = vunpack.i.h.bf16 %v5246_v53  ;;  %v5247_v37 = vunpack.i.l.bf16 %v5246_v53  ;;  %4593 = vmatpush1.bf16.msk.msra.mxu1 %vm4592_vm3, %v4588_v50  ;;  %vm4580_vm12 = vmpackc.low %vm2274_vm13, %vm2272_vm2 }
 0x590   : > { %v4594_v0 = vpack.c.bf16 %v5267_v7, %v5266_v40  ;;  %5323 = vset.pattern.permute.xlu0 %v9588_v41  ;;  %vm10326_vm13 = vmmov %vm10315_vm0 }
 0x591   : > { %v4570_v13 = vpack.c.bf16 %v5248_v33, %v5247_v37  ;;  %vm10327_vm2 = vmmov %vm10315_vm0 }
 0x593   : > { %v2696_v49 = vpop.permute.xlu1 %2695  ;;  %4572 = vmatprep.subr.msk.bf16.mxu0 %vm4571_vm5, %v4570_v13 }
 0x594   : > { %vm2713_vm6 = vcmp.eq.s32.totalorder %v10303_v38, %v2696_v49  ;;  %vm2714_vm7 = vcmp.eq.s32.totalorder %v10301_v12, %v2696_v49  ;;  %4575 = vmatpush1.bf16.msk.msra.mxu0 %vm4574_vm8, %v4570_v13  ;;  %vm2718_vm8 = vcmp.eq.s32.totalorder %v10301_v12, %v8833_v48 }
 0x595   : > { %vm4595_vm14 = vmpackc.low %vm2714_vm7, %vm2712_vm4 }
 0x596   : > { %vm4598_vm9 = vmpackc.low %vm2713_vm6, %vm2711_vm15  ;;  %4596 = vmatprep.subr.msk.bf16.mxu1 %vm4595_vm14, %v4594_v0  ;;  %vm2717_vm6 = vcmp.eq.s32.totalorder %v10303_v38, %v8833_v48 }
 0x597   : > { %4599 = vmatpush1.bf16.msk.msra.mxu1 %vm4598_vm9, %v4594_v0  ;;  %vm10318_vm4 = vmmov %vm10315_vm0 }
 0x598   : > { %v5253_v57 = vpop.permute.xlu1 %5252  ;;  %vm10320_vm14 = vmmov %vm10315_vm0 }
 0x599   : > { %v5255_v1 = vunpack.i.h.bf16 %v5253_v57  ;;  %v5254_v29 = vunpack.i.l.bf16 %v5253_v57  ;;  %vm10321_vm9 = vmmov %vm10315_vm0 }
 0x59b   : > { %v4576_v31 = vpack.c.bf16 %v5255_v1, %v5254_v29 }
 0x59d   : > { %v2699_v41 = vpop.permute.xlu1 %2698  ;;  %4578 = vmatprep.subr.msk.bf16.mxu0 %vm4577_vm1, %v4576_v31  ;;  %vm10329_vm1 = vmmov %vm10315_vm0 }
 0x59e   : > { %4581 = vmatpush1.bf16.msk.msra.mxu0 %vm4580_vm12, %v4576_v31  ;;  %vm2716_vm5 = vcmp.eq.s32.totalorder %v10301_v12, %v2699_v41  ;;  %vm2715_vm3 = vcmp.eq.s32.totalorder %v10303_v38, %v2699_v41  ;;  %vm10330_vm12 = vmmov %vm10315_vm0 }
 0x59f   : > { %vm4601_vm7 = vmpackc.low %vm2718_vm8, %vm2716_vm5 }
 0x5a0   : > { %vm4604_vm15 = vmpackc.low %vm2717_vm6, %vm2715_vm3  ;;  %v5284_v2 = vpop.permute.xlu0 %5283 }
 0x5a1   : > { %4214 = vmatmul.mubr.msk.f32.vlgmr.msra.gmra.mrb[32].mxu0 %vm10315_vm0, %v10314_v44  ;;  %vm10332_vm5 = vmmov %vm10315_vm0  ;;  %v5286_v4 = vunpack.i.h.bf16 %v5284_v2  ;;  %v5285_v35 = vunpack.i.l.bf16 %v5284_v2 }
 0x5a2   : > { %v5271_v42 = vpop.permute.xlu1 %5270  ;;  %2402 = vmatprep.mubr.f32.mxu0 %v10316_v8  ;;  %vm10334_vm3 = vmmov %vm10315_vm0 }
 0x5a3   : > { %v5273_v62 = vunpack.i.h.bf16 %v5271_v42  ;;  %v5272_v24 = vunpack.i.l.bf16 %v5271_v42  ;;  %vm10335_vm8 = vmmov %vm10315_vm0  ;;  %v4630_v5 = vpack.c.bf16 %v5286_v4, %v5285_v35 }
 0x5a4   : > { %vm10337_vm6 = vmmov %vm10315_vm0 }
 0x5a5   : > { %v4600_v46 = vpack.c.bf16 %v5273_v62, %v5272_v24  ;;  %4215 = vmatmul.mubr.msk.f32.gmra.mrb[34].mxu0 %vm10318_vm4, %v10317_v25  ;;  %vm10336_vm4 = vmmov %vm10315_vm0 }
 0x5a6   : > { %2408 = vmatprep.mubr.f32.mxu0 %v10316_v8 }
 0x5a7   : > { %4602 = vmatprep.subr.msk.bf16.mxu1 %vm4601_vm7, %v4600_v46  ;;  %v3124_v27 = vpop.permute.xlu1 %3123 }
 0x5a8   : > { %4605 = vmatpush1.bf16.msk.msra.mxu1 %vm4604_vm15, %v4600_v46  ;;  %vm3147_vm7 = vcmp.eq.s32.totalorder %v10301_v12, %v3124_v27 }
 0x5a9   : > { %4216 = vmatmul.mubr.msk.f32.gmra.mrb[36].mxu0 %vm10320_vm14, %v10319_v20 }
 0x5aa   : > { %2414 = vmatprep.mubr.f32.mxu0 %v10316_v8 }
 0x5ab   : > { %4286 = vmatmul.mubr.msk.f32.vlgmr.msra.gmra.mrb[32].mxu1 %vm10321_vm9, %v10314_v44 }
 0x5ac   : > { %2845 = vmatprep.mubr.f32.mxu1 %v10316_v8  ;;  %v5278_v51 = vpop.permute.xlu1 %5277 }
 0x5ad   : > { %4217 = vmatmul.mubr.msk.f32.gmra.mrb[38].mxu0 %vm10323_vm10, %v10322_v16  ;;  %v5280_v10 = vunpack.i.h.bf16 %v5278_v51  ;;  %v5279_v17 = vunpack.i.l.bf16 %v5278_v51  ;;  %vm3146_vm10 = vcmp.eq.s32.totalorder %v10303_v38, %v3124_v27 }
 0x5ae   : > { %2420 = vmatprep.mubr.f32.mxu0 %v10316_v8 }
 0x5af   : > { %4287 = vmatmul.mubr.msk.f32.gmra.mrb[34].mxu1 %vm10324_vm11, %v10317_v25  ;;  %v4606_v18 = vpack.c.bf16 %v5280_v10, %v5279_v17 }
 0x5b0   : > { %2851 = vmatprep.mubr.f32.mxu1 %v10316_v8 }
 0x5b1   : > { %4218 = vmatmul.mubr.msk.f32.gmra.mrb[40].mxu0 %vm10326_vm13, %v10325_v54  ;;  %v3570_v34 = vpop.permute.xlu1 %3569 }
 0x5b2   : > { %2426 = vmatprep.mubr.f32.mxu0 %v10316_v8 }
 0x5b3   : > { %4288 = vmatmul.mubr.msk.f32.gmra.mrb[36].mxu1 %vm10327_vm2, %v10319_v20 }
 0x5b4   : > { %2857 = vmatprep.mubr.f32.mxu1 %v10316_v8 }
 0x5b5   : > { %4219 = vmatmul.mubr.msk.f32.gmra.mrb[42].mxu0 %vm10329_vm1, %v10328_v11  ;;  %v3130_v52 = vpop.permute.xlu1 %3129 }
 0x5b6   : > { %2432 = vmatprep.mubr.f32.mxu0 %v10316_v8  ;;  %vm3151_vm2 = vcmp.eq.s32.totalorder %v10301_v12, %v3130_v52 }
 0x5b7   : > { %4289 = vmatmul.mubr.msk.f32.gmra.mrb[38].mxu1 %vm10330_vm12, %v10322_v16  ;;  %vm3150_vm12 = vcmp.eq.s32.totalorder %v10303_v38, %v3130_v52 }
 0x5b8   : > { %2863 = vmatprep.mubr.f32.mxu1 %v10316_v8 }
 0x5b9   : > { %4220 = vmatmul.mubr.msk.f32.gmra.mrb[44].mxu0 %vm10315_vm0, %v10331_v43  ;;  %v3133_v45 = vpop.permute.xlu1 %3132 }
 0x5ba   : > { %2438 = vmatprep.mubr.f32.mxu0 %v10316_v8  ;;  %v5289_v32 = vpop.permute.xlu0 %5288  ;;  %vm3153_vm15 = vcmp.eq.s32.totalorder %v10301_v12, %v3133_v45  ;;  %vm3152_vm11 = vcmp.eq.s32.totalorder %v10303_v38, %v3133_v45 }
 0x5bb   : > { %4290 = vmatmul.mubr.msk.f32.gmra.mrb[40].mxu1 %vm10332_vm5, %v10325_v54  ;;  %v5291_v26 = vunpack.i.h.bf16 %v5289_v32  ;;  %v5290_v61 = vunpack.i.l.bf16 %v5289_v32  ;;  %vm4613_vm0 = vmpackc.low %vm3153_vm15, %vm3151_vm2  ;;  %vm3592_vm5 = vcmp.eq.s32.totalorder %v10301_v12, %v3570_v34 }
 0x5bc   : > { %2869 = vmatprep.mubr.f32.mxu1 %v10316_v8 }
 0x5bd   : > { %4221 = vmatmul.mubr.msk.f32.gmra.mrb[46].mxu0 %vm10334_vm3, %v10333_v47  ;;  %v3573_v3 = vpop.permute.xlu1 %3572  ;;  %v4612_v30 = vpack.c.bf16 %v5291_v26, %v5290_v61  ;;  %vm4616_vm3 = vmpackc.low %vm3152_vm11, %vm3150_vm12 }
 0x5be   : > { %3282 = vmatprep.mubr.f32.mxu0 %v10316_v8  ;;  %vm3594_vm15 = vcmp.eq.s32.totalorder %v10301_v12, %v3573_v3  ;;  %vm3593_vm11 = vcmp.eq.s32.totalorder %v10303_v38, %v3573_v3 }
 0x5bf   : > { %4291 = vmatmul.mubr.msk.f32.gmra.mrb[42].mxu1 %vm10335_vm8, %v10328_v11 }
 0x5c0   : > { %2875 = vmatprep.mubr.f32.mxu1 %v10316_v8 }
 0x5c2   : > { %v5295_v22 = vpop.permute.xlu1 %5294 }
 0x5c3   : > { %4292 = vmatmul.mubr.msk.f32.gmra.mrb[44].mxu1 %vm10336_vm4, %v10331_v43  ;;  %v5297_v14 = vunpack.i.h.bf16 %v5295_v22  ;;  %v5296_v6 = vunpack.i.l.bf16 %v5295_v22 }
 0x5c4   : > { %2881 = vmatprep.mubr.f32.mxu1 %v10316_v8 }
 0x5c5   : > { %v4636_v50 = vpack.c.bf16 %v5297_v14, %v5296_v6 }
 0x5c7   : > { %4293 = vmatmul.mubr.msk.f32.gmra.mrb[46].mxu1 %vm10337_vm6, %v10333_v47  ;;  %vm3591_vm6 = vcmp.eq.s32.totalorder %v10303_v38, %v3570_v34 }
 0x5c8   : > { %3725 = vmatprep.mubr.f32.mxu1 %v10316_v8 }
 0x5cb   : > { %v8938_v21 = vpop.permute.xlu1 %3135 }
 0x5d6   : > { %v8940_v59 = vpop.permute.xlu1 %5301 }
 0x5d7   : > { %v8942_v56 = vpop.permute.xlu0 %5307  ;;  %v5304_v23 = vunpack.i.h.bf16 %v8940_v59  ;;  %v5303_v53 = vunpack.i.l.bf16 %v8940_v59 }
 0x5d8   : > { %v5310_v37 = vunpack.i.h.bf16 %v8942_v56  ;;  %v5309_v7 = vunpack.i.l.bf16 %v8942_v56 }
 0x5d9   : > { %v4618_v13 = vpack.c.bf16 %v5304_v23, %v5303_v53 }
 0x5da   : > { %v4642_v57 = vpack.c.bf16 %v5310_v37, %v5309_v7 }
 0x5db   : > { %v8944_v28 = vpop.permute.xlu1 %3581 }
 0x5e7   : > { %v8948_v48 = vpop.permute.xlu1 %3141 }
 0x5eb   : > { %v3145_v15 = vpop.permute.xlu1 %3144 }
 0x5ec   : > { %vm3161_vm12 = vcmp.eq.s32.totalorder %v10301_v12, %v3145_v15 }
 0x5ef   : > { %v3585_v36 = vpop.permute.xlu1 %3584 }
 0x5f2   : > { %v8946_v63 = vpop.permute.xlu0 %5312 }
 0x5f3   : > { %v5315_v60 = vunpack.i.h.bf16 %v8946_v63  ;;  %v5314_v33 = vunpack.i.l.bf16 %v8946_v63 }
 0x5f4   : > { %v5320_v49 = vpop.permute.xlu1 %5319 }
 0x5f5   : > { %v4624_v0 = vpack.c.bf16 %v5315_v60, %v5314_v33  ;;  %v5322_v39 = vunpack.i.h.bf16 %v5320_v49  ;;  %v5321_v1 = vunpack.i.l.bf16 %v5320_v49 }
 0x5f7   : > { %v3127_v55 = vpop.permute.xlu0 %3126  ;;  %v4648_v31 = vpack.c.bf16 %v5322_v39, %v5321_v1 }
 0x5f8   : > { %vm3148_vm14 = vcmp.eq.s32.totalorder %v10303_v38, %v3127_v55  ;;  %vm3149_vm9 = vcmp.eq.s32.totalorder %v10301_v12, %v3127_v55 }
 0x5f9   : > { %vm4607_vm13 = vmpackc.low %vm3149_vm9, %vm3147_vm7 }
 0x5fa   : > { %vm4610_vm1 = vmpackc.low %vm3148_vm14, %vm3146_vm10  ;;  %4608 = vmatprep.subr.msk.bf16.mxu0 %vm4607_vm13, %v4606_v18 }
 0x5fb   : > { %v3567_v9 = vpop.permute.xlu0 %3566  ;;  %4611 = vmatpush1.bf16.msk.msra.mxu0 %vm4610_vm1, %v4606_v18  ;;  %vm3155_vm1 = vcmp.eq.s32.totalorder %v10301_v12, %v8938_v21 }
 0x5fc   : > { %vm3589_vm8 = vcmp.eq.s32.totalorder %v10303_v38, %v3567_v9  ;;  %vm3590_vm4 = vcmp.eq.s32.totalorder %v10301_v12, %v3567_v9  ;;  %4614 = vmatprep.subr.msk.bf16.mxu0 %vm4613_vm0, %v4612_v30 }
 0x5fd   : > { %vm4631_vm7 = vmpackc.low %vm3592_vm5, %vm3590_vm4 }
 0x5fe   : > { %vm4634_vm14 = vmpackc.low %vm3591_vm6, %vm3589_vm8  ;;  %4632 = vmatprep.subr.msk.bf16.mxu1 %vm4631_vm7, %v4630_v5  ;;  %vm3160_vm8 = vcmp.eq.s32.totalorder %v10303_v38, %v3145_v15  ;;  %vm3159_vm6 = vcmp.eq.s32.totalorder %v10301_v12, %v8948_v48 }
 0x5ff   : > { %v3576_v19 = vpop.permute.xlu0 %3575  ;;  %4617 = vmatpush1.bf16.msk.msra.mxu0 %vm4616_vm3, %v4612_v30  ;;  %4635 = vmatpush1.bf16.msk.msra.mxu1 %vm4634_vm14, %v4630_v5  ;;  %vm3154_vm3 = vcmp.eq.s32.totalorder %v10303_v38, %v8938_v21  ;;  %vm3600_vm14 = vcmp.eq.s32.totalorder %v10301_v12, %v8944_v28 }
 0x600   : > { %vm3595_vm9 = vcmp.eq.s32.totalorder %v10303_v38, %v3576_v19  ;;  %vm3596_vm10 = vcmp.eq.s32.totalorder %v10301_v12, %v3576_v19 }
 0x601   : > { %vm4637_vm13 = vmpackc.low %vm3596_vm10, %vm3594_vm15  ;;  %vm3158_vm15 = vcmp.eq.s32.totalorder %v10303_v38, %v8948_v48 }
 0x602   : > { %vm4640_vm2 = vmpackc.low %vm3595_vm9, %vm3593_vm11  ;;  %4638 = vmatprep.subr.msk.bf16.mxu1 %vm4637_vm13, %v4636_v50 }
 0x603   : > { %v3139_v40 = vpop.permute.xlu0 %3138  ;;  %4641 = vmatpush1.bf16.msk.msra.mxu1 %vm4640_vm2, %v4636_v50  ;;  %vm4625_vm9 = vmpackc.low %vm3161_vm12, %vm3159_vm6  ;;  %vm3599_vm2 = vcmp.eq.s32.totalorder %v10303_v38, %v8944_v28  ;;  %vm3602_vm12 = vcmp.eq.s32.totalorder %v10301_v12, %v3585_v36 }
 0x604   : > { %vm3156_vm0 = vcmp.eq.s32.totalorder %v10303_v38, %v3139_v40  ;;  %vm3157_vm5 = vcmp.eq.s32.totalorder %v10301_v12, %v3139_v40  ;;  %vm4628_vm10 = vmpackc.low %vm3160_vm8, %vm3158_vm15  ;;  %vm3601_vm8 = vcmp.eq.s32.totalorder %v10303_v38, %v3585_v36 }
 0x605   : > { %vm4619_vm4 = vmpackc.low %vm3157_vm5, %vm3155_vm1 }
 0x606   : > { %vm4622_vm7 = vmpackc.low %vm3156_vm0, %vm3154_vm3  ;;  %4620 = vmatprep.subr.msk.bf16.mxu0 %vm4619_vm4, %v4618_v13 }
 0x607   : > { %v3579_v58 = vpop.permute.xlu0 %3578  ;;  %4623 = vmatpush1.bf16.msk.msra.mxu0 %vm4622_vm7, %v4618_v13  ;;  %vm10338_vm7 = vcmask 523264  }
 0x608   : > { %vm3597_vm11 = vcmp.eq.s32.totalorder %v10303_v38, %v3579_v58  ;;  %vm3598_vm13 = vcmp.eq.s32.totalorder %v10301_v12, %v3579_v58  ;;  %4626 = vmatprep.subr.msk.bf16.mxu0 %vm4625_vm9, %v4624_v0  ;;  %vm10340_vm15 = vmmov %vm10338_vm7 }
 0x609   : > { %vm4643_vm1 = vmpackc.low %vm3600_vm14, %vm3598_vm13 }
 0x60a   : > { %vm4646_vm0 = vmpackc.low %vm3599_vm2, %vm3597_vm11  ;;  %4644 = vmatprep.subr.msk.bf16.mxu1 %vm4643_vm1, %v4642_v57 }
 0x60b   : > { %v3588_v29 = vpop.permute.xlu0 %3587  ;;  %4629 = vmatpush1.bf16.msk.msra.mxu0 %vm4628_vm10, %v4624_v0  ;;  %4647 = vmatpush1.bf16.msk.msra.mxu1 %vm4646_vm0, %v4642_v57  ;;  %vm10339_vm14 = vmmov %vm10338_vm7 }
 0x60c   : > { %vm3603_vm5 = vcmp.eq.s32.totalorder %v10303_v38, %v3588_v29  ;;  %vm3604_vm3 = vcmp.eq.s32.totalorder %v10301_v12, %v3588_v29  ;;  %vm10341_vm9 = vmmov %vm10338_vm7 }
 0x60d   : > { %vm4649_vm4 = vmpackc.low %vm3604_vm3, %vm3602_vm12 }
 0x60e   : > { %vm4652_vm6 = vmpackc.low %vm3603_vm5, %vm3601_vm8  ;;  %4358 = vmatmul.mubr.msk.f32.vlgmr.msra.gmra.mrb[48].mxu0 %vm10338_vm7, %v10314_v44  ;;  %4650 = vmatprep.subr.msk.bf16.mxu1 %vm4649_vm4, %v4648_v31 }
 0x60f   : > { %4653 = vmatpush1.bf16.msk.msra.mxu1 %vm4652_vm6, %v4648_v31  ;;  %3288 = vmatprep.mubr.f32.mxu0 %v10316_v8  ;;  %vm10342_vm10 = vmmov %vm10338_vm7 }
 0x610   : > { %vm10343_vm11 = vmmov %vm10338_vm7 }
 0x611   : > { %vm10344_vm13 = vmmov %vm10338_vm7 }
 0x612   : > { %4359 = vmatmul.mubr.msk.f32.gmra.mrb[50].mxu0 %vm10339_vm14, %v10317_v25  ;;  %4430 = vmatmul.mubr.msk.f32.vlgmr.msra.gmra.mrb[48].mxu1 %vm10340_vm15, %v10314_v44  ;;  %vm10345_vm2 = vmmov %vm10338_vm7 }
 0x613   : > { %3294 = vmatprep.mubr.f32.mxu0 %v10316_v8  ;;  %3731 = vmatprep.mubr.f32.mxu1 %v10316_v8  ;;  %vm10346_vm1 = vmmov %vm10345_vm2 }
 0x614   : > { %vm10347_vm0 = vmmov %vm10346_vm1 }
 0x615   : > { %vm10348_vm12 = vmmov %vm10347_vm0 }
 0x616   : > { %4360 = vmatmul.mubr.msk.f32.gmra.mrb[52].mxu0 %vm10341_vm9, %v10319_v20  ;;  %4431 = vmatmul.mubr.msk.f32.gmra.mrb[50].mxu1 %vm10342_vm10, %v10317_v25  ;;  %vm10349_vm5 = vmmov %vm10347_vm0 }
 0x617   : > { %3300 = vmatprep.mubr.f32.mxu0 %v10316_v8  ;;  %3737 = vmatprep.mubr.f32.mxu1 %v10316_v8  ;;  %vm10350_vm3 = vmmov %vm10347_vm0 }
 0x618   : > { %vm10351_vm8 = vmmov %vm10347_vm0 }
 0x619   : > { %vm10352_vm4 = vmmov %vm10347_vm0 }
 0x61a   : > { %4361 = vmatmul.mubr.msk.f32.gmra.mrb[54].mxu0 %vm10343_vm11, %v10322_v16  ;;  %4432 = vmatmul.mubr.msk.f32.gmra.mrb[52].mxu1 %vm10344_vm13, %v10319_v20  ;;  %vm10353_vm6 = vmmov %vm10347_vm0 }
 0x61b   : > { %3306 = vmatprep.mubr.f32.mxu0 %v10316_v8  ;;  %3743 = vmatprep.mubr.f32.mxu1 %v10316_v8 }
 0x61e   : > { %4362 = vmatmul.mubr.msk.f32.gmra.mrb[56].mxu0 %vm10345_vm2, %v10325_v54  ;;  %4433 = vmatmul.mubr.msk.f32.gmra.mrb[54].mxu1 %vm10346_vm1, %v10322_v16 }
 0x61f   : > { %3312 = vmatprep.mubr.f32.mxu0 %v10316_v8  ;;  %3749 = vmatprep.mubr.f32.mxu1 %v10316_v8 }
 0x622   : > { %4363 = vmatmul.mubr.msk.f32.gmra.mrb[58].mxu0 %vm10347_vm0, %v10328_v11  ;;  %4434 = vmatmul.mubr.msk.f32.gmra.mrb[56].mxu1 %vm10348_vm12, %v10325_v54 }
 0x623   : > { %3318 = vmatprep.mubr.f32.mxu0 %v10316_v8  ;;  %3755 = vmatprep.mubr.f32.mxu1 %v10316_v8 }
 0x626   : > { %4364 = vmatmul.mubr.msk.f32.gmra.mrb[60].mxu0 %vm10349_vm5, %v10331_v43  ;;  %4435 = vmatmul.mubr.msk.f32.gmra.mrb[58].mxu1 %vm10350_vm3, %v10328_v11 }
 0x627   : > { %3324 = vmatprep.mubr.f32.mxu0 %v10316_v8  ;;  %3761 = vmatprep.mubr.f32.mxu1 %v10316_v8 }
 0x62a   : > { %4365 = vmatmul.mubr.msk.f32.gmra.mrb[62].mxu0 %vm10351_vm8, %v10333_v47  ;;  %4436 = vmatmul.mubr.msk.f32.gmra.mrb[60].mxu1 %vm10352_vm4, %v10331_v43 }
 0x62b   : > { %3767 = vmatprep.mubr.f32.mxu1 %v10316_v8 }
 0x62e   : > { %4437 = vmatmul.mubr.msk.f32.gmra.mrb[62].mxu1 %vm10353_vm6, %v10333_v47 }
 0x674   : > { %v2398_v12 = vpop.f32.mrb[32].mxu0 }
 0x675   : > { %4222 = vst [vmem:[%s7982_s15 + $0x200] sm:$0xff] %v2398_v12  ;;  %v2400_v38 = vpop.f32.mrb[33].mxu0 }
 0x676   : > { %4223 = vst [vmem:[%s7982_s15 + $0x208] sm:$0xff] %v2400_v38 }
 0x678   : > { %v2404_v41 = vpop.f32.mrb[34].mxu0 }
 0x679   : > { %4224 = vst [vmem:[%s7982_s15 + $0x210] sm:$0xff] %v2404_v41  ;;  %v2406_v44 = vpop.f32.mrb[35].mxu0 }
 0x67a   : > { %4225 = vst [vmem:[%s7982_s15 + $0x218] sm:$0xff] %v2406_v44 }
 0x67c   : > { %v2410_v42 = vpop.f32.mrb[36].mxu0 }
 0x67d   : > { %4226 = vst [vmem:[%s7982_s15 + $0x220] sm:$0xff] %v2410_v42  ;;  %v2412_v8 = vpop.f32.mrb[37].mxu0 }
 0x67e   : > { %4227 = vst [vmem:[%s7982_s15 + $0x228] sm:$0xff] %v2412_v8  ;;  %v2841_v62 = vpop.f32.mrb[32].mxu1 }
 0x67f   : > { %4294 = vst [vmem:[%s7982_s15 + $0x280] sm:$0xff] %v2841_v62  ;;  %v2843_v24 = vpop.f32.mrb[33].mxu1 }
 0x680   : > { %4295 = vst [vmem:[%s7982_s15 + $0x288] sm:$0xff] %v2843_v24  ;;  %v2416_v46 = vpop.f32.mrb[38].mxu0 }
 0x681   : > { %4228 = vst [vmem:[%s7982_s15 + $0x230] sm:$0xff] %v2416_v46  ;;  %v2418_v25 = vpop.f32.mrb[39].mxu0 }
 0x682   : > { %4229 = vst [vmem:[%s7982_s15 + $0x238] sm:$0xff] %v2418_v25  ;;  %v2847_v20 = vpop.f32.mrb[34].mxu1 }
 0x683   : > { %4296 = vst [vmem:[%s7982_s15 + $0x290] sm:$0xff] %v2847_v20  ;;  %v2849_v16 = vpop.f32.mrb[35].mxu1 }
 0x684   : > { %4297 = vst [vmem:[%s7982_s15 + $0x298] sm:$0xff] %v2849_v16  ;;  %v2422_v54 = vpop.f32.mrb[40].mxu0 }
 0x685   : > { %4230 = vst [vmem:[%s7982_s15 + $0x240] sm:$0xff] %v2422_v54  ;;  %v2424_v11 = vpop.f32.mrb[41].mxu0 }
 0x686   : > { %4231 = vst [vmem:[%s7982_s15 + $0x248] sm:$0xff] %v2424_v11  ;;  %v2853_v43 = vpop.f32.mrb[36].mxu1 }
 0x687   : > { %4298 = vst [vmem:[%s7982_s15 + $0x2a0] sm:$0xff] %v2853_v43  ;;  %v2855_v47 = vpop.f32.mrb[37].mxu1 }
 0x688   : > { %4299 = vst [vmem:[%s7982_s15 + $0x2a8] sm:$0xff] %v2855_v47  ;;  %v2428_v27 = vpop.f32.mrb[42].mxu0 }
 0x689   : > { %4232 = vst [vmem:[%s7982_s15 + $0x250] sm:$0xff] %v2428_v27  ;;  %v2430_v51 = vpop.f32.mrb[43].mxu0 }
 0x68a   : > { %4233 = vst [vmem:[%s7982_s15 + $0x258] sm:$0xff] %v2430_v51  ;;  %v2859_v34 = vpop.f32.mrb[38].mxu1 }
 0x68b   : > { %4300 = vst [vmem:[%s7982_s15 + $0x2b0] sm:$0xff] %v2859_v34  ;;  %v2861_v52 = vpop.f32.mrb[39].mxu1 }
 0x68c   : > { %4301 = vst [vmem:[%s7982_s15 + $0x2b8] sm:$0xff] %v2861_v52  ;;  %v2434_v45 = vpop.f32.mrb[44].mxu0 }
 0x68d   : > { %4234 = vst [vmem:[%s7982_s15 + $0x260] sm:$0xff] %v2434_v45  ;;  %v2436_v3 = vpop.f32.mrb[45].mxu0 }
 0x68e   : > { %4235 = vst [vmem:[%s7982_s15 + $0x268] sm:$0xff] %v2436_v3  ;;  %v2865_v22 = vpop.f32.mrb[40].mxu1 }
 0x68f   : > { %4302 = vst [vmem:[%s7982_s15 + $0x2c0] sm:$0xff] %v2865_v22  ;;  %v2867_v2 = vpop.f32.mrb[41].mxu1 }
 0x690   : > { %4303 = vst [vmem:[%s7982_s15 + $0x2c8] sm:$0xff] %v2867_v2  ;;  %v2440_v21 = vpop.f32.mrb[46].mxu0 }
 0x691   : > { %4236 = vst [vmem:[%s7982_s15 + $0x270] sm:$0xff] %v2440_v21  ;;  %v2442_v32 = vpop.f32.mrb[47].mxu0 }
 0x692   : > { %4237 = vst [vmem:[%s7982_s15 + $0x278] sm:$0xff] %v2442_v32  ;;  %v2871_v59 = vpop.f32.mrb[42].mxu1 }
 0x693   : > { %4304 = vst [vmem:[%s7982_s15 + $0x2d0] sm:$0xff] %v2871_v59  ;;  %v2873_v56 = vpop.f32.mrb[43].mxu1 }
 0x694   : > { %4305 = vst [vmem:[%s7982_s15 + $0x2d8] sm:$0xff] %v2873_v56 }
 0x696   : > { %v2877_v28 = vpop.f32.mrb[44].mxu1 }
 0x697   : > { %4306 = vst [vmem:[%s7982_s15 + $0x2e0] sm:$0xff] %v2877_v28  ;;  %v2879_v63 = vpop.f32.mrb[45].mxu1 }
 0x698   : > { %4307 = vst [vmem:[%s7982_s15 + $0x2e8] sm:$0xff] %v2879_v63 }
 0x69a   : > { %v2883_v48 = vpop.f32.mrb[46].mxu1 }
 0x69b   : > { %4308 = vst [vmem:[%s7982_s15 + $0x2f0] sm:$0xff] %v2883_v48  ;;  %v2885_v10 = vpop.f32.mrb[47].mxu1 }
 0x69c   : > { %4309 = vst [vmem:[%s7982_s15 + $0x2f8] sm:$0xff] %v2885_v10 }
 0x6e1   : > { %v3284_v17 = vpop.f32.mrb[48].mxu0 }
 0x6e2   : > { %4366 = vst [vmem:[%s7982_s15 + $0x300] sm:$0xff] %v3284_v17  ;;  %v3286_v26 = vpop.f32.mrb[49].mxu0 }
 0x6e3   : > { %4367 = vst [vmem:[%s7982_s15 + $0x308] sm:$0xff] %v3286_v26 }
 0x6e5   : > { %v3290_v61 = vpop.f32.mrb[50].mxu0  ;;  %v3727_v4 = vpop.f32.mrb[48].mxu1 }
 0x6e6   : > { %4368 = vst [vmem:[%s7982_s15 + $0x310] sm:$0xff] %v3290_v61  ;;  %4438 = vst [vmem:[%s7982_s15 + $0x380] sm:$0xff] %v3727_v4  ;;  %v3292_v35 = vpop.f32.mrb[51].mxu0  ;;  %v3729_v55 = vpop.f32.mrb[49].mxu1 }
 0x6e7   : > { %4369 = vst [vmem:[%s7982_s15 + $0x318] sm:$0xff] %v3292_v35  ;;  %4439 = vst [vmem:[%s7982_s15 + $0x388] sm:$0xff] %v3729_v55 }
 0x6e9   : > { %v3296_v18 = vpop.f32.mrb[52].mxu0  ;;  %v3733_v15 = vpop.f32.mrb[50].mxu1 }
 0x6ea   : > { %4370 = vst [vmem:[%s7982_s15 + $0x320] sm:$0xff] %v3296_v18  ;;  %4440 = vst [vmem:[%s7982_s15 + $0x390] sm:$0xff] %v3733_v15  ;;  %v3298_v30 = vpop.f32.mrb[53].mxu0  ;;  %v3735_v14 = vpop.f32.mrb[51].mxu1 }
 0x6eb   : > { %4371 = vst [vmem:[%s7982_s15 + $0x328] sm:$0xff] %v3298_v30  ;;  %4441 = vst [vmem:[%s7982_s15 + $0x398] sm:$0xff] %v3735_v14 }
 0x6ed   : > { %v3302_v6 = vpop.f32.mrb[54].mxu0  ;;  %v3739_v9 = vpop.f32.mrb[52].mxu1 }
 0x6ee   : > { %4372 = vst [vmem:[%s7982_s15 + $0x330] sm:$0xff] %v3302_v6  ;;  %4442 = vst [vmem:[%s7982_s15 + $0x3a0] sm:$0xff] %v3739_v9  ;;  %v3304_v5 = vpop.f32.mrb[55].mxu0  ;;  %v3741_v50 = vpop.f32.mrb[53].mxu1 }
 0x6ef   : > { %4373 = vst [vmem:[%s7982_s15 + $0x338] sm:$0xff] %v3304_v5  ;;  %4443 = vst [vmem:[%s7982_s15 + $0x3a8] sm:$0xff] %v3741_v50 }
 0x6f1   : > { %v3308_v36 = vpop.f32.mrb[56].mxu0  ;;  %v3745_v19 = vpop.f32.mrb[54].mxu1 }
 0x6f2   : > { %4374 = vst [vmem:[%s7982_s15 + $0x340] sm:$0xff] %v3308_v36  ;;  %4444 = vst [vmem:[%s7982_s15 + $0x3b0] sm:$0xff] %v3745_v19  ;;  %v3310_v23 = vpop.f32.mrb[57].mxu0  ;;  %v3747_v53 = vpop.f32.mrb[55].mxu1 }
 0x6f3   : > { %4375 = vst [vmem:[%s7982_s15 + $0x348] sm:$0xff] %v3310_v23  ;;  %4445 = vst [vmem:[%s7982_s15 + $0x3b8] sm:$0xff] %v3747_v53 }
 0x6f5   : > { %v3314_v60 = vpop.f32.mrb[58].mxu0  ;;  %v3751_v33 = vpop.f32.mrb[56].mxu1 }
 0x6f6   : > { %4376 = vst [vmem:[%s7982_s15 + $0x350] sm:$0xff] %v3314_v60  ;;  %4446 = vst [vmem:[%s7982_s15 + $0x3c0] sm:$0xff] %v3751_v33  ;;  %v3316_v37 = vpop.f32.mrb[59].mxu0  ;;  %v3753_v7 = vpop.f32.mrb[57].mxu1 }
 0x6f7   : > { %4377 = vst [vmem:[%s7982_s15 + $0x358] sm:$0xff] %v3316_v37  ;;  %4447 = vst [vmem:[%s7982_s15 + $0x3c8] sm:$0xff] %v3753_v7 }
 0x6f9   : > { %v3320_v40 = vpop.f32.mrb[60].mxu0  ;;  %v3757_v13 = vpop.f32.mrb[58].mxu1 }
 0x6fa   : > { %4378 = vst [vmem:[%s7982_s15 + $0x360] sm:$0xff] %v3320_v40  ;;  %4448 = vst [vmem:[%s7982_s15 + $0x3d0] sm:$0xff] %v3757_v13  ;;  %v3322_v49 = vpop.f32.mrb[61].mxu0  ;;  %v3759_v0 = vpop.f32.mrb[59].mxu1 }
 0x6fb   : > { %4379 = vst [vmem:[%s7982_s15 + $0x368] sm:$0xff] %v3322_v49  ;;  %4449 = vst [vmem:[%s7982_s15 + $0x3d8] sm:$0xff] %v3759_v0 }
 0x6fd   : > { %v3326_v57 = vpop.f32.mrb[62].mxu0  ;;  %v3763_v58 = vpop.f32.mrb[60].mxu1 }
 0x6fe   : > { %4380 = vst [vmem:[%s7982_s15 + $0x370] sm:$0xff] %v3326_v57  ;;  %4450 = vst [vmem:[%s7982_s15 + $0x3e0] sm:$0xff] %v3763_v58  ;;  %v3328_v39 = vpop.f32.mrb[63].mxu0  ;;  %v3765_v1 = vpop.f32.mrb[61].mxu1 }
 0x6ff   : > { %4381 = vst [vmem:[%s7982_s15 + $0x378] sm:$0xff] %v3328_v39  ;;  %4451 = vst [vmem:[%s7982_s15 + $0x3e8] sm:$0xff] %v3765_v1 }
 0x701   : > { %v3769_v29 = vpop.f32.mrb[62].mxu1 }
 0x702   : > { %4452 = vst [vmem:[%s7982_s15 + $0x3f0] sm:$0xff] %v3769_v29  ;;  %v3771_v31 = vpop.f32.mrb[63].mxu1 }
 0x703   : > { %4453 = vst [vmem:[%s7982_s15 + $0x3f8] sm:$0xff] %v3771_v31 }
 0x704   : > { %5337 = shalt.err (!%p5334_p5)
}
 0x705   : > { %s5338_s29 = scalar_lea.hbm %s9109_s24, 16384  ;;  %s5342_s4 = scalar_lea.hbm %s9165_s2, 32768 }
 0x706   : > { %p5339_p6 = scmp.ne.s32.totalorder %s9109_s24, %s5338_s29  ;;  %p5343_p10 = scmp.lt.u32.totalorder %s9109_s24, %s9165_s2 }
 0x707   : > { %p5344_p11 = scmp.lt.u32.totalorder %s5342_s4, %s5338_s29  ;;  %p5346_p13 = scmp.lt.u32.totalorder %s5338_s29, %s9109_s24 }
 0x708   : > { %p5340_p7 = pnand %p5339_p6, %p5468_p4 }
 0x709   : > { %p5345_p12 = por %p5344_p11, %p5343_p10 }
 0x70a   : > { %p5341_p9 = pneg %p5340_p7 }
 0x70b   : > { %p5347_p0 = por %p5346_p13, %p5345_p12 }
 0x70d   : > { %p5348_p1 = pnand %p5347_p0, %p5341_p9 }
 0x70f   : > { %5351 = shalt.err (!%p5348_p1)
}
 0x710   : > { %s5411_s7 = smov 256   ;;  %s5412_s8 = smov 16  }
 0x711   : > { %4910 = dma.vmem_to_hbm [thread:$0]  (%p5468_p4), %s9111_s18, 16384, %s9109_s24, %s9117_s12, %s5411_s7, %s5411_s7, %s5412_s8  }
 0x712 PF: > { %p4916_p2 = scmp.ge.s32.totalorder %s5402_s14, 2  ;;  %s3822_s15 = sand.u32 1, %s5382_s9  }
 0x713   : > { %s3823_s16 = scalar_lea.sflag [#allocation3], %s3822_s15 }
 0x714   : > { %p4913_p3 = pnand %p4916_p2, %p5475_p8 }
 0x716   : > { %5377 = dma.done.wait (!%p4913_p3), %s3823_s16, 16384  }
 0x717   : > { %5379 = vsyncadd (!%p4913_p3), %s3823_s16, 4294950912  ;;  %s15_s14 = sadd.s32 1, %s5402_s14   ;;  %s10354_s9 = smov %s5386_s10 }
 0x718   : > { %p12_p5 = scmp.ge.s32.totalorder %s15_s14, 4   ;;  %s10355_s10 = smov %s5390_s11 }
 0x719   : > { %s10356_s11 = smov %s5481_s22  ;;  %s10357_s12 = smov %s5398_s13 }
 0x71a   : > { %s10358_s13 = smov %s10360_s17  ;;  %14 = sbr.rel (!%p12_p5) target bundleno = 4 (0x4), region = 80 }
 0x721   :  { %3828 = vsyncpa [#allocation3], 1 }
 0x722   :  { %3830 = vsyncpa [#allocation3 + $0x1], 1 }

</bundles_post_ra>
